<compile_context>
chip_gen: v7x
topology: tpu7x:2x2x1
jax: 0.10.0
libtpu: 0.0.40
codegen_flags: <defaults>
</compile_context>

<pallas_src>
import functools

import jax
import jax.numpy as jnp
from jax.experimental import pallas as pl
from jax.experimental.pallas import tpu as pltpu


# ----------------------------------------------------------------------------
# Pallas kernels
# ----------------------------------------------------------------------------
def conv_gemm_kernel(p_ref, w_ref, shift_ref, o_ref):
    """Fused im2col-GEMM + folded-BN shift + LeakyReLU(0.2).

    p_ref:     (TILE_M, K) bf16 im2col patches (M = B*Ho*Wo, K = kh*kw*Cin)
    w_ref:     (K, N)      bf16 conv weight in GEMM form, BN scale pre-folded
    shift_ref: (1, N)      f32  beta - running_mean * scale
    o_ref:     (TILE_M, N) bf16
    """
    acc = jnp.dot(p_ref[...], w_ref[...], preferred_element_type=jnp.float32)
    y = acc + shift_ref[...]
    y = jnp.where(y >= 0, y, 0.2 * y)          # LeakyReLU(0.2), f32 epilogue
    o_ref[...] = y.astype(o_ref.dtype)


def heads_kernel(x_ref, w3_ref, s3_ref, wh_ref, bh_ref, wo_ref, bo_ref,
                 o_ref, *, n_class):
    """Fused conv3(+BN+LeakyReLU) + label head + domain head, per batch tile.

    x_ref:  (TB, 3136) bf16  conv2 output flattened NHWC per sample
    w3_ref: (3136, 288) bf16 conv3 encoded as a structured dense GEMM weight
                             (BN3 scale folded in); columns are the flattened
                             (h_out, w_out, c_out) feature in NHWC order.
    s3_ref: (1, 288) f32     BN3 shift, tiled per spatial position
    wh_ref: (288, 256) bf16  [fc1 | pad | dc1 | pad] hidden weights (NHWC rows)
    bh_ref: (1, 256) f32
    wo_ref: (256, 128) bf16  fc2 into lanes 0..n_class-1, dc2 into lane n_class
    bo_ref: (1, 128) f32
    o_ref:  (TB, 128) f32    lane-dense output slab
    """
    x = x_ref[...]
    # conv3 + BN shift + LeakyReLU(0.2)  (Dropout2d = identity in eval)
    f = jnp.dot(x, w3_ref[...], preferred_element_type=jnp.float32) + s3_ref[...]
    f = jnp.where(f >= 0, f, 0.2 * f)
    # hidden layers of both heads in one GEMM (Dropout = identity in eval)
    h = jnp.dot(f.astype(jnp.bfloat16), wh_ref[...],
                preferred_element_type=jnp.float32) + bh_ref[...]
    h = jnp.maximum(h, 0.0)                    # ReLU
    # output layers of both heads in one GEMM, lane-dense store
    y = jnp.dot(h.astype(jnp.bfloat16), wo_ref[...],
                preferred_element_type=jnp.float32) + bo_ref[...]
    col = jax.lax.broadcasted_iota(jnp.int32, y.shape, 1)
    sig = 0.5 * (jnp.tanh(0.5 * y) + 1.0)      # numerically stable sigmoid
    o_ref[...] = jnp.where(col == n_class, sig, y)


# ----------------------------------------------------------------------------
# Pallas wrappers
# ----------------------------------------------------------------------------
def _round_up(x, m):
    return ((x + m - 1) // m) * m


def _pad_rows(x, target):
    if x.shape[0] == target:
        return x
    pad = ((0, target - x.shape[0]),) + ((0, 0),) * (x.ndim - 1)
    return jnp.pad(x, pad)


def conv_gemm(patches, w_scaled, shift, *, tile_m=512):
    """Tiled (over M) fused conv GEMM + BN shift + LeakyReLU."""
    M, K = patches.shape
    N = w_scaled.shape[1]
    if M >= tile_m:
        tm = tile_m
        Mp = _round_up(M, tm)
    else:
        Mp = _round_up(M, 16)       # bf16 sublane-friendly full block
        tm = Mp
    p = _pad_rows(patches, Mp)
    out = pl.pallas_call(
        conv_gemm_kernel,
        out_shape=jax.ShapeDtypeStruct((Mp, N), jnp.bfloat16),
        grid=(Mp // tm,),
        in_specs=[pl.BlockSpec((tm, K), lambda i: (i, 0)),
                  pl.BlockSpec((K, N), lambda i: (0, 0)),
                  pl.BlockSpec((1, N), lambda i: (0, 0))],
        out_specs=pl.BlockSpec((tm, N), lambda i: (i, 0)),
        compiler_params=pltpu.CompilerParams(
            dimension_semantics=("parallel",),
            vmem_limit_bytes=48 * 1024 * 1024),
    )(p, w_scaled, shift)
    return out[:M] if Mp != M else out


def fused_heads(x2_flat, w3, s3, w_hid, b_hid, w_out, b_out, *,
                n_class, tile_b=256):
    """Batch-tiled fused conv3 + both heads. Returns (B, 128) f32 slab."""
    B, K = x2_flat.shape
    if B >= tile_b:
        tb = tile_b
        Bp = _round_up(B, tb)
    else:
        Bp = _round_up(B, 16)
        tb = Bp
    xp = _pad_rows(x2_flat, Bp)
    kern = functools.partial(heads_kernel, n_class=n_class)
    out = pl.pallas_call(
        kern,
        out_shape=jax.ShapeDtypeStruct((Bp, 128), jnp.float32),
        grid=(Bp // tb,),
        in_specs=[pl.BlockSpec((tb, K), lambda i: (i, 0)),
                  pl.BlockSpec(w3.shape, lambda i: (0, 0)),
                  pl.BlockSpec(s3.shape, lambda i: (0, 0)),
                  pl.BlockSpec(w_hid.shape, lambda i: (0, 0)),
                  pl.BlockSpec(b_hid.shape, lambda i: (0, 0)),
                  pl.BlockSpec(w_out.shape, lambda i: (0, 0)),
                  pl.BlockSpec(b_out.shape, lambda i: (0, 0))],
        out_specs=pl.BlockSpec((tb, 128), lambda i: (i, 0)),
        compiler_params=pltpu.CompilerParams(
            dimension_semantics=("parallel",),
            vmem_limit_bytes=48 * 1024 * 1024),
    )(xp, w3, s3, w_hid, b_hid, w_out, b_out)
    return out[:B]


# ----------------------------------------------------------------------------
# Plain-JAX glue
# ----------------------------------------------------------------------------
def im2col(x_nhwc, k, stride, pad):
    """x: (B, H, W, C) -> patches (B*Ho*Wo, k*k*C) ordered [kh][kw][cin]."""
    B, H, W, C = x_nhwc.shape
    if pad:
        x_nhwc = jnp.pad(x_nhwc, ((0, 0), (pad, pad), (pad, pad), (0, 0)))
    Ho = (H + 2 * pad - k) // stride + 1
    Wo = (W + 2 * pad - k) // stride + 1
    pieces = []
    for kh in range(k):
        for kw in range(k):
            pieces.append(
                x_nhwc[:, kh:kh + Ho * stride:stride,
                       kw:kw + Wo * stride:stride, :])
    p = jnp.stack(pieces, axis=3)              # (B, Ho, Wo, k*k, C)
    return p.reshape(B * Ho * Wo, k * k * C), Ho, Wo


def conv_weight_to_gemm(w_oihw):
    """PyTorch (Cout, Cin, kh, kw) -> (kh*kw*Cin, Cout) matching im2col order."""
    co, ci, kh, kw = w_oihw.shape
    return jnp.transpose(w_oihw, (2, 3, 1, 0)).reshape(kh * kw * ci, co)


def fold_bn(gamma, beta, running_mean, running_var, eps=1e-5):
    scale = gamma / jnp.sqrt(running_var + eps)
    shift = beta - running_mean * scale
    return scale.reshape(1, -1), shift.reshape(1, -1)


def prepare_params(params, n_class=10):
    """One-time weight prep: GEMM layouts, BN folding, bf16 casts, padding."""
    prep = {}
    # conv1 / conv2: fold BN scale into the GEMM weight columns.
    for idx, name in ((1, "conv1_w"), (2, "conv2_w")):
        s, t = fold_bn(params[f"bn{idx}_g"], params[f"bn{idx}_b"],
                       params[f"bn{idx}_m"], params[f"bn{idx}_v"])
        w = conv_weight_to_gemm(params[name]) * s      # (K, N) * (1, N)
        prep[f"conv{idx}_w"] = w.astype(jnp.bfloat16)
        prep[f"conv{idx}_shift"] = t                   # (1, N) f32

    # conv3 as a structured dense GEMM: (7*7*64) -> (3*3*32), NHWC flatten.
    s3, t3 = fold_bn(params["bn3_g"], params["bn3_b"],
                     params["bn3_m"], params["bn3_v"])
    w3 = params["conv3_w"]                             # (32, 64, 5, 5)
    wt = jnp.transpose(w3, (2, 3, 1, 0))               # (kh, kw, cin, cout)
    T = jnp.zeros((7, 7, 64, 3, 3, 32), jnp.float32)
    for ho in range(3):
        for wo in range(3):
            T = T.at[ho:ho + 5, wo:wo + 5, :, ho, wo, :].set(wt)
    w3_full = T.reshape(7 * 7 * 64, 3 * 3 * 32)
    w3_full = w3_full * jnp.tile(s3.reshape(-1), 9)[None, :]
    prep["conv3_w"] = w3_full.astype(jnp.bfloat16)             # (3136, 288)
    prep["conv3_shift"] = jnp.tile(t3.reshape(-1), 9).reshape(1, -1)  # (1, 288)

    # Row permutation: PyTorch NCHW flatten (c*9 + h*3 + w) -> our NHWC
    # flatten ((h*3 + w)*32 + c), absorbed into fc1/dc1 weights.
    hw = jnp.arange(9)
    c = jnp.arange(32)
    perm = (hw[:, None] + 9 * c[None, :]).reshape(-1)          # (288,)
    w_fc1 = params["fc1_w"].T[perm]                            # (288, 100)
    w_dc1 = params["dc1_w"].T[perm]                            # (288, 100)

    # Combined hidden weights padded 100 -> 128 per head (288, 256).
    w_hid = jnp.zeros((288, 256), jnp.float32)
    w_hid = w_hid.at[:, 0:100].set(w_fc1).at[:, 128:228].set(w_dc1)
    b_hid = jnp.zeros((256,), jnp.float32)
    b_hid = b_hid.at[0:100].set(params["fc1_b"]).at[128:228].set(params["dc1_b"])

    # Combined output weights -> lane-dense (256, 128) slab.
    w_out = jnp.zeros((256, 128), jnp.float32)
    w_out = w_out.at[0:100, 0:n_class].set(params["fc2_w"].T)
    w_out = w_out.at[128:228, n_class:n_class + 1].set(params["dc2_w"].T)
    b_out = jnp.zeros((128,), jnp.float32)
    b_out = b_out.at[0:n_class].set(params["fc2_b"]).at[n_class].set(params["dc2_b"][0])

    prep["w_hid"] = w_hid.astype(jnp.bfloat16)
    prep["b_hid"] = b_hid.reshape(1, -1)
    prep["w_out"] = w_out.astype(jnp.bfloat16)
    prep["b_out"] = b_out.reshape(1, -1)
    return prep


def init_params(key, n_class=10):
    ks = jax.random.split(key, 16)
    p = {}
    # extractor conv weights (bias=False)
    p["conv1_w"] = 0.05 * jax.random.normal(ks[0], (128, 3, 4, 4), jnp.float32)
    p["conv2_w"] = 0.05 * jax.random.normal(ks[1], (64, 128, 4, 4), jnp.float32)
    p["conv3_w"] = 0.05 * jax.random.normal(ks[2], (32, 64, 5, 5), jnp.float32)
    # batchnorm params (running stats at default init: mean=0, var=1)
    for i, c in zip((1, 2, 3), (128, 64, 32)):
        p[f"bn{i}_g"] = 1.0 + 0.1 * jax.random.normal(ks[2 + i], (c,), jnp.float32)
        p[f"bn{i}_b"] = 0.1 * jax.random.normal(ks[5 + i], (c,), jnp.float32)
        p[f"bn{i}_m"] = jnp.zeros((c,), jnp.float32)
        p[f"bn{i}_v"] = jnp.ones((c,), jnp.float32)
    # label classifier: Linear(288,100), Linear(100,n_class)
    p["fc1_w"] = 0.05 * jax.random.normal(ks[9], (100, 288), jnp.float32)
    p["fc1_b"] = 0.01 * jax.random.normal(ks[10], (100,), jnp.float32)
    p["fc2_w"] = 0.05 * jax.random.normal(ks[11], (n_class, 100), jnp.float32)
    p["fc2_b"] = 0.01 * jax.random.normal(ks[12], (n_class,), jnp.float32)
    # domain classifier: Linear(288,100), Linear(100,1)
    p["dc1_w"] = 0.05 * jax.random.normal(ks[13], (100, 288), jnp.float32)
    p["dc1_b"] = 0.01 * jax.random.normal(ks[14], (100,), jnp.float32)
    p["dc2_w"] = 0.05 * jax.random.normal(ks[15], (1, 100), jnp.float32)
    p["dc2_b"] = jnp.zeros((1,), jnp.float32)
    return p


@functools.partial(jax.jit, static_argnames=("n_class",))
def dann_forward(x_nchw, alpha, prep, n_class=10):
    """Forward pass of DANN.  x: (B, 3, 28, 28) NCHW.  alpha only affects the
    backward pass of ReverseLayer -> identity here."""
    del alpha
    B = x_nchw.shape[0]
    x = jnp.transpose(x_nchw, (0, 2, 3, 1)).astype(jnp.bfloat16)   # NHWC bf16

    # Conv1: 3 -> 128, k=4, s=2, p=1   (28 -> 14)
    p1, ho, wo = im2col(x, k=4, stride=2, pad=1)
    y1 = conv_gemm(p1, prep["conv1_w"], prep["conv1_shift"])        # (B*196,128)
    x1 = y1.reshape(B, ho, wo, 128)

    # Conv2: 128 -> 64, k=4, s=2, p=1  (14 -> 7)
    # TODO(synk): conv2's im2col patches are still materialized in HBM by XLA;
    # fusing the patch build into the kernel (space-to-depth + in-VMEM slices)
    # would cut conv2 input HBM traffic ~4x further.
    p2, ho, wo = im2col(x1, k=4, stride=2, pad=1)
    y2 = conv_gemm(p2, prep["conv2_w"], prep["conv2_shift"])        # (B*49, 64)
    x2 = y2.reshape(B, ho * wo * 64)                                # (B, 3136)

    # Conv3 + BN3 + LeakyReLU + both heads, fused, lane-dense (B,128) output.
    out = fused_heads(x2, prep["conv3_w"], prep["conv3_shift"],
                      prep["w_hid"], prep["b_hid"],
                      prep["w_out"], prep["b_out"], n_class=n_class)
    cls_out = out[:, :n_class]
    dom_out = out[:, n_class]                                       # (B,)
    return cls_out, dom_out


if __name__ == "__main__":
    key = jax.random.PRNGKey(0)
    k_x, k_p = jax.random.split(key)

    # Input must be 28x28 so the extractor produces 32*3*3 features.
    B = 2
    x = jax.random.normal(k_x, (B, 3, 28, 28), jnp.float32)
    alpha = jnp.float32(0.5)
    params = init_params(k_p, n_class=10)
    prep = prepare_params(params, n_class=10)     # one-time weight prep

    cls_out, domain_out = dann_forward(x, alpha, prep, n_class=10)
    jax.block_until_ready((cls_out, domain_out))

    assert cls_out.shape == (B, 10), cls_out.shape
    assert domain_out.shape == (B,), domain_out.shape
    assert bool(jnp.all(jnp.isfinite(cls_out)))
    assert bool(jnp.all((domain_out >= 0) & (domain_out <= 1)))
    print("KERNEL_OK")
</pallas_src>

<mosaic_0001>
module attributes {stable_mosaic.version = 11 : i64} {
  func.func @conv_gemm_kernel(%arg0: i32, %arg1: memref<400x48xbf16, #tpu.memory_space<vmem>>, %arg2: memref<48x128xbf16, #tpu.memory_space<vmem>>, %arg3: memref<1x128xf32, #tpu.memory_space<vmem>>, %arg4: memref<400x128xbf16, #tpu.memory_space<vmem>>) attributes {dimension_semantics = [#tpu.dimension_semantics<parallel>], iteration_bounds = array<i64: 1>, scalar_prefetch = 0 : i64, scratch_operands = 0 : i64, tpu.core_type = #tpu.core_type<tc>, window_params = [{transform_indices = @transform_0, window_bounds = array<i64: 400, 48>}, {pipeline_mode = #tpu.pipeline_mode<synchronous>, transform_indices = @transform_1, window_bounds = array<i64: 48, 128>}, {pipeline_mode = #tpu.pipeline_mode<synchronous>, transform_indices = @transform_2, window_bounds = array<i64: 1, 128>}, {transform_indices = @transform_3, window_bounds = array<i64: 400, 128>}]} {
    %c0 = arith.constant 0 : index
    %c0_0 = arith.constant 0 : index
    %0 = vector.load %arg1[%c0, %c0_0] : memref<400x48xbf16, #tpu.memory_space<vmem>>, vector<400x48xbf16>
    %c0_1 = arith.constant 0 : index
    %c0_2 = arith.constant 0 : index
    %1 = vector.load %arg2[%c0_1, %c0_2] : memref<48x128xbf16, #tpu.memory_space<vmem>>, vector<48x128xbf16>
    %cst = arith.constant dense<0.000000e+00> : vector<400x128xf32>
    %2 = tpu.matmul %0, %1, %cst {dimension_numbers = #tpu.dot_dimension_numbers<[1], [0], [0], [1], [0, 0, 1, 1], [], []>} : vector<400x48xbf16>, vector<48x128xbf16>, vector<400x128xf32> -> vector<400x128xf32>
    %c0_3 = arith.constant 0 : index
    %c0_4 = arith.constant 0 : index
    %3 = vector.load %arg3[%c0_3, %c0_4] : memref<1x128xf32, #tpu.memory_space<vmem>>, vector<1x128xf32>
    %4 = vector.broadcast %3 : vector<1x128xf32> to vector<400x128xf32>
    %5 = arith.addf %2, %4 : vector<400x128xf32>
    %cst_5 = arith.constant 0.000000e+00 : f32
    %6 = vector.broadcast %cst_5 : f32 to vector<400x128xf32>
    %7 = arith.cmpf oge, %5, %6 : vector<400x128xf32>
    %cst_6 = arith.constant 2.000000e-01 : f32
    %8 = vector.broadcast %cst_6 : f32 to vector<400x128xf32>
    %9 = arith.mulf %8, %5 : vector<400x128xf32>
    %10 = arith.select %7, %5, %9 : vector<400x128xi1>, vector<400x128xf32>
    %11 = arith.truncf %10 : vector<400x128xf32> to vector<400x128xbf16>
    %c0_7 = arith.constant 0 : index
    %c0_8 = arith.constant 0 : index
    %12 = vector.load %arg4[%c0_7, %c0_8] : memref<400x128xbf16, #tpu.memory_space<vmem>>, vector<400x128xbf16>
    tpu.vector_store %arg4[%c0_7, %c0_8], %11 {strides = array<i32>} : memref<400x128xbf16, #tpu.memory_space<vmem>>, vector<400x128xbf16>,
    return
  }
  func.func @transform_0(%arg0: i32) -> (i32, i32) {
    %c0_i32 = arith.constant 0 : i32
    %c0_i32_0 = arith.constant 0 : i32
    return %arg0, %c0_i32 : i32, i32
  }
  func.func @transform_1(%arg0: i32) -> (i32, i32) {
    %c0_i32 = arith.constant 0 : i32
    %c0_i32_0 = arith.constant 0 : i32
    %c0_i32_1 = arith.constant 0 : i32
    return %c0_i32, %c0_i32_0 : i32, i32
  }
  func.func @transform_2(%arg0: i32) -> (i32, i32) {
    %c0_i32 = arith.constant 0 : i32
    %c0_i32_0 = arith.constant 0 : i32
    %c0_i32_1 = arith.constant 0 : i32
    return %c0_i32, %c0_i32_0 : i32, i32
  }
  func.func @transform_3(%arg0: i32) -> (i32, i32) {
    %c0_i32 = arith.constant 0 : i32
    %c0_i32_0 = arith.constant 0 : i32
    return %arg0, %c0_i32 : i32, i32
  }
}

module attributes {stable_mosaic.version = 11 : i64} {
  func.func @conv_gemm_kernel(%arg0: i32, %arg1: memref<112x2048xbf16, #tpu.memory_space<vmem>>, %arg2: memref<2048x64xbf16, #tpu.memory_space<vmem>>, %arg3: memref<1x64xf32, #tpu.memory_space<vmem>>, %arg4: memref<112x64xbf16, #tpu.memory_space<vmem>>) attributes {dimension_semantics = [#tpu.dimension_semantics<parallel>], iteration_bounds = array<i64: 1>, scalar_prefetch = 0 : i64, scratch_operands = 0 : i64, tpu.core_type = #tpu.core_type<tc>, window_params = [{transform_indices = @transform_0, window_bounds = array<i64: 112, 2048>}, {pipeline_mode = #tpu.pipeline_mode<synchronous>, transform_indices = @transform_1, window_bounds = array<i64: 2048, 64>}, {pipeline_mode = #tpu.pipeline_mode<synchronous>, transform_indices = @transform_2, window_bounds = array<i64: 1, 64>}, {transform_indices = @transform_3, window_bounds = array<i64: 112, 64>}]} {
    %c0 = arith.constant 0 : index
    %c0_0 = arith.constant 0 : index
    %0 = vector.load %arg1[%c0, %c0_0] : memref<112x2048xbf16, #tpu.memory_space<vmem>>, vector<112x2048xbf16>
    %c0_1 = arith.constant 0 : index
    %c0_2 = arith.constant 0 : index
    %1 = vector.load %arg2[%c0_1, %c0_2] : memref<2048x64xbf16, #tpu.memory_space<vmem>>, vector<2048x64xbf16>
    %cst = arith.constant dense<0.000000e+00> : vector<112x64xf32>
    %2 = tpu.matmul %0, %1, %cst {dimension_numbers = #tpu.dot_dimension_numbers<[1], [0], [0], [1], [0, 0, 1, 1], [], []>} : vector<112x2048xbf16>, vector<2048x64xbf16>, vector<112x64xf32> -> vector<112x64xf32>
    %c0_3 = arith.constant 0 : index
    %c0_4 = arith.constant 0 : index
    %3 = vector.load %arg3[%c0_3, %c0_4] : memref<1x64xf32, #tpu.memory_space<vmem>>, vector<1x64xf32>
    %4 = vector.broadcast %3 : vector<1x64xf32> to vector<112x64xf32>
    %5 = arith.addf %2, %4 : vector<112x64xf32>
    %cst_5 = arith.constant 0.000000e+00 : f32
    %6 = vector.broadcast %cst_5 : f32 to vector<112x64xf32>
    %7 = arith.cmpf oge, %5, %6 : vector<112x64xf32>
    %cst_6 = arith.constant 2.000000e-01 : f32
    %8 = vector.broadcast %cst_6 : f32 to vector<112x64xf32>
    %9 = arith.mulf %8, %5 : vector<112x64xf32>
    %10 = arith.select %7, %5, %9 : vector<112x64xi1>, vector<112x64xf32>
    %11 = arith.truncf %10 : vector<112x64xf32> to vector<112x64xbf16>
    %c0_7 = arith.constant 0 : index
    %c0_8 = arith.constant 0 : index
    %12 = vector.load %arg4[%c0_7, %c0_8] : memref<112x64xbf16, #tpu.memory_space<vmem>>, vector<112x64xbf16>
    tpu.vector_store %arg4[%c0_7, %c0_8], %11 {strides = array<i32>} : memref<112x64xbf16, #tpu.memory_space<vmem>>, vector<112x64xbf16>,
    return
  }
  func.func @transform_0(%arg0: i32) -> (i32, i32) {
    %c0_i32 = arith.constant 0 : i32
    %c0_i32_0 = arith.constant 0 : i32
    return %arg0, %c0_i32 : i32, i32
  }
  func.func @transform_1(%arg0: i32) -> (i32, i32) {
    %c0_i32 = arith.constant 0 : i32
    %c0_i32_0 = arith.constant 0 : i32
    %c0_i32_1 = arith.constant 0 : i32
    return %c0_i32, %c0_i32_0 : i32, i32
  }
  func.func @transform_2(%arg0: i32) -> (i32, i32) {
    %c0_i32 = arith.constant 0 : i32
    %c0_i32_0 = arith.constant 0 : i32
    %c0_i32_1 = arith.constant 0 : i32
    return %c0_i32, %c0_i32_0 : i32, i32
  }
  func.func @transform_3(%arg0: i32) -> (i32, i32) {
    %c0_i32 = arith.constant 0 : i32
    %c0_i32_0 = arith.constant 0 : i32
    return %arg0, %c0_i32 : i32, i32
  }
}

module attributes {stable_mosaic.version = 11 : i64} {
  func.func @heads_kernel(%arg0: i32, %arg1: memref<16x3136xbf16, #tpu.memory_space<vmem>>, %arg2: memref<3136x288xbf16, #tpu.memory_space<vmem>>, %arg3: memref<1x288xf32, #tpu.memory_space<vmem>>, %arg4: memref<288x256xbf16, #tpu.memory_space<vmem>>, %arg5: memref<1x256xf32, #tpu.memory_space<vmem>>, %arg6: memref<256x128xbf16, #tpu.memory_space<vmem>>, %arg7: memref<1x128xf32, #tpu.memory_space<vmem>>, %arg8: memref<16x128xf32, #tpu.memory_space<vmem>>) attributes {dimension_semantics = [#tpu.dimension_semantics<parallel>], iteration_bounds = array<i64: 1>, scalar_prefetch = 0 : i64, scratch_operands = 0 : i64, tpu.core_type = #tpu.core_type<tc>, window_params = [{transform_indices = @transform_0, window_bounds = array<i64: 16, 3136>}, {pipeline_mode = #tpu.pipeline_mode<synchronous>, transform_indices = @transform_1, window_bounds = array<i64: 3136, 288>}, {pipeline_mode = #tpu.pipeline_mode<synchronous>, transform_indices = @transform_2, window_bounds = array<i64: 1, 288>}, {pipeline_mode = #tpu.pipeline_mode<synchronous>, transform_indices = @transform_3, window_bounds = array<i64: 288, 256>}, {pipeline_mode = #tpu.pipeline_mode<synchronous>, transform_indices = @transform_4, window_bounds = array<i64: 1, 256>}, {pipeline_mode = #tpu.pipeline_mode<synchronous>, transform_indices = @transform_5, window_bounds = array<i64: 256, 128>}, {pipeline_mode = #tpu.pipeline_mode<synchronous>, transform_indices = @transform_6, window_bounds = array<i64: 1, 128>}, {transform_indices = @transform_7, window_bounds = array<i64: 16, 128>}]} {
    %c0 = arith.constant 0 : index
    %c0_0 = arith.constant 0 : index
    %0 = vector.load %arg1[%c0, %c0_0] : memref<16x3136xbf16, #tpu.memory_space<vmem>>, vector<16x3136xbf16>
    %c0_1 = arith.constant 0 : index
    %c0_2 = arith.constant 0 : index
    %1 = vector.load %arg2[%c0_1, %c0_2] : memref<3136x288xbf16, #tpu.memory_space<vmem>>, vector<3136x288xbf16>
    %cst = arith.constant dense<0.000000e+00> : vector<16x288xf32>
    %2 = tpu.matmul %0, %1, %cst {dimension_numbers = #tpu.dot_dimension_numbers<[1], [0], [0], [1], [0, 0, 1, 1], [], []>} : vector<16x3136xbf16>, vector<3136x288xbf16>, vector<16x288xf32> -> vector<16x288xf32>
    %c0_3 = arith.constant 0 : index
    %c0_4 = arith.constant 0 : index
    %3 = vector.load %arg3[%c0_3, %c0_4] : memref<1x288xf32, #tpu.memory_space<vmem>>, vector<1x288xf32>
    %4 = vector.broadcast %3 : vector<1x288xf32> to vector<16x288xf32>
    %5 = arith.addf %2, %4 : vector<16x288xf32>
    %cst_5 = arith.constant 0.000000e+00 : f32
    %6 = vector.broadcast %cst_5 : f32 to vector<16x288xf32>
    %7 = arith.cmpf oge, %5, %6 : vector<16x288xf32>
    %cst_6 = arith.constant 2.000000e-01 : f32
    %8 = vector.broadcast %cst_6 : f32 to vector<16x288xf32>
    %9 = arith.mulf %8, %5 : vector<16x288xf32>
    %10 = arith.select %7, %5, %9 : vector<16x288xi1>, vector<16x288xf32>
    %11 = arith.truncf %10 : vector<16x288xf32> to vector<16x288xbf16>
    %c0_7 = arith.constant 0 : index
    %c0_8 = arith.constant 0 : index
    %12 = vector.load %arg4[%c0_7, %c0_8] : memref<288x256xbf16, #tpu.memory_space<vmem>>, vector<288x256xbf16>
    %cst_9 = arith.constant dense<0.000000e+00> : vector<16x256xf32>
    %13 = tpu.matmul %11, %12, %cst_9 {dimension_numbers = #tpu.dot_dimension_numbers<[1], [0], [0], [1], [0, 0, 1, 1], [], []>} : vector<16x288xbf16>, vector<288x256xbf16>, vector<16x256xf32> -> vector<16x256xf32>
    %c0_10 = arith.constant 0 : index
    %c0_11 = arith.constant 0 : index
    %14 = vector.load %arg5[%c0_10, %c0_11] : memref<1x256xf32, #tpu.memory_space<vmem>>, vector<1x256xf32>
    %15 = vector.broadcast %14 : vector<1x256xf32> to vector<16x256xf32>
    %16 = arith.addf %13, %15 : vector<16x256xf32>
    %cst_12 = arith.constant 0.000000e+00 : f32
    %17 = vector.broadcast %cst_12 : f32 to vector<16x256xf32>
    %18 = arith.maximumf %16, %17 : vector<16x256xf32>
    %19 = arith.truncf %18 : vector<16x256xf32> to vector<16x256xbf16>
    %c0_13 = arith.constant 0 : index
    %c0_14 = arith.constant 0 : index
    %20 = vector.load %arg6[%c0_13, %c0_14] : memref<256x128xbf16, #tpu.memory_space<vmem>>, vector<256x128xbf16>
    %cst_15 = arith.constant dense<0.000000e+00> : vector<16x128xf32>
    %21 = tpu.matmul %19, %20, %cst_15 {dimension_numbers = #tpu.dot_dimension_numbers<[1], [0], [0], [1], [0, 0, 1, 1], [], []>} : vector<16x256xbf16>, vector<256x128xbf16>, vector<16x128xf32> -> vector<16x128xf32>
    %c0_16 = arith.constant 0 : index
    %c0_17 = arith.constant 0 : index
    %22 = vector.load %arg7[%c0_16, %c0_17] : memref<1x128xf32, #tpu.memory_space<vmem>>, vector<1x128xf32>
    %23 = vector.broadcast %22 : vector<1x128xf32> to vector<16x128xf32>
    %24 = arith.addf %21, %23 : vector<16x128xf32>
    %25 = tpu.iota {dimensions = array<i32: 1>} : vector<16x128xi32>
    %cst_18 = arith.constant 5.000000e-01 : f32
    %26 = vector.broadcast %cst_18 : f32 to vector<16x128xf32>
    %27 = arith.mulf %26, %24 : vector<16x128xf32>
    %28 = math.tanh %27 : vector<16x128xf32>
    %cst_19 = arith.constant 1.000000e+00 : f32
    %29 = vector.broadcast %cst_19 : f32 to vector<16x128xf32>
    %30 = arith.addf %28, %29 : vector<16x128xf32>
    %cst_20 = arith.constant 5.000000e-01 : f32
    %31 = vector.broadcast %cst_20 : f32 to vector<16x128xf32>
    %32 = arith.mulf %31, %30 : vector<16x128xf32>
    %c10_i32 = arith.constant 10 : i32
    %33 = vector.broadcast %c10_i32 : i32 to vector<16x128xi32>
    %34 = arith.cmpi eq, %25, %33 : vector<16x128xi32>
    %35 = arith.select %34, %32, %24 : vector<16x128xi1>, vector<16x128xf32>
    %c0_21 = arith.constant 0 : index
    %c0_22 = arith.constant 0 : index
    %36 = vector.load %arg8[%c0_21, %c0_22] : memref<16x128xf32, #tpu.memory_space<vmem>>, vector<16x128xf32>
    tpu.vector_store %arg8[%c0_21, %c0_22], %35 {strides = array<i32>} : memref<16x128xf32, #tpu.memory_space<vmem>>, vector<16x128xf32>,
    return
  }
  func.func @transform_0(%arg0: i32) -> (i32, i32) {
    %c0_i32 = arith.constant 0 : i32
    %c0_i32_0 = arith.constant 0 : i32
    return %arg0, %c0_i32 : i32, i32
  }
  func.func @transform_1(%arg0: i32) -> (i32, i32) {
    %c0_i32 = arith.constant 0 : i32
    %c0_i32_0 = arith.constant 0 : i32
    %c0_i32_1 = arith.constant 0 : i32
    return %c0_i32, %c0_i32_0 : i32, i32
  }
  func.func @transform_2(%arg0: i32) -> (i32, i32) {
    %c0_i32 = arith.constant 0 : i32
    %c0_i32_0 = arith.constant 0 : i32
    %c0_i32_1 = arith.constant 0 : i32
    return %c0_i32, %c0_i32_0 : i32, i32
  }
  func.func @transform_3(%arg0: i32) -> (i32, i32) {
    %c0_i32 = arith.constant 0 : i32
    %c0_i32_0 = arith.constant 0 : i32
    %c0_i32_1 = arith.constant 0 : i32
    return %c0_i32, %c0_i32_0 : i32, i32
  }
  func.func @transform_4(%arg0: i32) -> (i32, i32) {
    %c0_i32 = arith.constant 0 : i32
    %c0_i32_0 = arith.constant 0 : i32
    %c0_i32_1 = arith.constant 0 : i32
    return %c0_i32, %c0_i32_0 : i32, i32
  }
  func.func @transform_5(%arg0: i32) -> (i32, i32) {
    %c0_i32 = arith.constant 0 : i32
    %c0_i32_0 = arith.constant 0 : i32
    %c0_i32_1 = arith.constant 0 : i32
    return %c0_i32, %c0_i32_0 : i32, i32
  }
  func.func @transform_6(%arg0: i32) -> (i32, i32) {
    %c0_i32 = arith.constant 0 : i32
    %c0_i32_0 = arith.constant 0 : i32
    %c0_i32_1 = arith.constant 0 : i32
    return %c0_i32, %c0_i32_0 : i32, i32
  }
  func.func @transform_7(%arg0: i32) -> (i32, i32) {
    %c0_i32 = arith.constant 0 : i32
    %c0_i32_0 = arith.constant 0 : i32
    return %arg0, %c0_i32 : i32, i32
  }
}

</mosaic_0001>

<bundles_post_ra>
// kernel: dann_forward.3
= control target key start
LH: loop header
LB: loop body
LE: loop exit
PB: predicated region body
PF: predicated region fallthrough
CT: control target
= control target key end

     0   :  { %v1407_v0 = vmov 0.0   ;;  %vm1408_vm0 = vmmov 0   ;;  %vm221_vm1 = vcmask 392192   ;;  %s1724_s1 = inlined_call_operand.vmem [shape: bf16[48,128], index: 1, kind: input, shape index: {}]   ;;  %s1725_s0 = inlined_call_operand.vmem [shape: bf16[400,48], index: 0, kind: input, shape index: {}]   ;;  %s1726_s2 = inlined_call_operand.vmem [shape: f32[1,128], index: 2, kind: input, shape index: {}]   ;;  %s1727_s3 = inlined_call_operand.vmem [shape: bf16[400,128], index: 3, kind: output, shape index: {}]  }
   0x1   :  { %1265 = vmatprep.subr.bf16.mxu0 %v1407_v0  ;;  %v1379_v1 = vld [vmem:[%s1724_s1] sm:$0xff]   ;;  %1371 = vmatprep.subr.bf16.mxu1 %v1407_v0  ;;  %v1380_v2 = vld [vmem:[%s1724_s1 + $0x8] sm:$0xff]   ;;  %v1381_v3 = vld [vmem:[%s1724_s1 + $0x10] sm:$0xff]  }
   0x2   :  { %1271 = vmatprep.mubr.msk.bf16.mxu0 %vm1408_vm0, %v1407_v0  ;;  %1323 = vmatprep.mubr.msk.bf16.mxu1 %vm1408_vm0, %v1407_v0  ;;  %v1382_v4 = vld [vmem:[%s1725_s0] sm:$0xff]   ;;  %v1383_v5 = vld [vmem:[%s1725_s0 + $0x68] sm:$0xff]   ;;  %v1385_v7 = vld [vmem:[%s1725_s0 + $0x70] sm:$0xff]  }
   0x3   :  { %1266 = vmatpush3.bf16.msra.mxu0 %v1379_v1  ;;  %1374 = vmatpush3.bf16.msra.mxu1 %v1379_v1  ;;  %v1384_v6 = vld [vmem:[%s1725_s0 + $0x8] sm:$0xff]   ;;  %v1386_v8 = vld [vmem:[%s1725_s0 + $0x10] sm:$0xff]   ;;  %v1387_v9 = vld [vmem:[%s1725_s0 + $0x78] sm:$0xff]  }
   0x4   :  { %1267 = vmatprep.subr.bf16.mxu0 %v1407_v0  ;;  %1372 = vmatprep.subr.bf16.mxu1 %v1407_v0  ;;  %v1388_v10 = vld [vmem:[%s1725_s0 + $0x18] sm:$0xff]   ;;  %v1389_v11 = vld [vmem:[%s1725_s0 + $0x80] sm:$0xff]   ;;  %v1391_v13 = vld [vmem:[%s1725_s0 + $0x88] sm:$0xff]  }
   0x5   :  { %v1390_v12 = vld [vmem:[%s1725_s0 + $0x20] sm:$0xff]   ;;  %v1392_v14 = vld [vmem:[%s1725_s0 + $0x28] sm:$0xff]   ;;  %v1393_v15 = vld [vmem:[%s1725_s0 + $0x90] sm:$0xff]  }
   0x6   :  { %v1394_v16 = vld [vmem:[%s1725_s0 + $0x30] sm:$0xff]   ;;  %v1395_v17 = vld [vmem:[%s1725_s0 + $0x98] sm:$0xff]   ;;  %v1397_v19 = vld [vmem:[%s1725_s0 + $0xa0] sm:$0xff]  }
   0x7   :  { %1268 = vmatpush3.bf16.msra.mxu0 %v1380_v2  ;;  %1375 = vmatpush3.bf16.msra.mxu1 %v1380_v2  ;;  %v1396_v18 = vld [vmem:[%s1725_s0 + $0x38] sm:$0xff]   ;;  %v1398_v20 = vld [vmem:[%s1725_s0 + $0x40] sm:$0xff]   ;;  %v1399_v21 = vld [vmem:[%s1725_s0 + $0xa8] sm:$0xff]  }
   0x8   :  { %1269 = vmatprep.subr.bf16.mxu0 %v1407_v0  ;;  %1373 = vmatprep.subr.bf16.mxu1 %v1407_v0  ;;  %v1400_v22 = vld [vmem:[%s1725_s0 + $0x48] sm:$0xff]   ;;  %v1401_v23 = vld [vmem:[%s1725_s0 + $0xb0] sm:$0xff]   ;;  %v1403_v25 = vld [vmem:[%s1725_s0 + $0xb8] sm:$0xff]  }
   0x9   :  { %v1402_v24 = vld [vmem:[%s1725_s0 + $0x50] sm:$0xff]   ;;  %v1404_v26 = vld [vmem:[%s1725_s0 + $0x58] sm:$0xff]   ;;  %v1405_v27 = vld [vmem:[%s1725_s0 + $0xc0] sm:$0xff]  }
   0xa   :  { %v1406_v28 = vld [vmem:[%s1725_s0 + $0x60] sm:$0xff]  }
   0xb   :  { %1270 = vmatpush3.bf16.msra.mxu0 %v1381_v3  ;;  %1376 = vmatpush3.bf16.msra.mxu1 %v1381_v3  ;;  %v1597_v29 = vld [vmem:[%s1726_s2] ss:$0 sm:$0xff] }
   0xe   :  { %1272 = vmatmul.mubr.msk.bf16.vlgmr.msra.gmra.mrb[0].mxu0 %vm221_vm1, %v1382_v4  ;;  %1324 = vmatmul.mubr.msk.bf16.vlgmr.msra.gmra.mrb[0].mxu1 %vm221_vm1, %v1383_v5 }
   0xf   :  { %1275 = vmatprep.mubr.msk.bf16.mxu0 %vm1408_vm0, %v1407_v0  ;;  %1327 = vmatprep.mubr.msk.bf16.mxu1 %vm1408_vm0, %v1407_v0 }
  0x16   :  { %1276 = vmatmul.mubr.msk.bf16.gmra.mrb[4].mxu0 %vm221_vm1, %v1384_v6  ;;  %1328 = vmatmul.mubr.msk.bf16.gmra.mrb[4].mxu1 %vm221_vm1, %v1385_v7 }
  0x17   :  { %1279 = vmatprep.mubr.msk.bf16.mxu0 %vm1408_vm0, %v1407_v0  ;;  %1331 = vmatprep.mubr.msk.bf16.mxu1 %vm1408_vm0, %v1407_v0 }
  0x1e   :  { %1280 = vmatmul.mubr.msk.bf16.gmra.mrb[8].mxu0 %vm221_vm1, %v1386_v8  ;;  %1332 = vmatmul.mubr.msk.bf16.gmra.mrb[8].mxu1 %vm221_vm1, %v1387_v9 }
  0x1f   :  { %1283 = vmatprep.mubr.msk.bf16.mxu0 %vm1408_vm0, %v1407_v0  ;;  %1335 = vmatprep.mubr.msk.bf16.mxu1 %vm1408_vm0, %v1407_v0 }
  0x26   :  { %1284 = vmatmul.mubr.msk.bf16.gmra.mrb[12].mxu0 %vm221_vm1, %v1388_v10  ;;  %1336 = vmatmul.mubr.msk.bf16.gmra.mrb[12].mxu1 %vm221_vm1, %v1389_v11 }
  0x27   :  { %1287 = vmatprep.mubr.msk.bf16.mxu0 %vm1408_vm0, %v1407_v0  ;;  %1339 = vmatprep.mubr.msk.bf16.mxu1 %vm1408_vm0, %v1407_v0 }
  0x2e   :  { %1288 = vmatmul.mubr.msk.bf16.gmra.mrb[16].mxu0 %vm221_vm1, %v1390_v12  ;;  %1340 = vmatmul.mubr.msk.bf16.gmra.mrb[16].mxu1 %vm221_vm1, %v1391_v13 }
  0x2f   :  { %1291 = vmatprep.mubr.msk.bf16.mxu0 %vm1408_vm0, %v1407_v0  ;;  %1343 = vmatprep.mubr.msk.bf16.mxu1 %vm1408_vm0, %v1407_v0 }
  0x36   :  { %1292 = vmatmul.mubr.msk.bf16.gmra.mrb[20].mxu0 %vm221_vm1, %v1392_v14  ;;  %1344 = vmatmul.mubr.msk.bf16.gmra.mrb[20].mxu1 %vm221_vm1, %v1393_v15 }
  0x37   :  { %1295 = vmatprep.mubr.msk.bf16.mxu0 %vm1408_vm0, %v1407_v0  ;;  %1347 = vmatprep.mubr.msk.bf16.mxu1 %vm1408_vm0, %v1407_v0 }
  0x3e   :  { %1296 = vmatmul.mubr.msk.bf16.gmra.mrb[24].mxu0 %vm221_vm1, %v1394_v16  ;;  %1348 = vmatmul.mubr.msk.bf16.gmra.mrb[24].mxu1 %vm221_vm1, %v1395_v17 }
  0x3f   :  { %1299 = vmatprep.mubr.msk.bf16.mxu0 %vm1408_vm0, %v1407_v0  ;;  %1351 = vmatprep.mubr.msk.bf16.mxu1 %vm1408_vm0, %v1407_v0 }
  0x46   :  { %1300 = vmatmul.mubr.msk.bf16.gmra.mrb[28].mxu0 %vm221_vm1, %v1396_v18  ;;  %1352 = vmatmul.mubr.msk.bf16.gmra.mrb[28].mxu1 %vm221_vm1, %v1397_v19 }
  0x47   :  { %1303 = vmatprep.mubr.msk.bf16.mxu0 %vm1408_vm0, %v1407_v0  ;;  %1355 = vmatprep.mubr.msk.bf16.mxu1 %vm1408_vm0, %v1407_v0 }
  0x4e   :  { %1304 = vmatmul.mubr.msk.bf16.gmra.mrb[32].mxu0 %vm221_vm1, %v1398_v20  ;;  %1356 = vmatmul.mubr.msk.bf16.gmra.mrb[32].mxu1 %vm221_vm1, %v1399_v21 }
  0x4f   :  { %1307 = vmatprep.mubr.msk.bf16.mxu0 %vm1408_vm0, %v1407_v0  ;;  %1359 = vmatprep.mubr.msk.bf16.mxu1 %vm1408_vm0, %v1407_v0 }
  0x56   :  { %1308 = vmatmul.mubr.msk.bf16.gmra.mrb[36].mxu0 %vm221_vm1, %v1400_v22  ;;  %1360 = vmatmul.mubr.msk.bf16.gmra.mrb[36].mxu1 %vm221_vm1, %v1401_v23 }
  0x57   :  { %1311 = vmatprep.mubr.msk.bf16.mxu0 %vm1408_vm0, %v1407_v0  ;;  %1363 = vmatprep.mubr.msk.bf16.mxu1 %vm1408_vm0, %v1407_v0 }
  0x5e   :  { %1312 = vmatmul.mubr.msk.bf16.gmra.mrb[40].mxu0 %vm221_vm1, %v1402_v24  ;;  %1364 = vmatmul.mubr.msk.bf16.gmra.mrb[40].mxu1 %vm221_vm1, %v1403_v25 }
  0x5f   :  { %1315 = vmatprep.mubr.msk.bf16.mxu0 %vm1408_vm0, %v1407_v0  ;;  %1367 = vmatprep.mubr.msk.bf16.mxu1 %vm1408_vm0, %v1407_v0 }
  0x66   :  { %1316 = vmatmul.mubr.msk.bf16.gmra.mrb[44].mxu0 %vm221_vm1, %v1404_v26  ;;  %1368 = vmatmul.mubr.msk.bf16.gmra.mrb[44].mxu1 %vm221_vm1, %v1405_v27 }
  0x67   :  { %1319 = vmatprep.mubr.msk.bf16.mxu0 %vm1408_vm0, %v1407_v0 }
  0x6e   :  { %1320 = vmatmul.mubr.msk.bf16.gmra.mrb[48].mxu0 %vm221_vm1, %v1406_v28 }
  0xe1   :  { %v331_v30 = vpop.f32.mrb[0].mxu0  ;;  %v435_v31 = vpop.f32.mrb[0].mxu1 }
  0xe2   :  { %v332_v32 = vadd.f32 %v1597_v29, %v331_v30  ;;  %v1273_v33 = vpop.f32.mrb[1].mxu0  ;;  %v436_v34 = vadd.f32 %v1597_v29, %v435_v31  ;;  %v1325_v35 = vpop.f32.mrb[1].mxu1 }
  0xe3   :  { %v334_v36 = vpop.f32.mrb[2].mxu0  ;;  %v438_v37 = vpop.f32.mrb[2].mxu1 }
  0xe4   :  { %v580_v38 = vmul.f32 0.2, %v332_v32  ;;  %v335_v39 = vadd.f32 %v1597_v29, %v334_v36  ;;  %v1274_v40 = vpop.f32.mrb[3].mxu0  ;;  %vm556_vm2 = vcmp.ge.f32.partialorder %v436_v34, 0.0  ;;  %v1326_v41 = vpop.f32.mrb[3].mxu1  ;;  %vm530_vm3 = vcmp.ge.f32.partialorder %v332_v32, 0.0 }
  0xe5   :  { %v606_v42 = vmul.f32 0.2, %v436_v34  ;;  %v439_v43 = vadd.f32 %v1597_v29, %v438_v37 }
  0xe6   :  { %vm531_vm4 = vcmp.ge.f32.partialorder %v335_v39, 0.0  ;;  %v581_v44 = vmul.f32 0.2, %v335_v39  ;;  %v630_v47 = vsel %vm530_vm3, %v332_v32, %v580_v38 }
  0xe7   :  { %v656_v45 = vsel %vm556_vm2, %v436_v34, %v606_v42  ;;  %vm557_vm5 = vcmp.ge.f32.partialorder %v439_v43, 0.0  ;;  %v607_v46 = vmul.f32 0.2, %v439_v43 }
  0xe8   :  { %v631_v48 = vsel %vm531_vm4, %v335_v39, %v581_v44 }
  0xe9   :  { %v1091_v49 = vpack.c.bf16 %v631_v48, %v630_v47  ;;  %v657_v50 = vsel %vm557_vm5, %v439_v43, %v607_v46  ;;  %v339_v51 = vpop.f32.mrb[4].mxu0  ;;  %v443_v52 = vpop.f32.mrb[4].mxu1 }
  0xea   :  { %v1156_v53 = vpack.c.bf16 %v657_v50, %v656_v45  ;;  %v340_v54 = vadd.f32 %v1597_v29, %v339_v51  ;;  %v1277_v55 = vpop.f32.mrb[5].mxu0  ;;  %v444_v56 = vadd.f32 %v1597_v29, %v443_v52  ;;  %v1329_v57 = vpop.f32.mrb[5].mxu1 }
  0xeb   :  { %1092 = vst [vmem:[%s1727_s3] sm:$0xff] %v1091_v49   ;;  %v342_v58 = vpop.f32.mrb[6].mxu0  ;;  %v446_v59 = vpop.f32.mrb[6].mxu1 }
  0xec   :  { %1225 = vst [vmem:[%s1727_s3 + $0x68] sm:$0xff] %v1156_v53   ;;  %v582_v60 = vmul.f32 0.2, %v340_v54  ;;  %v343_v61 = vadd.f32 %v1597_v29, %v342_v58  ;;  %v1278_v62 = vpop.f32.mrb[7].mxu0  ;;  %vm558_vm6 = vcmp.ge.f32.partialorder %v444_v56, 0.0  ;;  %v1330_v63 = vpop.f32.mrb[7].mxu1  ;;  %v447_v1 = vadd.f32 %v1597_v29, %v446_v59 }
  0xed   :  { %vm532_vm7 = vcmp.ge.f32.partialorder %v340_v54, 0.0  ;;  %v608_v0 = vmul.f32 0.2, %v444_v56 }
  0xee   :  { %vm533_vm8 = vcmp.ge.f32.partialorder %v343_v61, 0.0  ;;  %v583_v2 = vmul.f32 0.2, %v343_v61  ;;  %vm559_vm9 = vcmp.ge.f32.partialorder %v447_v1, 0.0  ;;  %v609_v4 = vmul.f32 0.2, %v447_v1 }
  0xef   :  { %v658_v3 = vsel %vm558_vm6, %v444_v56, %v608_v0  ;;  %v632_v5 = vsel %vm532_vm7, %v340_v54, %v582_v60 }
  0xf0   :  { %v633_v6 = vsel %vm533_vm8, %v343_v61, %v583_v2  ;;  %v659_v8 = vsel %vm559_vm9, %v447_v1, %v609_v4 }
  0xf1   :  { %v1096_v7 = vpack.c.bf16 %v633_v6, %v632_v5  ;;  %v347_v9 = vpop.f32.mrb[8].mxu0  ;;  %v451_v10 = vpop.f32.mrb[8].mxu1  ;;  %v1161_v11 = vpack.c.bf16 %v659_v8, %v658_v3 }
  0xf2   :  { %v348_v12 = vadd.f32 %v1597_v29, %v347_v9  ;;  %v1281_v13 = vpop.f32.mrb[9].mxu0  ;;  %v452_v14 = vadd.f32 %v1597_v29, %v451_v10  ;;  %v1333_v15 = vpop.f32.mrb[9].mxu1 }
  0xf3   :  { %1213 = vst [vmem:[%s1727_s3 + $0x8] sm:$0xff] %v1096_v7   ;;  %v350_v16 = vpop.f32.mrb[10].mxu0  ;;  %v454_v17 = vpop.f32.mrb[10].mxu1  ;;  %1226 = vst [vmem:[%s1727_s3 + $0x70] sm:$0xff] %v1161_v11  }
  0xf4   :  { %v584_v18 = vmul.f32 0.2, %v348_v12  ;;  %v351_v19 = vadd.f32 %v1597_v29, %v350_v16  ;;  %v1282_v20 = vpop.f32.mrb[11].mxu0  ;;  %vm560_vm10 = vcmp.ge.f32.partialorder %v452_v14, 0.0  ;;  %v1334_v21 = vpop.f32.mrb[11].mxu1  ;;  %vm534_vm11 = vcmp.ge.f32.partialorder %v348_v12, 0.0 }
  0xf5   :  { %v610_v22 = vmul.f32 0.2, %v452_v14  ;;  %v455_v23 = vadd.f32 %v1597_v29, %v454_v17 }
  0xf6   :  { %vm535_vm12 = vcmp.ge.f32.partialorder %v351_v19, 0.0  ;;  %v585_v24 = vmul.f32 0.2, %v351_v19  ;;  %v634_v27 = vsel %vm534_vm11, %v348_v12, %v584_v18 }
  0xf7   :  { %v660_v25 = vsel %vm560_vm10, %v452_v14, %v610_v22  ;;  %vm561_vm13 = vcmp.ge.f32.partialorder %v455_v23, 0.0  ;;  %v611_v26 = vmul.f32 0.2, %v455_v23 }
  0xf8   :  { %v635_v28 = vsel %vm535_vm12, %v351_v19, %v585_v24 }
  0xf9   :  { %v1101_v30 = vpack.c.bf16 %v635_v28, %v634_v27  ;;  %v661_v31 = vsel %vm561_vm13, %v455_v23, %v611_v26  ;;  %v355_v32 = vpop.f32.mrb[12].mxu0  ;;  %v459_v33 = vpop.f32.mrb[12].mxu1 }
  0xfa   :  { %v1166_v34 = vpack.c.bf16 %v661_v31, %v660_v25  ;;  %v356_v35 = vadd.f32 %v1597_v29, %v355_v32  ;;  %v1285_v36 = vpop.f32.mrb[13].mxu0  ;;  %v460_v37 = vadd.f32 %v1597_v29, %v459_v33  ;;  %v1337_v38 = vpop.f32.mrb[13].mxu1 }
  0xfb   :  { %1214 = vst [vmem:[%s1727_s3 + $0x10] sm:$0xff] %v1101_v30   ;;  %v358_v39 = vpop.f32.mrb[14].mxu0  ;;  %v462_v40 = vpop.f32.mrb[14].mxu1 }
  0xfc   :  { %1227 = vst [vmem:[%s1727_s3 + $0x78] sm:$0xff] %v1166_v34   ;;  %v586_v41 = vmul.f32 0.2, %v356_v35  ;;  %v359_v42 = vadd.f32 %v1597_v29, %v358_v39  ;;  %v1286_v43 = vpop.f32.mrb[15].mxu0  ;;  %vm562_vm14 = vcmp.ge.f32.partialorder %v460_v37, 0.0  ;;  %v1338_v44 = vpop.f32.mrb[15].mxu1  ;;  %v463_v46 = vadd.f32 %v1597_v29, %v462_v40 }
  0xfd   :  { %vm536_vm15 = vcmp.ge.f32.partialorder %v356_v35, 0.0  ;;  %v612_v45 = vmul.f32 0.2, %v460_v37 }
  0xfe   :  { %vm537_vm0 = vcmp.ge.f32.partialorder %v359_v42, 0.0  ;;  %v587_v47 = vmul.f32 0.2, %v359_v42  ;;  %vm563_vm1 = vcmp.ge.f32.partialorder %v463_v46, 0.0  ;;  %v613_v49 = vmul.f32 0.2, %v463_v46 }
  0xff   :  { %v662_v48 = vsel %vm562_vm14, %v460_v37, %v612_v45  ;;  %v636_v50 = vsel %vm536_vm15, %v356_v35, %v586_v41 }
 0x100   :  { %v637_v51 = vsel %vm537_vm0, %v359_v42, %v587_v47  ;;  %v663_v53 = vsel %vm563_vm1, %v463_v46, %v613_v49 }
 0x101   :  { %v1106_v52 = vpack.c.bf16 %v637_v51, %v636_v50  ;;  %v363_v54 = vpop.f32.mrb[16].mxu0  ;;  %v467_v55 = vpop.f32.mrb[16].mxu1  ;;  %v1171_v56 = vpack.c.bf16 %v663_v53, %v662_v48 }
 0x102   :  { %v364_v57 = vadd.f32 %v1597_v29, %v363_v54  ;;  %v1289_v58 = vpop.f32.mrb[17].mxu0  ;;  %v468_v59 = vadd.f32 %v1597_v29, %v467_v55  ;;  %v1341_v60 = vpop.f32.mrb[17].mxu1 }
 0x103   :  { %1215 = vst [vmem:[%s1727_s3 + $0x18] sm:$0xff] %v1106_v52   ;;  %v366_v61 = vpop.f32.mrb[18].mxu0  ;;  %v470_v62 = vpop.f32.mrb[18].mxu1  ;;  %1228 = vst [vmem:[%s1727_s3 + $0x80] sm:$0xff] %v1171_v56  }
 0x104   :  { %v588_v63 = vmul.f32 0.2, %v364_v57  ;;  %v367_v0 = vadd.f32 %v1597_v29, %v366_v61  ;;  %v1290_v1 = vpop.f32.mrb[19].mxu0  ;;  %vm564_vm2 = vcmp.ge.f32.partialorder %v468_v59, 0.0  ;;  %v1342_v2 = vpop.f32.mrb[19].mxu1  ;;  %vm538_vm3 = vcmp.ge.f32.partialorder %v364_v57, 0.0 }
 0x105   :  { %v614_v3 = vmul.f32 0.2, %v468_v59  ;;  %v471_v4 = vadd.f32 %v1597_v29, %v470_v62 }
 0x106   :  { %vm539_vm4 = vcmp.ge.f32.partialorder %v367_v0, 0.0  ;;  %v589_v5 = vmul.f32 0.2, %v367_v0  ;;  %v638_v8 = vsel %vm538_vm3, %v364_v57, %v588_v63 }
 0x107   :  { %v664_v6 = vsel %vm564_vm2, %v468_v59, %v614_v3  ;;  %vm565_vm5 = vcmp.ge.f32.partialorder %v471_v4, 0.0  ;;  %v615_v7 = vmul.f32 0.2, %v471_v4 }
 0x108   :  { %v639_v9 = vsel %vm539_vm4, %v367_v0, %v589_v5 }
 0x109   :  { %v1111_v10 = vpack.c.bf16 %v639_v9, %v638_v8  ;;  %v665_v11 = vsel %vm565_vm5, %v471_v4, %v615_v7  ;;  %v371_v12 = vpop.f32.mrb[20].mxu0  ;;  %v475_v13 = vpop.f32.mrb[20].mxu1 }
 0x10a   :  { %v1176_v14 = vpack.c.bf16 %v665_v11, %v664_v6  ;;  %v372_v15 = vadd.f32 %v1597_v29, %v371_v12  ;;  %v1293_v16 = vpop.f32.mrb[21].mxu0  ;;  %v476_v17 = vadd.f32 %v1597_v29, %v475_v13  ;;  %v1345_v18 = vpop.f32.mrb[21].mxu1 }
 0x10b   :  { %1216 = vst [vmem:[%s1727_s3 + $0x20] sm:$0xff] %v1111_v10   ;;  %v374_v19 = vpop.f32.mrb[22].mxu0  ;;  %v478_v20 = vpop.f32.mrb[22].mxu1 }
 0x10c   :  { %1229 = vst [vmem:[%s1727_s3 + $0x88] sm:$0xff] %v1176_v14   ;;  %v590_v21 = vmul.f32 0.2, %v372_v15  ;;  %v375_v22 = vadd.f32 %v1597_v29, %v374_v19  ;;  %v1294_v23 = vpop.f32.mrb[23].mxu0  ;;  %vm566_vm6 = vcmp.ge.f32.partialorder %v476_v17, 0.0  ;;  %v1346_v24 = vpop.f32.mrb[23].mxu1  ;;  %v479_v26 = vadd.f32 %v1597_v29, %v478_v20 }
 0x10d   :  { %vm540_vm7 = vcmp.ge.f32.partialorder %v372_v15, 0.0  ;;  %v616_v25 = vmul.f32 0.2, %v476_v17 }
 0x10e   :  { %vm541_vm8 = vcmp.ge.f32.partialorder %v375_v22, 0.0  ;;  %v591_v27 = vmul.f32 0.2, %v375_v22  ;;  %vm567_vm9 = vcmp.ge.f32.partialorder %v479_v26, 0.0  ;;  %v617_v30 = vmul.f32 0.2, %v479_v26 }
 0x10f   :  { %v666_v28 = vsel %vm566_vm6, %v476_v17, %v616_v25  ;;  %v640_v31 = vsel %vm540_vm7, %v372_v15, %v590_v21 }
 0x110   :  { %v641_v32 = vsel %vm541_vm8, %v375_v22, %v591_v27  ;;  %v667_v34 = vsel %vm567_vm9, %v479_v26, %v617_v30 }
 0x111   :  { %v1116_v33 = vpack.c.bf16 %v641_v32, %v640_v31  ;;  %v379_v35 = vpop.f32.mrb[24].mxu0  ;;  %v483_v36 = vpop.f32.mrb[24].mxu1  ;;  %v1181_v37 = vpack.c.bf16 %v667_v34, %v666_v28 }
 0x112   :  { %v380_v38 = vadd.f32 %v1597_v29, %v379_v35  ;;  %v1297_v39 = vpop.f32.mrb[25].mxu0  ;;  %v484_v40 = vadd.f32 %v1597_v29, %v483_v36  ;;  %v1349_v41 = vpop.f32.mrb[25].mxu1 }
 0x113   :  { %1217 = vst [vmem:[%s1727_s3 + $0x28] sm:$0xff] %v1116_v33   ;;  %v382_v42 = vpop.f32.mrb[26].mxu0  ;;  %v486_v43 = vpop.f32.mrb[26].mxu1  ;;  %1230 = vst [vmem:[%s1727_s3 + $0x90] sm:$0xff] %v1181_v37  }
 0x114   :  { %v592_v44 = vmul.f32 0.2, %v380_v38  ;;  %v383_v45 = vadd.f32 %v1597_v29, %v382_v42  ;;  %v1298_v46 = vpop.f32.mrb[27].mxu0  ;;  %vm568_vm10 = vcmp.ge.f32.partialorder %v484_v40, 0.0  ;;  %v1350_v47 = vpop.f32.mrb[27].mxu1  ;;  %vm542_vm11 = vcmp.ge.f32.partialorder %v380_v38, 0.0 }
 0x115   :  { %v618_v48 = vmul.f32 0.2, %v484_v40  ;;  %v487_v49 = vadd.f32 %v1597_v29, %v486_v43 }
 0x116   :  { %vm543_vm12 = vcmp.ge.f32.partialorder %v383_v45, 0.0  ;;  %v593_v50 = vmul.f32 0.2, %v383_v45  ;;  %v642_v53 = vsel %vm542_vm11, %v380_v38, %v592_v44 }
 0x117   :  { %v668_v51 = vsel %vm568_vm10, %v484_v40, %v618_v48  ;;  %vm569_vm13 = vcmp.ge.f32.partialorder %v487_v49, 0.0  ;;  %v619_v52 = vmul.f32 0.2, %v487_v49 }
 0x118   :  { %v643_v54 = vsel %vm543_vm12, %v383_v45, %v593_v50 }
 0x119   :  { %v1121_v55 = vpack.c.bf16 %v643_v54, %v642_v53  ;;  %v669_v56 = vsel %vm569_vm13, %v487_v49, %v619_v52  ;;  %v387_v57 = vpop.f32.mrb[28].mxu0  ;;  %v491_v58 = vpop.f32.mrb[28].mxu1 }
 0x11a   :  { %v1186_v59 = vpack.c.bf16 %v669_v56, %v668_v51  ;;  %v388_v60 = vadd.f32 %v1597_v29, %v387_v57  ;;  %v1301_v61 = vpop.f32.mrb[29].mxu0  ;;  %v492_v62 = vadd.f32 %v1597_v29, %v491_v58  ;;  %v1353_v63 = vpop.f32.mrb[29].mxu1 }
 0x11b   :  { %1218 = vst [vmem:[%s1727_s3 + $0x30] sm:$0xff] %v1121_v55   ;;  %v390_v0 = vpop.f32.mrb[30].mxu0  ;;  %v494_v1 = vpop.f32.mrb[30].mxu1 }
 0x11c   :  { %1231 = vst [vmem:[%s1727_s3 + $0x98] sm:$0xff] %v1186_v59   ;;  %v594_v2 = vmul.f32 0.2, %v388_v60  ;;  %v391_v3 = vadd.f32 %v1597_v29, %v390_v0  ;;  %v1302_v4 = vpop.f32.mrb[31].mxu0  ;;  %vm570_vm14 = vcmp.ge.f32.partialorder %v492_v62, 0.0  ;;  %v1354_v5 = vpop.f32.mrb[31].mxu1  ;;  %v495_v7 = vadd.f32 %v1597_v29, %v494_v1 }
 0x11d   :  { %vm544_vm15 = vcmp.ge.f32.partialorder %v388_v60, 0.0  ;;  %v620_v6 = vmul.f32 0.2, %v492_v62 }
 0x11e   :  { %vm545_vm0 = vcmp.ge.f32.partialorder %v391_v3, 0.0  ;;  %v595_v8 = vmul.f32 0.2, %v391_v3  ;;  %vm571_vm1 = vcmp.ge.f32.partialorder %v495_v7, 0.0  ;;  %v621_v10 = vmul.f32 0.2, %v495_v7 }
 0x11f   :  { %v670_v9 = vsel %vm570_vm14, %v492_v62, %v620_v6  ;;  %v644_v11 = vsel %vm544_vm15, %v388_v60, %v594_v2 }
 0x120   :  { %v645_v12 = vsel %vm545_vm0, %v391_v3, %v595_v8  ;;  %v671_v14 = vsel %vm571_vm1, %v495_v7, %v621_v10 }
 0x121   :  { %v1126_v13 = vpack.c.bf16 %v645_v12, %v644_v11  ;;  %v395_v15 = vpop.f32.mrb[32].mxu0  ;;  %v499_v16 = vpop.f32.mrb[32].mxu1  ;;  %v1191_v17 = vpack.c.bf16 %v671_v14, %v670_v9 }
 0x122   :  { %v396_v18 = vadd.f32 %v1597_v29, %v395_v15  ;;  %v1305_v19 = vpop.f32.mrb[33].mxu0  ;;  %v500_v20 = vadd.f32 %v1597_v29, %v499_v16  ;;  %v1357_v21 = vpop.f32.mrb[33].mxu1 }
 0x123   :  { %1219 = vst [vmem:[%s1727_s3 + $0x38] sm:$0xff] %v1126_v13   ;;  %v398_v22 = vpop.f32.mrb[34].mxu0  ;;  %v502_v23 = vpop.f32.mrb[34].mxu1  ;;  %1232 = vst [vmem:[%s1727_s3 + $0xa0] sm:$0xff] %v1191_v17  }
 0x124   :  { %v596_v24 = vmul.f32 0.2, %v396_v18  ;;  %v399_v25 = vadd.f32 %v1597_v29, %v398_v22  ;;  %v1306_v26 = vpop.f32.mrb[35].mxu0  ;;  %vm572_vm2 = vcmp.ge.f32.partialorder %v500_v20, 0.0  ;;  %v1358_v27 = vpop.f32.mrb[35].mxu1  ;;  %vm546_vm3 = vcmp.ge.f32.partialorder %v396_v18, 0.0 }
 0x125   :  { %v622_v28 = vmul.f32 0.2, %v500_v20  ;;  %v503_v30 = vadd.f32 %v1597_v29, %v502_v23 }
 0x126   :  { %vm547_vm4 = vcmp.ge.f32.partialorder %v399_v25, 0.0  ;;  %v597_v31 = vmul.f32 0.2, %v399_v25  ;;  %v646_v34 = vsel %vm546_vm3, %v396_v18, %v596_v24 }
 0x127   :  { %v672_v32 = vsel %vm572_vm2, %v500_v20, %v622_v28  ;;  %vm573_vm5 = vcmp.ge.f32.partialorder %v503_v30, 0.0  ;;  %v623_v33 = vmul.f32 0.2, %v503_v30 }
 0x128   :  { %v647_v35 = vsel %vm547_vm4, %v399_v25, %v597_v31 }
 0x129   :  { %v1131_v36 = vpack.c.bf16 %v647_v35, %v646_v34  ;;  %v673_v37 = vsel %vm573_vm5, %v503_v30, %v623_v33  ;;  %v403_v38 = vpop.f32.mrb[36].mxu0  ;;  %v507_v39 = vpop.f32.mrb[36].mxu1 }
 0x12a   :  { %v1196_v40 = vpack.c.bf16 %v673_v37, %v672_v32  ;;  %v404_v41 = vadd.f32 %v1597_v29, %v403_v38  ;;  %v1309_v42 = vpop.f32.mrb[37].mxu0  ;;  %v508_v43 = vadd.f32 %v1597_v29, %v507_v39  ;;  %v1361_v44 = vpop.f32.mrb[37].mxu1 }
 0x12b   :  { %1220 = vst [vmem:[%s1727_s3 + $0x40] sm:$0xff] %v1131_v36   ;;  %v406_v45 = vpop.f32.mrb[38].mxu0  ;;  %v510_v46 = vpop.f32.mrb[38].mxu1 }
 0x12c   :  { %1233 = vst [vmem:[%s1727_s3 + $0xa8] sm:$0xff] %v1196_v40   ;;  %v598_v47 = vmul.f32 0.2, %v404_v41  ;;  %v407_v48 = vadd.f32 %v1597_v29, %v406_v45  ;;  %v1310_v49 = vpop.f32.mrb[39].mxu0  ;;  %vm574_vm6 = vcmp.ge.f32.partialorder %v508_v43, 0.0  ;;  %v1362_v50 = vpop.f32.mrb[39].mxu1  ;;  %v511_v52 = vadd.f32 %v1597_v29, %v510_v46 }
 0x12d   :  { %vm548_vm7 = vcmp.ge.f32.partialorder %v404_v41, 0.0  ;;  %v624_v51 = vmul.f32 0.2, %v508_v43 }
 0x12e   :  { %vm549_vm8 = vcmp.ge.f32.partialorder %v407_v48, 0.0  ;;  %v599_v53 = vmul.f32 0.2, %v407_v48  ;;  %vm575_vm9 = vcmp.ge.f32.partialorder %v511_v52, 0.0  ;;  %v625_v55 = vmul.f32 0.2, %v511_v52 }
 0x12f   :  { %v674_v54 = vsel %vm574_vm6, %v508_v43, %v624_v51  ;;  %v648_v56 = vsel %vm548_vm7, %v404_v41, %v598_v47 }
 0x130   :  { %v649_v57 = vsel %vm549_vm8, %v407_v48, %v599_v53  ;;  %v675_v59 = vsel %vm575_vm9, %v511_v52, %v625_v55 }
 0x131   :  { %v1136_v58 = vpack.c.bf16 %v649_v57, %v648_v56  ;;  %v411_v60 = vpop.f32.mrb[40].mxu0  ;;  %v515_v61 = vpop.f32.mrb[40].mxu1  ;;  %v1201_v62 = vpack.c.bf16 %v675_v59, %v674_v54 }
 0x132   :  { %v412_v63 = vadd.f32 %v1597_v29, %v411_v60  ;;  %v1313_v0 = vpop.f32.mrb[41].mxu0  ;;  %v516_v1 = vadd.f32 %v1597_v29, %v515_v61  ;;  %v1365_v2 = vpop.f32.mrb[41].mxu1 }
 0x133   :  { %1221 = vst [vmem:[%s1727_s3 + $0x48] sm:$0xff] %v1136_v58   ;;  %v414_v3 = vpop.f32.mrb[42].mxu0  ;;  %v518_v4 = vpop.f32.mrb[42].mxu1  ;;  %1234 = vst [vmem:[%s1727_s3 + $0xb0] sm:$0xff] %v1201_v62  }
 0x134   :  { %v600_v5 = vmul.f32 0.2, %v412_v63  ;;  %v415_v6 = vadd.f32 %v1597_v29, %v414_v3  ;;  %v1314_v7 = vpop.f32.mrb[43].mxu0  ;;  %vm576_vm10 = vcmp.ge.f32.partialorder %v516_v1, 0.0  ;;  %v1366_v8 = vpop.f32.mrb[43].mxu1  ;;  %vm550_vm11 = vcmp.ge.f32.partialorder %v412_v63, 0.0 }
 0x135   :  { %v626_v9 = vmul.f32 0.2, %v516_v1  ;;  %v519_v10 = vadd.f32 %v1597_v29, %v518_v4 }
 0x136   :  { %vm551_vm12 = vcmp.ge.f32.partialorder %v415_v6, 0.0  ;;  %v601_v11 = vmul.f32 0.2, %v415_v6  ;;  %v650_v14 = vsel %vm550_vm11, %v412_v63, %v600_v5 }
 0x137   :  { %v676_v12 = vsel %vm576_vm10, %v516_v1, %v626_v9  ;;  %vm577_vm13 = vcmp.ge.f32.partialorder %v519_v10, 0.0  ;;  %v627_v13 = vmul.f32 0.2, %v519_v10 }
 0x138   :  { %v651_v15 = vsel %vm551_vm12, %v415_v6, %v601_v11 }
 0x139   :  { %v1141_v16 = vpack.c.bf16 %v651_v15, %v650_v14  ;;  %v677_v17 = vsel %vm577_vm13, %v519_v10, %v627_v13  ;;  %v419_v18 = vpop.f32.mrb[44].mxu0  ;;  %v523_v19 = vpop.f32.mrb[44].mxu1 }
 0x13a   :  { %v1206_v20 = vpack.c.bf16 %v677_v17, %v676_v12  ;;  %v420_v21 = vadd.f32 %v1597_v29, %v419_v18  ;;  %v1317_v22 = vpop.f32.mrb[45].mxu0  ;;  %v524_v23 = vadd.f32 %v1597_v29, %v523_v19  ;;  %v1369_v24 = vpop.f32.mrb[45].mxu1 }
 0x13b   :  { %1222 = vst [vmem:[%s1727_s3 + $0x50] sm:$0xff] %v1141_v16   ;;  %v422_v25 = vpop.f32.mrb[46].mxu0  ;;  %v526_v26 = vpop.f32.mrb[46].mxu1 }
 0x13c   :  { %1235 = vst [vmem:[%s1727_s3 + $0xb8] sm:$0xff] %v1206_v20   ;;  %v602_v27 = vmul.f32 0.2, %v420_v21  ;;  %v423_v28 = vadd.f32 %v1597_v29, %v422_v25  ;;  %v1318_v30 = vpop.f32.mrb[47].mxu0  ;;  %vm578_vm14 = vcmp.ge.f32.partialorder %v524_v23, 0.0  ;;  %v1370_v31 = vpop.f32.mrb[47].mxu1  ;;  %v527_v33 = vadd.f32 %v1597_v29, %v526_v26 }
 0x13d   :  { %vm552_vm15 = vcmp.ge.f32.partialorder %v420_v21, 0.0  ;;  %v628_v32 = vmul.f32 0.2, %v524_v23 }
 0x13e   :  { %vm553_vm0 = vcmp.ge.f32.partialorder %v423_v28, 0.0  ;;  %v603_v34 = vmul.f32 0.2, %v423_v28  ;;  %vm579_vm1 = vcmp.ge.f32.partialorder %v527_v33, 0.0  ;;  %v629_v36 = vmul.f32 0.2, %v527_v33 }
 0x13f   :  { %v678_v35 = vsel %vm578_vm14, %v524_v23, %v628_v32  ;;  %v652_v37 = vsel %vm552_vm15, %v420_v21, %v602_v27 }
 0x140   :  { %v653_v38 = vsel %vm553_vm0, %v423_v28, %v603_v34  ;;  %v679_v40 = vsel %vm579_vm1, %v527_v33, %v629_v36 }
 0x141   :  { %v1146_v39 = vpack.c.bf16 %v653_v38, %v652_v37  ;;  %v427_v41 = vpop.f32.mrb[48].mxu0  ;;  %v1211_v42 = vpack.c.bf16 %v679_v40, %v678_v35 }
 0x142   :  { %v428_v43 = vadd.f32 %v1597_v29, %v427_v41  ;;  %v1321_v44 = vpop.f32.mrb[49].mxu0 }
 0x143   :  { %1223 = vst [vmem:[%s1727_s3 + $0x58] sm:$0xff] %v1146_v39   ;;  %v430_v45 = vpop.f32.mrb[50].mxu0  ;;  %1236 = vst [vmem:[%s1727_s3 + $0xc0] sm:$0xff] %v1211_v42  }
 0x144   :  { %v604_v46 = vmul.f32 0.2, %v428_v43  ;;  %v431_v47 = vadd.f32 %v1597_v29, %v430_v45  ;;  %v1322_v48 = vpop.f32.mrb[51].mxu0  ;;  %vm554_vm2 = vcmp.ge.f32.partialorder %v428_v43, 0.0 }
 0x146   :  { %vm555_vm3 = vcmp.ge.f32.partialorder %v431_v47, 0.0  ;;  %v605_v49 = vmul.f32 0.2, %v431_v47  ;;  %v654_v50 = vsel %vm554_vm2, %v428_v43, %v604_v46 }
 0x148   :  { %v655_v51 = vsel %vm555_vm3, %v431_v47, %v605_v49 }
 0x149   :  { %v1151_v52 = vpack.c.bf16 %v655_v51, %v654_v50 }
 0x14b   :  { %1224 = vst [vmem:[%s1727_s3 + $0x60] sm:$0xff] %v1151_v52  }

// kernel: dann_forward.4
= control target key start
LH: loop header
LB: loop body
LE: loop exit
PB: predicated region body
PF: predicated region fallthrough
CT: control target
= control target key end

     0   :  { %vm2528_vm1 = vcmask 519168   ;;  %s4349_s1 = inlined_call_operand.vmem [shape: bf16[2048,64], index: 1, kind: input, shape index: {}]   ;;  %s4350_s0 = inlined_call_operand.vmem [shape: bf16[112,2048], index: 0, kind: input, shape index: {}]   ;;  %s4351_s2 = inlined_call_operand.vmem [shape: f32[1,64], index: 2, kind: input, shape index: {}]   ;;  %s4352_s3 = inlined_call_operand.vmem [shape: bf16[112,64], index: 3, kind: output, shape index: {}]  }
   0x1   :  { %v3280_v0 = vld [vmem:[%s4349_s1 + $0x40] sm:$0xff]   ;;  %v3284_v4 = vld [vmem:[%s4349_s1 + $0x48] sm:$0xff]   ;;  %v3288_v8 = vld [vmem:[%s4349_s1 + $0x50] sm:$0xff]  }
   0x2   :  { %v3281_v1 = vld [vmem:[%s4349_s1 + $0xc0] sm:$0xff]   ;;  %2816 = vmatprep.subr.bf16.mxu0 %v3280_v0  ;;  %v3285_v5 = vld [vmem:[%s4349_s1 + $0xc8] sm:$0xff]   ;;  %v3289_v9 = vld [vmem:[%s4349_s1 + $0xd0] sm:$0xff]  }
   0x3   :  { %v3282_v2 = vld [vmem:[%s4349_s1] sm:$0xff]   ;;  %2874 = vmatprep.subr.bf16.mxu1 %v3281_v1  ;;  %v3286_v6 = vld [vmem:[%s4349_s1 + $0x8] sm:$0xff]   ;;  %v3290_v10 = vld [vmem:[%s4349_s1 + $0x10] sm:$0xff]  }
   0x4   :  { %v3283_v3 = vld [vmem:[%s4349_s1 + $0x80] sm:$0xff]   ;;  %2817 = vmatpush3.bf16.msra.mxu0 %v3282_v2  ;;  %v3287_v7 = vld [vmem:[%s4349_s1 + $0x88] sm:$0xff]   ;;  %v3291_v11 = vld [vmem:[%s4349_s1 + $0x90] sm:$0xff]  }
   0x5   :  { %2875 = vmatpush3.bf16.msra.mxu1 %v3283_v3  ;;  %2818 = vmatprep.subr.bf16.mxu0 %v3284_v4  ;;  %v3292_v12 = vld [vmem:[%s4349_s1 + $0x58] sm:$0xff]   ;;  %v3296_v16 = vld [vmem:[%s4349_s1 + $0x60] sm:$0xff]   ;;  %v3300_v20 = vld [vmem:[%s4349_s1 + $0x68] sm:$0xff]  }
   0x6   :  { %2876 = vmatprep.subr.bf16.mxu1 %v3285_v5  ;;  %v3293_v13 = vld [vmem:[%s4349_s1 + $0xd8] sm:$0xff]   ;;  %v3297_v17 = vld [vmem:[%s4349_s1 + $0xe0] sm:$0xff]   ;;  %v3301_v21 = vld [vmem:[%s4349_s1 + $0xe8] sm:$0xff]  }
   0x7   :  { %v3294_v14 = vld [vmem:[%s4349_s1 + $0x18] sm:$0xff]   ;;  %v3298_v18 = vld [vmem:[%s4349_s1 + $0x20] sm:$0xff]   ;;  %v3302_v22 = vld [vmem:[%s4349_s1 + $0x28] sm:$0xff]  }
   0x8   :  { %2819 = vmatpush3.bf16.msra.mxu0 %v3286_v6  ;;  %v3295_v15 = vld [vmem:[%s4349_s1 + $0x98] sm:$0xff]   ;;  %v3299_v19 = vld [vmem:[%s4349_s1 + $0xa0] sm:$0xff]   ;;  %v3303_v23 = vld [vmem:[%s4349_s1 + $0xa8] sm:$0xff]  }
   0x9   :  { %2877 = vmatpush3.bf16.msra.mxu1 %v3287_v7  ;;  %2820 = vmatprep.subr.bf16.mxu0 %v3288_v8  ;;  %v3304_v24 = vld [vmem:[%s4349_s1 + $0x70] sm:$0xff]   ;;  %v3308_v28 = vld [vmem:[%s4349_s1 + $0x78] sm:$0xff]   ;;  %v15_v32 = vld [vmem:[%s4350_s0] sm:$0xff] }
   0xa   :  { %2878 = vmatprep.subr.bf16.mxu1 %v3289_v9  ;;  %v3305_v25 = vld [vmem:[%s4349_s1 + $0xf0] sm:$0xff]   ;;  %v3309_v29 = vld [vmem:[%s4349_s1 + $0xf8] sm:$0xff]   ;;  %v23_v33 = vld [vmem:[%s4350_s0 + $0x40] sm:$0xff] }
   0xb   :  { %v3306_v26 = vld [vmem:[%s4349_s1 + $0x30] sm:$0xff]   ;;  %v3310_v30 = vld [vmem:[%s4349_s1 + $0x38] sm:$0xff]   ;;  %v16_v34 = vld [vmem:[%s4350_s0 + $0x8] sm:$0xff]  ;;  %v2548_v35 = vcombine.low %v15_v32, %v23_v33  ;;  %v2549_v36 = vcombine.high %v15_v32, %v23_v33 }
   0xc   :  { %2821 = vmatpush3.bf16.msra.mxu0 %v3290_v10  ;;  %v3307_v27 = vld [vmem:[%s4349_s1 + $0xb0] sm:$0xff]   ;;  %v3311_v31 = vld [vmem:[%s4349_s1 + $0xb8] sm:$0xff]   ;;  %v24_v37 = vld [vmem:[%s4350_s0 + $0x48] sm:$0xff] }
   0xd   :  { %2879 = vmatpush3.bf16.msra.mxu1 %v3291_v11  ;;  %2822 = vmatprep.subr.bf16.mxu0 %v3292_v12  ;;  %v2550_v38 = vcombine.low %v16_v34, %v24_v37  ;;  %v2551_v39 = vcombine.high %v16_v34, %v24_v37  ;;  %v3312_v40 = vld [vmem:[%s4349_s1 + $0x140] sm:$0xff]   ;;  %v32_v47 = vld [vmem:[%s4350_s0 + $0x88] sm:$0xff]  ;;  %v3320_v56 = vld [vmem:[%s4349_s1 + $0x150] sm:$0xff]  }
   0xe   :  { %2880 = vmatprep.subr.bf16.mxu1 %v3293_v13  ;;  %1750 = vmatprep.mubr.bf16.mxu0 %v2549_v36  ;;  %v3313_v41 = vld [vmem:[%s4349_s1 + $0x100] sm:$0xff]   ;;  %v40_v48 = vld [vmem:[%s4350_s0 + $0xc8] sm:$0xff]  ;;  %v3321_v63 = vld [vmem:[%s4349_s1 + $0x110] sm:$0xff]  }
   0xf   :  { %1839 = vmatprep.mubr.bf16.mxu1 %v2551_v39  ;;  %v3314_v42 = vld [vmem:[%s4349_s1 + $0x1c0] sm:$0xff]   ;;  %v2567_v49 = vcombine.high %v32_v47, %v40_v48  ;;  %v3316_v50 = vld [vmem:[%s4349_s1 + $0x148] sm:$0xff]   ;;  %v2566_v53 = vcombine.low %v32_v47, %v40_v48  ;;  %v3322_v0 = vld [vmem:[%s4349_s1 + $0x1d0] sm:$0xff]  }
  0x10   :  { %2823 = vmatpush3.bf16.msra.mxu0 %v3294_v14  ;;  %v3315_v43 = vld [vmem:[%s4349_s1 + $0x180] sm:$0xff]   ;;  %v3317_v52 = vld [vmem:[%s4349_s1 + $0x108] sm:$0xff]   ;;  %v3323_v1 = vld [vmem:[%s4349_s1 + $0x190] sm:$0xff]  }
  0x11   :  { %2881 = vmatpush3.bf16.msra.mxu1 %v3295_v15  ;;  %2824 = vmatprep.subr.bf16.mxu0 %v3296_v16  ;;  %v31_v44 = vld [vmem:[%s4350_s0 + $0x80] sm:$0xff]  ;;  %v3318_v54 = vld [vmem:[%s4349_s1 + $0x1c8] sm:$0xff]   ;;  %v3324_v3 = vld [vmem:[%s4349_s1 + $0x158] sm:$0xff]  }
  0x12   :  { %2882 = vmatprep.subr.bf16.mxu1 %v3297_v17  ;;  %v39_v45 = vld [vmem:[%s4350_s0 + $0xc0] sm:$0xff]  ;;  %v3319_v55 = vld [vmem:[%s4349_s1 + $0x188] sm:$0xff]   ;;  %v3325_v5 = vld [vmem:[%s4349_s1 + $0x118] sm:$0xff]  }
  0x13   :  { %v2565_v46 = vcombine.high %v31_v44, %v39_v45  ;;  %v2564_v51 = vcombine.low %v31_v44, %v39_v45  ;;  %v47_v57 = vld [vmem:[%s4350_s0 + $0x100] sm:$0xff]  ;;  %v48_v59 = vld [vmem:[%s4350_s0 + $0x108] sm:$0xff]  ;;  %v3326_v12 = vld [vmem:[%s4349_s1 + $0x1d8] sm:$0xff]  }
  0x14   :  { %2825 = vmatpush3.bf16.msra.mxu0 %v3298_v18  ;;  %v55_v58 = vld [vmem:[%s4350_s0 + $0x140] sm:$0xff]  ;;  %v56_v60 = vld [vmem:[%s4350_s0 + $0x148] sm:$0xff]  ;;  %v3327_v13 = vld [vmem:[%s4349_s1 + $0x198] sm:$0xff]  }
  0x15   :  { %2883 = vmatpush3.bf16.msra.mxu1 %v3299_v19  ;;  %2826 = vmatprep.subr.bf16.mxu0 %v3300_v20  ;;  %v2581_v61 = vcombine.high %v47_v57, %v55_v58  ;;  %v2583_v62 = vcombine.high %v48_v59, %v56_v60  ;;  %v2580_v2 = vcombine.low %v47_v57, %v55_v58  ;;  %v63_v6 = vld [vmem:[%s4350_s0 + $0x180] sm:$0xff]  ;;  %v64_v8 = vld [vmem:[%s4350_s0 + $0x188] sm:$0xff]  ;;  %v3341_v47 = vld [vmem:[%s4349_s1 + $0x138] sm:$0xff]  }
  0x16   :  { %2884 = vmatprep.subr.bf16.mxu1 %v3301_v21  ;;  %v2582_v4 = vcombine.low %v48_v59, %v56_v60  ;;  %v71_v7 = vld [vmem:[%s4350_s0 + $0x1c0] sm:$0xff]  ;;  %v72_v10 = vld [vmem:[%s4350_s0 + $0x1c8] sm:$0xff]  ;;  %v25_v57 = vld [vmem:[%s4350_s0 + $0x50] sm:$0xff] }
  0x17   :  { %v2597_v9 = vcombine.high %v63_v6, %v71_v7  ;;  %v2599_v11 = vcombine.high %v64_v8, %v72_v10  ;;  %v3328_v14 = vld [vmem:[%s4349_s1 + $0x160] sm:$0xff]   ;;  %v2596_v16 = vcombine.low %v63_v6, %v71_v7  ;;  %v2598_v20 = vcombine.low %v64_v8, %v72_v10  ;;  %v96_v32 = vld [vmem:[%s4350_s0 + $0x288] sm:$0xff]  ;;  %v18_v58 = vld [vmem:[%s4350_s0 + $0x18] sm:$0xff] }
  0x18   :  { %2827 = vmatpush3.bf16.msra.mxu0 %v3302_v22  ;;  %v3329_v15 = vld [vmem:[%s4349_s1 + $0x120] sm:$0xff]   ;;  %v80_v22 = vld [vmem:[%s4350_s0 + $0x208] sm:$0xff]  ;;  %v26_v59 = vld [vmem:[%s4350_s0 + $0x58] sm:$0xff] }
  0x19   :  { %2885 = vmatpush3.bf16.msra.mxu1 %v3303_v23  ;;  %2828 = vmatprep.subr.bf16.mxu0 %v3304_v24  ;;  %v3330_v17 = vld [vmem:[%s4349_s1 + $0x1e0] sm:$0xff]   ;;  %v88_v23 = vld [vmem:[%s4350_s0 + $0x248] sm:$0xff] }
  0x1a   :  { %2886 = vmatprep.subr.bf16.mxu1 %v3305_v25  ;;  %v79_v18 = vld [vmem:[%s4350_s0 + $0x200] sm:$0xff]  ;;  %v2615_v24 = vcombine.high %v80_v22, %v88_v23  ;;  %v104_v33 = vld [vmem:[%s4350_s0 + $0x2c8] sm:$0xff]  ;;  %v2614_v36 = vcombine.low %v80_v22, %v88_v23 }
  0x1b   :  { %v87_v19 = vld [vmem:[%s4350_s0 + $0x240] sm:$0xff]  ;;  %v2631_v39 = vcombine.high %v96_v32, %v104_v33  ;;  %v112_v44 = vld [vmem:[%s4350_s0 + $0x308] sm:$0xff] }
  0x1c   :  { %2829 = vmatpush3.bf16.msra.mxu0 %v3306_v26  ;;  %v2613_v21 = vcombine.high %v79_v18, %v87_v19  ;;  %v3331_v25 = vld [vmem:[%s4349_s1 + $0x1a0] sm:$0xff]   ;;  %v3332_v26 = vld [vmem:[%s4349_s1 + $0x168] sm:$0xff]   ;;  %v2612_v34 = vcombine.low %v79_v18, %v87_v19  ;;  %v58_v18 = vld [vmem:[%s4350_s0 + $0x158] sm:$0xff] }
  0x1d   :  { %2887 = vmatpush3.bf16.msra.mxu1 %v3307_v27  ;;  %2830 = vmatprep.subr.bf16.mxu0 %v3308_v28  ;;  %v3333_v27 = vld [vmem:[%s4349_s1 + $0x128] sm:$0xff]   ;;  %v3345_v6 = vld [vmem:[%s4349_s1 + $0x200] sm:$0xff]   ;;  %v3354_v19 = vld [vmem:[%s4349_s1 + $0x2d0] sm:$0xff]  }
  0x1e   :  { %2888 = vmatprep.subr.bf16.mxu1 %v3309_v29  ;;  %v3334_v28 = vld [vmem:[%s4349_s1 + $0x1e8] sm:$0xff]   ;;  %v3347_v7 = vld [vmem:[%s4349_s1 + $0x280] sm:$0xff]  }
  0x1f   :  { %v3335_v29 = vld [vmem:[%s4349_s1 + $0x1a8] sm:$0xff]  }
  0x20   :  { %2831 = vmatpush3.bf16.msra.mxu0 %v3310_v30  ;;  %v95_v30 = vld [vmem:[%s4350_s0 + $0x280] sm:$0xff]  ;;  %v120_v45 = vld [vmem:[%s4350_s0 + $0x348] sm:$0xff] }
  0x21   :  { %2889 = vmatpush3.bf16.msra.mxu1 %v3311_v31  ;;  %2932 = vmatprep.subr.bf16.mxu0 %v3312_v40  ;;  %v103_v31 = vld [vmem:[%s4350_s0 + $0x2c0] sm:$0xff]  ;;  %v3338_v40 = vld [vmem:[%s4349_s1 + $0x1f0] sm:$0xff]   ;;  %v3348_v10 = vld [vmem:[%s4349_s1 + $0x248] sm:$0xff]  }
  0x22   :  { %2990 = vmatprep.subr.bf16.mxu1 %v3314_v42  ;;  %v2629_v37 = vcombine.high %v95_v30, %v103_v31  ;;  %v111_v42 = vld [vmem:[%s4350_s0 + $0x300] sm:$0xff]  ;;  %v2628_v48 = vcombine.low %v95_v30, %v103_v31  ;;  %v3358_v30 = vld [vmem:[%s4349_s1 + $0x2d8] sm:$0xff]  }
  0x23   :  { %1751 = vmatmul.mubr.bf16.vlgmr.msra.gmra.mrb[0].mxu0 %v2548_v35  ;;  %v3336_v35 = vld [vmem:[%s4349_s1 + $0x170] sm:$0xff]   ;;  %v66_v31 = vld [vmem:[%s4350_s0 + $0x198] sm:$0xff] }
  0x24   :  { %1840 = vmatmul.mubr.bf16.vlgmr.msra.gmra.mrb[0].mxu1 %v2550_v38  ;;  %2933 = vmatpush3.bf16.msra.mxu0 %v3313_v41  ;;  %v3337_v38 = vld [vmem:[%s4349_s1 + $0x130] sm:$0xff]  }
  0x25   :  { %2991 = vmatpush3.bf16.msra.mxu1 %v3315_v43  ;;  %1758 = vmatprep.mubr.bf16.mxu0 %v2565_v46  ;;  %v3339_v41 = vld [vmem:[%s4349_s1 + $0x1b0] sm:$0xff]   ;;  %v119_v43 = vld [vmem:[%s4350_s0 + $0x340] sm:$0xff]  ;;  %v3340_v46 = vld [vmem:[%s4349_s1 + $0x178] sm:$0xff]  }
  0x26   :  { %1847 = vmatprep.mubr.bf16.mxu1 %v2567_v49  ;;  %2934 = vmatprep.subr.bf16.mxu0 %v3316_v50  ;;  %v3342_v49 = vld [vmem:[%s4349_s1 + $0x1f8] sm:$0xff]   ;;  %v2630_v50 = vcombine.low %v96_v32, %v104_v33  ;;  %v2644_v60 = vcombine.low %v111_v42, %v119_v43 }
  0x27   :  { %2992 = vmatprep.subr.bf16.mxu1 %v3318_v54  ;;  %v3344_v54 = vld [vmem:[%s4349_s1 + $0x240] sm:$0xff]   ;;  %v74_v32 = vld [vmem:[%s4350_s0 + $0x1d8] sm:$0xff] }
  0x28   :  { %2935 = vmatpush3.bf16.msra.mxu0 %v3317_v52  ;;  %v3343_v52 = vld [vmem:[%s4349_s1 + $0x1b8] sm:$0xff]  }
  0x29   :  { %2993 = vmatpush3.bf16.msra.mxu1 %v3319_v55  ;;  %2936 = vmatprep.subr.bf16.mxu0 %v3320_v56  ;;  %v3346_v55 = vld [vmem:[%s4349_s1 + $0x2c0] sm:$0xff]   ;;  %v17_v56 = vld [vmem:[%s4350_s0 + $0x10] sm:$0xff]  ;;  %v3359_v33 = vld [vmem:[%s4349_s1 + $0x298] sm:$0xff]  }
  0x2a   :  { %2994 = vmatprep.subr.bf16.mxu1 %v3322_v0  ;;  %v33_v0 = vld [vmem:[%s4350_s0 + $0x90] sm:$0xff] }
  0x2b   :  { %1759 = vmatmul.mubr.bf16.gmra.mrb[4].mxu0 %v2564_v51  ;;  %v2645_v51 = vcombine.high %v111_v42, %v119_v43  ;;  %v3364_v42 = vld [vmem:[%s4349_s1 + $0x268] sm:$0xff]   ;;  %v81_v43 = vld [vmem:[%s4350_s0 + $0x210] sm:$0xff] }
  0x2c   :  { %1848 = vmatmul.mubr.bf16.gmra.mrb[4].mxu1 %v2566_v53  ;;  %1766 = vmatprep.mubr.bf16.mxu0 %v2581_v61  ;;  %v2647_v53 = vcombine.high %v112_v44, %v120_v45  ;;  %v2646_v61 = vcombine.low %v112_v44, %v120_v45  ;;  %v3366_v44 = vld [vmem:[%s4349_s1 + $0x2e8] sm:$0xff]   ;;  %v89_v45 = vld [vmem:[%s4350_s0 + $0x250] sm:$0xff] }
  0x2d   :  { %1855 = vmatprep.mubr.bf16.mxu1 %v2583_v62  ;;  %2937 = vmatpush3.bf16.msra.mxu0 %v3321_v63  ;;  %v2553_v62 = vcombine.high %v17_v56, %v25_v57  ;;  %v2555_v63 = vcombine.high %v18_v58, %v26_v59 }
  0x2e   :  { %2995 = vmatpush3.bf16.msra.mxu1 %v3323_v1  ;;  %2938 = vmatprep.subr.bf16.mxu0 %v3324_v3  ;;  %v41_v1 = vld [vmem:[%s4350_s0 + $0xd0] sm:$0xff]  ;;  %v2552_v3 = vcombine.low %v17_v56, %v25_v57 }
  0x2f   :  { %2996 = vmatprep.subr.bf16.mxu1 %v3326_v12  ;;  %v2569_v8 = vcombine.high %v33_v0, %v41_v1  ;;  %v3350_v12 = vld [vmem:[%s4349_s1 + $0x2c8] sm:$0xff]   ;;  %v3369_v56 = vld [vmem:[%s4349_s1 + $0x230] sm:$0xff]  }
  0x30   :  { %v3371_v57 = vld [vmem:[%s4349_s1 + $0x2b0] sm:$0xff]  }
  0x31   :  { %2939 = vmatpush3.bf16.msra.mxu0 %v3325_v5  ;;  %v2554_v5 = vcombine.low %v18_v58, %v26_v59  ;;  %v3372_v58 = vld [vmem:[%s4349_s1 + $0x278] sm:$0xff]   ;;  %v97_v59 = vld [vmem:[%s4350_s0 + $0x290] sm:$0xff] }
  0x32   :  { %2997 = vmatpush3.bf16.msra.mxu1 %v3327_v13  ;;  %2940 = vmatprep.subr.bf16.mxu0 %v3328_v14  ;;  %v3351_v13 = vld [vmem:[%s4349_s1 + $0x288] sm:$0xff]   ;;  %v3352_v14 = vld [vmem:[%s4349_s1 + $0x250] sm:$0xff]  }
  0x33   :  { %1767 = vmatmul.mubr.bf16.gmra.mrb[8].mxu0 %v2580_v2  ;;  %2998 = vmatprep.subr.bf16.mxu1 %v3330_v17  ;;  %v34_v2 = vld [vmem:[%s4350_s0 + $0x98] sm:$0xff] }
  0x34   :  { %1856 = vmatmul.mubr.bf16.gmra.mrb[8].mxu1 %v2582_v4  ;;  %1774 = vmatprep.mubr.bf16.mxu0 %v2597_v9  ;;  %v42_v4 = vld [vmem:[%s4350_s0 + $0xd8] sm:$0xff] }
  0x35   :  { %1863 = vmatprep.mubr.bf16.mxu1 %v2599_v11  ;;  %2941 = vmatpush3.bf16.msra.mxu0 %v3329_v15  ;;  %v2571_v9 = vcombine.high %v34_v2, %v42_v4  ;;  %v3349_v11 = vld [vmem:[%s4349_s1 + $0x208] sm:$0xff]   ;;  %v49_v15 = vld [vmem:[%s4350_s0 + $0x110] sm:$0xff]  ;;  %v50_v17 = vld [vmem:[%s4350_s0 + $0x118] sm:$0xff] }
  0x36   :  { %2999 = vmatpush3.bf16.msra.mxu1 %v3331_v25  ;;  %2942 = vmatprep.subr.bf16.mxu0 %v3332_v26  ;;  %v2587_v23 = vcombine.high %v50_v17, %v58_v18  ;;  %v3355_v25 = vld [vmem:[%s4349_s1 + $0x290] sm:$0xff]   ;;  %v3356_v26 = vld [vmem:[%s4349_s1 + $0x258] sm:$0xff]  }
  0x37   :  { %3000 = vmatprep.subr.bf16.mxu1 %v3334_v28  ;;  %v65_v28 = vld [vmem:[%s4350_s0 + $0x190] sm:$0xff] }
  0x39   :  { %2943 = vmatpush3.bf16.msra.mxu0 %v3333_v27  ;;  %v3357_v27 = vld [vmem:[%s4349_s1 + $0x218] sm:$0xff]  }
  0x3a   :  { %3001 = vmatpush3.bf16.msra.mxu1 %v3335_v29  ;;  %2944 = vmatprep.subr.bf16.mxu0 %v3336_v35  ;;  %v73_v29 = vld [vmem:[%s4350_s0 + $0x1d0] sm:$0xff] }
  0x3b   :  { %1775 = vmatmul.mubr.bf16.gmra.mrb[12].mxu0 %v2596_v16  ;;  %3002 = vmatprep.subr.bf16.mxu1 %v3338_v40  ;;  %v57_v16 = vld [vmem:[%s4350_s0 + $0x150] sm:$0xff]  ;;  %v2603_v40 = vcombine.high %v66_v31, %v74_v32 }
  0x3c   :  { %1864 = vmatmul.mubr.bf16.gmra.mrb[12].mxu1 %v2598_v20  ;;  %1782 = vmatprep.mubr.bf16.mxu0 %v2613_v21  ;;  %v2568_v20 = vcombine.low %v33_v0, %v41_v1  ;;  %v2570_v21 = vcombine.low %v34_v2, %v42_v4  ;;  %v2585_v22 = vcombine.high %v49_v15, %v57_v16  ;;  %v3373_v0 = vld [vmem:[%s4349_s1 + $0x238] sm:$0xff]   ;;  %v3376_v2 = vld [vmem:[%s4349_s1 + $0x340] sm:$0xff]  }
  0x3d   :  { %1871 = vmatprep.mubr.bf16.mxu1 %v2615_v24  ;;  %2945 = vmatpush3.bf16.msra.mxu0 %v3337_v38  ;;  %v3353_v24 = vld [vmem:[%s4349_s1 + $0x210] sm:$0xff]   ;;  %v2584_v35 = vcombine.low %v49_v15, %v57_v16  ;;  %v2601_v38 = vcombine.high %v65_v28, %v73_v29  ;;  %v3375_v1 = vld [vmem:[%s4349_s1 + $0x2b8] sm:$0xff]   ;;  %v3378_v4 = vld [vmem:[%s4349_s1 + $0x3c0] sm:$0xff]  }
  0x3e   :  { %3003 = vmatpush3.bf16.msra.mxu1 %v3339_v41  ;;  %2946 = vmatprep.subr.bf16.mxu0 %v3340_v46  ;;  %v3363_v41 = vld [vmem:[%s4349_s1 + $0x2a0] sm:$0xff]   ;;  %v82_v46 = vld [vmem:[%s4350_s0 + $0x218] sm:$0xff] }
  0x3f   :  { %3004 = vmatprep.subr.bf16.mxu1 %v3342_v49  ;;  %v3367_v49 = vld [vmem:[%s4349_s1 + $0x2a8] sm:$0xff]   ;;  %v19_v16 = vld [vmem:[%s4350_s0 + $0x20] sm:$0xff] }
  0x41   :  { %2947 = vmatpush3.bf16.msra.mxu0 %v3341_v47  ;;  %v90_v47 = vld [vmem:[%s4350_s0 + $0x258] sm:$0xff] }
  0x42   :  { %3005 = vmatpush3.bf16.msra.mxu1 %v3343_v52  ;;  %3048 = vmatprep.subr.bf16.mxu0 %v3344_v54  ;;  %v3370_v52 = vld [vmem:[%s4349_s1 + $0x2f0] sm:$0xff]   ;;  %v2617_v54 = vcombine.high %v81_v43, %v89_v45 }
  0x43   :  { %1783 = vmatmul.mubr.bf16.gmra.mrb[16].mxu0 %v2612_v34  ;;  %3106 = vmatprep.subr.bf16.mxu1 %v3346_v55  ;;  %v3360_v34 = vld [vmem:[%s4349_s1 + $0x260] sm:$0xff]   ;;  %v2619_v55 = vcombine.high %v82_v46, %v90_v47 }
  0x44   :  { %1872 = vmatmul.mubr.bf16.gmra.mrb[16].mxu1 %v2614_v36  ;;  %1790 = vmatprep.mubr.bf16.mxu0 %v2629_v37  ;;  %v3362_v36 = vld [vmem:[%s4349_s1 + $0x2e0] sm:$0xff]   ;;  %v2586_v37 = vcombine.low %v50_v17, %v58_v18  ;;  %v20_v18 = vld [vmem:[%s4350_s0 + $0x28] sm:$0xff] }
  0x45   :  { %1879 = vmatprep.mubr.bf16.mxu1 %v2631_v39  ;;  %v3361_v39 = vld [vmem:[%s4349_s1 + $0x220] sm:$0xff]  }
  0x46   :  { %v27_v17 = vld [vmem:[%s4350_s0 + $0x60] sm:$0xff] }
  0x4b   :  { %1791 = vmatmul.mubr.bf16.gmra.mrb[20].mxu0 %v2628_v48  ;;  %v3365_v48 = vld [vmem:[%s4349_s1 + $0x228] sm:$0xff]  }
  0x4c   :  { %1880 = vmatmul.mubr.bf16.gmra.mrb[20].mxu1 %v2630_v50  ;;  %1798 = vmatprep.mubr.bf16.mxu0 %v2645_v51  ;;  %v3368_v50 = vld [vmem:[%s4349_s1 + $0x270] sm:$0xff]   ;;  %v2600_v51 = vcombine.low %v65_v28, %v73_v29  ;;  %v44_v28 = vld [vmem:[%s4350_s0 + $0xe8] sm:$0xff] }
  0x4d   :  { %1887 = vmatprep.mubr.bf16.mxu1 %v2647_v53  ;;  %v2602_v53 = vcombine.low %v66_v31, %v74_v32  ;;  %v3379_v31 = vld [vmem:[%s4349_s1 + $0x380] sm:$0xff]  }
  0x53   :  { %1799 = vmatmul.mubr.bf16.gmra.mrb[24].mxu0 %v2644_v60  ;;  %v105_v60 = vld [vmem:[%s4350_s0 + $0x2d0] sm:$0xff] }
  0x54   :  { %1888 = vmatmul.mubr.bf16.gmra.mrb[24].mxu1 %v2646_v61  ;;  %1928 = vmatprep.mubr.bf16.mxu0 %v2553_v62  ;;  %v3374_v61 = vld [vmem:[%s4349_s1 + $0x2f8] sm:$0xff]  }
  0x55   :  { %2017 = vmatprep.mubr.bf16.mxu1 %v2555_v63  ;;  %v98_v62 = vld [vmem:[%s4350_s0 + $0x298] sm:$0xff] }
  0x56   :  { %v106_v63 = vld [vmem:[%s4350_s0 + $0x2d8] sm:$0xff] }
  0x5b   :  { %1929 = vmatmul.mubr.bf16.vlgmr.msra.gmra.mrb[28].mxu0 %v2552_v3  ;;  %v2616_v3 = vcombine.low %v81_v43, %v89_v45  ;;  %v3386_v43 = vld [vmem:[%s4349_s1 + $0x3d0] sm:$0xff]  }
  0x5c   :  { %2018 = vmatmul.mubr.bf16.vlgmr.msra.gmra.mrb[28].mxu1 %v2554_v5  ;;  %3049 = vmatpush3.bf16.msra.mxu0 %v3345_v6  ;;  %v2618_v5 = vcombine.low %v82_v46, %v90_v47  ;;  %v2633_v6 = vcombine.high %v97_v59, %v105_v60  ;;  %v3385_v47 = vld [vmem:[%s4349_s1 + $0x310] sm:$0xff]  }
  0x5d   :  { %3107 = vmatpush3.bf16.msra.mxu1 %v3347_v7  ;;  %1936 = vmatprep.mubr.bf16.mxu0 %v2569_v8  ;;  %v2635_v7 = vcombine.high %v98_v62, %v106_v63  ;;  %v113_v8 = vld [vmem:[%s4350_s0 + $0x310] sm:$0xff] }
  0x5e   :  { %2025 = vmatprep.mubr.bf16.mxu1 %v2571_v9  ;;  %3050 = vmatprep.subr.bf16.mxu0 %v3348_v10  ;;  %v121_v9 = vld [vmem:[%s4350_s0 + $0x350] sm:$0xff]  ;;  %v114_v10 = vld [vmem:[%s4350_s0 + $0x318] sm:$0xff] }
  0x5f   :  { %3108 = vmatprep.subr.bf16.mxu1 %v3350_v12  ;;  %v2632_v12 = vcombine.low %v97_v59, %v105_v60  ;;  %v3394_v60 = vld [vmem:[%s4349_s1 + $0x3e0] sm:$0xff]  }
  0x60   :  { %3051 = vmatpush3.bf16.msra.mxu0 %v3349_v11  ;;  %v122_v11 = vld [vmem:[%s4350_s0 + $0x358] sm:$0xff] }
  0x61   :  { %3109 = vmatpush3.bf16.msra.mxu1 %v3351_v13  ;;  %3052 = vmatprep.subr.bf16.mxu0 %v3352_v14  ;;  %v2634_v13 = vcombine.low %v98_v62, %v106_v63  ;;  %v2649_v14 = vcombine.high %v113_v8, %v121_v9  ;;  %v2651_v15 = vcombine.high %v114_v10, %v122_v11 }
  0x62   :  { %3110 = vmatprep.subr.bf16.mxu1 %v3354_v19  ;;  %v28_v19 = vld [vmem:[%s4350_s0 + $0x68] sm:$0xff] }
  0x63   :  { %1937 = vmatmul.mubr.bf16.gmra.mrb[32].mxu0 %v2568_v20  ;;  %v2648_v20 = vcombine.low %v113_v8, %v121_v9  ;;  %v2558_v29 = vcombine.low %v20_v18, %v28_v19  ;;  %v92_v8 = vld [vmem:[%s4350_s0 + $0x268] sm:$0xff] }
  0x64   :  { %2026 = vmatmul.mubr.bf16.gmra.mrb[32].mxu1 %v2570_v21  ;;  %1944 = vmatprep.mubr.bf16.mxu0 %v2585_v22  ;;  %v2650_v21 = vcombine.low %v114_v10, %v122_v11  ;;  %v2557_v22 = vcombine.high %v19_v16, %v27_v17  ;;  %v3399_v9 = vld [vmem:[%s4349_s1 + $0x3a8] sm:$0xff]   ;;  %v3400_v10 = vld [vmem:[%s4349_s1 + $0x370] sm:$0xff]  }
  0x65   :  { %2033 = vmatprep.mubr.bf16.mxu1 %v2587_v23  ;;  %3053 = vmatpush3.bf16.msra.mxu0 %v3353_v24  ;;  %v2559_v23 = vcombine.high %v20_v18, %v28_v19  ;;  %v35_v24 = vld [vmem:[%s4350_s0 + $0xa0] sm:$0xff]  ;;  %v3404_v18 = vld [vmem:[%s4349_s1 + $0x378] sm:$0xff]  }
  0x66   :  { %3111 = vmatpush3.bf16.msra.mxu1 %v3355_v25  ;;  %3054 = vmatprep.subr.bf16.mxu0 %v3356_v26  ;;  %v43_v25 = vld [vmem:[%s4350_s0 + $0xe0] sm:$0xff]  ;;  %v36_v26 = vld [vmem:[%s4350_s0 + $0xa8] sm:$0xff]  ;;  %v3406_v19 = vld [vmem:[%s4349_s1 + $0x3f8] sm:$0xff]  }
  0x67   :  { %3112 = vmatprep.subr.bf16.mxu1 %v3358_v30  ;;  %v3377_v30 = vld [vmem:[%s4349_s1 + $0x300] sm:$0xff]   ;;  %v2573_v32 = vcombine.high %v35_v24, %v43_v25  ;;  %v2574_v45 = vcombine.low %v36_v26, %v44_v28 }
  0x69   :  { %3055 = vmatpush3.bf16.msra.mxu0 %v3357_v27  ;;  %v2556_v27 = vcombine.low %v19_v16, %v27_v17  ;;  %v3401_v16 = vld [vmem:[%s4349_s1 + $0x330] sm:$0xff]  }
  0x6a   :  { %3113 = vmatpush3.bf16.msra.mxu1 %v3359_v33  ;;  %3056 = vmatprep.subr.bf16.mxu0 %v3360_v34  ;;  %v3380_v33 = vld [vmem:[%s4349_s1 + $0x348] sm:$0xff]   ;;  %v2575_v34 = vcombine.high %v36_v26, %v44_v28  ;;  %v3403_v17 = vld [vmem:[%s4349_s1 + $0x3b0] sm:$0xff]  }
  0x6b   :  { %1945 = vmatmul.mubr.bf16.gmra.mrb[36].mxu0 %v2584_v35  ;;  %3114 = vmatprep.subr.bf16.mxu1 %v3362_v36  ;;  %v3381_v35 = vld [vmem:[%s4349_s1 + $0x308] sm:$0xff]  }
  0x6c   :  { %2034 = vmatmul.mubr.bf16.gmra.mrb[36].mxu1 %v2586_v37  ;;  %1952 = vmatprep.mubr.bf16.mxu0 %v2601_v38  ;;  %v3382_v36 = vld [vmem:[%s4349_s1 + $0x3c8] sm:$0xff]   ;;  %v3384_v38 = vld [vmem:[%s4349_s1 + $0x350] sm:$0xff]  }
  0x6d   :  { %2041 = vmatprep.mubr.bf16.mxu1 %v2603_v40  ;;  %3057 = vmatpush3.bf16.msra.mxu0 %v3361_v39  ;;  %v3383_v37 = vld [vmem:[%s4349_s1 + $0x388] sm:$0xff]   ;;  %v51_v39 = vld [vmem:[%s4350_s0 + $0x120] sm:$0xff] }
  0x6e   :  { %3115 = vmatpush3.bf16.msra.mxu1 %v3363_v41  ;;  %3058 = vmatprep.subr.bf16.mxu0 %v3364_v42  ;;  %v59_v40 = vld [vmem:[%s4350_s0 + $0x160] sm:$0xff]  ;;  %v52_v41 = vld [vmem:[%s4350_s0 + $0x128] sm:$0xff] }
  0x6f   :  { %3116 = vmatprep.subr.bf16.mxu1 %v3366_v44  ;;  %v60_v42 = vld [vmem:[%s4350_s0 + $0x168] sm:$0xff]  ;;  %v2572_v44 = vcombine.low %v35_v24, %v43_v25  ;;  %v2589_v46 = vcombine.high %v51_v39, %v59_v40  ;;  %v2588_v59 = vcombine.low %v51_v39, %v59_v40  ;;  %v3407_v25 = vld [vmem:[%s4349_s1 + $0x3b8] sm:$0xff]   ;;  %v29_v39 = vld [vmem:[%s4350_s0 + $0x70] sm:$0xff] }
  0x70   :  { %v108_v24 = vld [vmem:[%s4350_s0 + $0x2e8] sm:$0xff]  ;;  %v22_v40 = vld [vmem:[%s4350_s0 + $0x38] sm:$0xff] }
  0x71   :  { %3059 = vmatpush3.bf16.msra.mxu0 %v3365_v48  ;;  %v2591_v48 = vcombine.high %v52_v41, %v60_v42 }
  0x72   :  { %3117 = vmatpush3.bf16.msra.mxu1 %v3367_v49  ;;  %3060 = vmatprep.subr.bf16.mxu0 %v3368_v50  ;;  %v3387_v49 = vld [vmem:[%s4349_s1 + $0x390] sm:$0xff]   ;;  %v3388_v50 = vld [vmem:[%s4349_s1 + $0x358] sm:$0xff]  }
  0x73   :  { %1953 = vmatmul.mubr.bf16.gmra.mrb[40].mxu0 %v2600_v51  ;;  %3118 = vmatprep.subr.bf16.mxu1 %v3370_v52  ;;  %v3390_v51 = vld [vmem:[%s4349_s1 + $0x3d8] sm:$0xff]  }
  0x74   :  { %2042 = vmatmul.mubr.bf16.gmra.mrb[40].mxu1 %v2602_v53  ;;  %1960 = vmatprep.mubr.bf16.mxu0 %v2617_v54  ;;  %v3389_v52 = vld [vmem:[%s4349_s1 + $0x318] sm:$0xff]   ;;  %v67_v53 = vld [vmem:[%s4350_s0 + $0x1a0] sm:$0xff] }
  0x75   :  { %2049 = vmatprep.mubr.bf16.mxu1 %v2619_v55  ;;  %3061 = vmatpush3.bf16.msra.mxu0 %v3369_v56  ;;  %v75_v54 = vld [vmem:[%s4350_s0 + $0x1e0] sm:$0xff]  ;;  %v68_v55 = vld [vmem:[%s4350_s0 + $0x1a8] sm:$0xff] }
  0x76   :  { %3119 = vmatpush3.bf16.msra.mxu1 %v3371_v57  ;;  %3062 = vmatprep.subr.bf16.mxu0 %v3372_v58  ;;  %v76_v56 = vld [vmem:[%s4350_s0 + $0x1e8] sm:$0xff]  ;;  %v3391_v57 = vld [vmem:[%s4349_s1 + $0x398] sm:$0xff]   ;;  %v3392_v58 = vld [vmem:[%s4349_s1 + $0x360] sm:$0xff]   ;;  %v2605_v62 = vcombine.high %v67_v53, %v75_v54  ;;  %v2604_v11 = vcombine.low %v67_v53, %v75_v54 }
  0x77   :  { %3120 = vmatprep.subr.bf16.mxu1 %v3374_v61  ;;  %v2590_v61 = vcombine.low %v52_v41, %v60_v42  ;;  %v2607_v63 = vcombine.high %v68_v55, %v76_v56  ;;  %v30_v41 = vld [vmem:[%s4350_s0 + $0x78] sm:$0xff]  ;;  %v53_v54 = vld [vmem:[%s4350_s0 + $0x130] sm:$0xff] }
  0x79   :  { %3063 = vmatpush3.bf16.msra.mxu0 %v3373_v0  ;;  %v3393_v0 = vld [vmem:[%s4349_s1 + $0x320] sm:$0xff]  }
  0x7a   :  { %3121 = vmatpush3.bf16.msra.mxu1 %v3375_v1  ;;  %3164 = vmatprep.subr.bf16.mxu0 %v3376_v2  ;;  %v3395_v1 = vld [vmem:[%s4349_s1 + $0x3a0] sm:$0xff]   ;;  %v3396_v2 = vld [vmem:[%s4349_s1 + $0x368] sm:$0xff]  }
  0x7b   :  { %1961 = vmatmul.mubr.bf16.gmra.mrb[44].mxu0 %v2616_v3  ;;  %3222 = vmatprep.subr.bf16.mxu1 %v3378_v4  ;;  %v3398_v3 = vld [vmem:[%s4349_s1 + $0x3e8] sm:$0xff]   ;;  %v83_v4 = vld [vmem:[%s4350_s0 + $0x220] sm:$0xff] }
  0x7c   :  { %2050 = vmatmul.mubr.bf16.gmra.mrb[44].mxu1 %v2618_v5  ;;  %1968 = vmatprep.mubr.bf16.mxu0 %v2633_v6  ;;  %v91_v5 = vld [vmem:[%s4350_s0 + $0x260] sm:$0xff]  ;;  %v84_v6 = vld [vmem:[%s4350_s0 + $0x228] sm:$0xff] }
  0x7d   :  { %2057 = vmatprep.mubr.bf16.mxu1 %v2635_v7  ;;  %v3397_v7 = vld [vmem:[%s4349_s1 + $0x328] sm:$0xff]   ;;  %v2620_v26 = vcombine.low %v83_v4, %v91_v5 }
  0x83   :  { %1969 = vmatmul.mubr.bf16.gmra.mrb[48].mxu0 %v2632_v12  ;;  %v3402_v12 = vld [vmem:[%s4349_s1 + $0x3f0] sm:$0xff]  }
  0x84   :  { %2058 = vmatmul.mubr.bf16.gmra.mrb[48].mxu1 %v2634_v13  ;;  %1976 = vmatprep.mubr.bf16.mxu0 %v2649_v14  ;;  %v2606_v13 = vcombine.low %v68_v55, %v76_v56  ;;  %v2621_v14 = vcombine.high %v83_v4, %v91_v5  ;;  %v61_v55 = vld [vmem:[%s4350_s0 + $0x170] sm:$0xff]  ;;  %v54_v56 = vld [vmem:[%s4350_s0 + $0x138] sm:$0xff] }
  0x85   :  { %2065 = vmatprep.mubr.bf16.mxu1 %v2651_v15  ;;  %v2623_v15 = vcombine.high %v84_v6, %v92_v8 }
  0x8b   :  { %1977 = vmatmul.mubr.bf16.gmra.mrb[52].mxu0 %v2648_v20  ;;  %v99_v20 = vld [vmem:[%s4350_s0 + $0x2a0] sm:$0xff] }
  0x8c   :  { %2066 = vmatmul.mubr.bf16.gmra.mrb[52].mxu1 %v2650_v21  ;;  %2106 = vmatprep.mubr.bf16.mxu0 %v2557_v22  ;;  %v107_v21 = vld [vmem:[%s4350_s0 + $0x2e0] sm:$0xff]  ;;  %v3405_v22 = vld [vmem:[%s4349_s1 + $0x338] sm:$0xff]  }
  0x8d   :  { %2195 = vmatprep.mubr.bf16.mxu1 %v2559_v23  ;;  %v100_v23 = vld [vmem:[%s4350_s0 + $0x2a8] sm:$0xff]  ;;  %v2637_v28 = vcombine.high %v99_v20, %v107_v21 }
  0x93   :  { %2107 = vmatmul.mubr.bf16.vlgmr.msra.gmra.mrb[56].mxu0 %v2556_v27  ;;  %v2622_v27 = vcombine.low %v84_v6, %v92_v8  ;;  %v85_v6 = vld [vmem:[%s4350_s0 + $0x230] sm:$0xff]  ;;  %v86_v8 = vld [vmem:[%s4350_s0 + $0x238] sm:$0xff] }
  0x94   :  { %2196 = vmatmul.mubr.bf16.vlgmr.msra.gmra.mrb[56].mxu1 %v2558_v29  ;;  %3165 = vmatpush3.bf16.msra.mxu0 %v3377_v30  ;;  %v2639_v29 = vcombine.high %v100_v23, %v108_v24  ;;  %v115_v30 = vld [vmem:[%s4350_s0 + $0x320] sm:$0xff] }
  0x95   :  { %3223 = vmatpush3.bf16.msra.mxu1 %v3379_v31  ;;  %2114 = vmatprep.mubr.bf16.mxu0 %v2573_v32  ;;  %v123_v31 = vld [vmem:[%s4350_s0 + $0x360] sm:$0xff]  ;;  %v116_v32 = vld [vmem:[%s4350_s0 + $0x328] sm:$0xff] }
  0x96   :  { %2203 = vmatprep.mubr.bf16.mxu1 %v2575_v34  ;;  %3166 = vmatprep.subr.bf16.mxu0 %v3380_v33  ;;  %v124_v33 = vld [vmem:[%s4350_s0 + $0x368] sm:$0xff]  ;;  %v2636_v34 = vcombine.low %v99_v20, %v107_v21  ;;  %v2652_v42 = vcombine.low %v115_v30, %v123_v31 }
  0x97   :  { %3224 = vmatprep.subr.bf16.mxu1 %v3382_v36  ;;  %v2653_v36 = vcombine.high %v115_v30, %v123_v31 }
  0x98   :  { %3167 = vmatpush3.bf16.msra.mxu0 %v3381_v35  ;;  %v2638_v35 = vcombine.low %v100_v23, %v108_v24  ;;  %v125_v23 = vld [vmem:[%s4350_s0 + $0x370] sm:$0xff]  ;;  %v118_v24 = vld [vmem:[%s4350_s0 + $0x338] sm:$0xff] }
  0x99   :  { %3225 = vmatpush3.bf16.msra.mxu1 %v3383_v37  ;;  %3168 = vmatprep.subr.bf16.mxu0 %v3384_v38  ;;  %v2655_v37 = vcombine.high %v116_v32, %v124_v33  ;;  %v21_v38 = vld [vmem:[%s4350_s0 + $0x30] sm:$0xff] }
  0x9a   :  { %3226 = vmatprep.subr.bf16.mxu1 %v3386_v43  ;;  %v2654_v43 = vcombine.low %v116_v32, %v124_v33  ;;  %v4151_v32 = vld [vmem:[%s4351_s2] ss:$0 sm:$0xff] }
  0x9b   :  { %2115 = vmatmul.mubr.bf16.gmra.mrb[60].mxu0 %v2572_v44  ;;  %v2561_v44 = vcombine.high %v21_v38, %v29_v39 }
  0x9c   :  { %2204 = vmatmul.mubr.bf16.gmra.mrb[60].mxu1 %v2574_v45  ;;  %2122 = vmatprep.mubr.bf16.mxu0 %v2589_v46  ;;  %v2563_v45 = vcombine.high %v22_v40, %v30_v41  ;;  %v37_v46 = vld [vmem:[%s4350_s0 + $0xb0] sm:$0xff] }
  0x9d   :  { %2211 = vmatprep.mubr.bf16.mxu1 %v2591_v48  ;;  %3169 = vmatpush3.bf16.msra.mxu0 %v3385_v47  ;;  %v45_v47 = vld [vmem:[%s4350_s0 + $0xf0] sm:$0xff]  ;;  %v38_v48 = vld [vmem:[%s4350_s0 + $0xb8] sm:$0xff] }
  0x9e   :  { %3227 = vmatpush3.bf16.msra.mxu1 %v3387_v49  ;;  %3170 = vmatprep.subr.bf16.mxu0 %v3388_v50  ;;  %v46_v49 = vld [vmem:[%s4350_s0 + $0xf8] sm:$0xff]  ;;  %v2560_v50 = vcombine.low %v21_v38, %v29_v39 }
  0x9f   :  { %3228 = vmatprep.subr.bf16.mxu1 %v3390_v51  ;;  %v2562_v51 = vcombine.low %v22_v40, %v30_v41  ;;  %v2579_v53 = vcombine.high %v38_v48, %v46_v49 }
  0xa1   :  { %3171 = vmatpush3.bf16.msra.mxu0 %v3389_v52  ;;  %v2577_v52 = vcombine.high %v37_v46, %v45_v47 }
  0xa2   :  { %3229 = vmatpush3.bf16.msra.mxu1 %v3391_v57  ;;  %3172 = vmatprep.subr.bf16.mxu0 %v3392_v58  ;;  %v62_v57 = vld [vmem:[%s4350_s0 + $0x178] sm:$0xff]  ;;  %v2576_v58 = vcombine.low %v37_v46, %v45_v47 }
  0xa3   :  { %2123 = vmatmul.mubr.bf16.gmra.mrb[64].mxu0 %v2588_v59  ;;  %3230 = vmatprep.subr.bf16.mxu1 %v3394_v60  ;;  %v2578_v59 = vcombine.low %v38_v48, %v46_v49  ;;  %v2593_v60 = vcombine.high %v53_v54, %v61_v55 }
  0xa4   :  { %2212 = vmatmul.mubr.bf16.gmra.mrb[64].mxu1 %v2590_v61  ;;  %2130 = vmatprep.mubr.bf16.mxu0 %v2605_v62  ;;  %v2595_v61 = vcombine.high %v54_v56, %v62_v57  ;;  %v69_v62 = vld [vmem:[%s4350_s0 + $0x1b0] sm:$0xff] }
  0xa5   :  { %2219 = vmatprep.mubr.bf16.mxu1 %v2607_v63  ;;  %3173 = vmatpush3.bf16.msra.mxu0 %v3393_v0  ;;  %v77_v63 = vld [vmem:[%s4350_s0 + $0x1f0] sm:$0xff]  ;;  %v70_v0 = vld [vmem:[%s4350_s0 + $0x1b8] sm:$0xff] }
  0xa6   :  { %3231 = vmatpush3.bf16.msra.mxu1 %v3395_v1  ;;  %3174 = vmatprep.subr.bf16.mxu0 %v3396_v2  ;;  %v78_v1 = vld [vmem:[%s4350_s0 + $0x1f8] sm:$0xff]  ;;  %v2592_v2 = vcombine.low %v53_v54, %v61_v55  ;;  %v2609_v4 = vcombine.high %v69_v62, %v77_v63 }
  0xa7   :  { %3232 = vmatprep.subr.bf16.mxu1 %v3398_v3  ;;  %v2594_v3 = vcombine.low %v54_v56, %v62_v57  ;;  %v2611_v5 = vcombine.high %v70_v0, %v78_v1 }
  0xa9   :  { %3175 = vmatpush3.bf16.msra.mxu0 %v3397_v7  ;;  %v93_v7 = vld [vmem:[%s4350_s0 + $0x270] sm:$0xff] }
  0xaa   :  { %3233 = vmatpush3.bf16.msra.mxu1 %v3399_v9  ;;  %3176 = vmatprep.subr.bf16.mxu0 %v3400_v10  ;;  %v94_v9 = vld [vmem:[%s4350_s0 + $0x278] sm:$0xff]  ;;  %v2608_v10 = vcombine.low %v69_v62, %v77_v63 }
  0xab   :  { %2131 = vmatmul.mubr.bf16.gmra.mrb[68].mxu0 %v2604_v11  ;;  %3234 = vmatprep.subr.bf16.mxu1 %v3402_v12  ;;  %v2610_v11 = vcombine.low %v70_v0, %v78_v1  ;;  %v2625_v12 = vcombine.high %v85_v6, %v93_v7 }
  0xac   :  { %2220 = vmatmul.mubr.bf16.gmra.mrb[68].mxu1 %v2606_v13  ;;  %2138 = vmatprep.mubr.bf16.mxu0 %v2621_v14  ;;  %v2627_v13 = vcombine.high %v86_v8, %v94_v9  ;;  %v101_v14 = vld [vmem:[%s4350_s0 + $0x2b0] sm:$0xff] }
  0xad   :  { %2227 = vmatprep.mubr.bf16.mxu1 %v2623_v15  ;;  %3177 = vmatpush3.bf16.msra.mxu0 %v3401_v16  ;;  %v109_v15 = vld [vmem:[%s4350_s0 + $0x2f0] sm:$0xff]  ;;  %v102_v16 = vld [vmem:[%s4350_s0 + $0x2b8] sm:$0xff] }
  0xae   :  { %3235 = vmatpush3.bf16.msra.mxu1 %v3403_v17  ;;  %3178 = vmatprep.subr.bf16.mxu0 %v3404_v18  ;;  %v110_v17 = vld [vmem:[%s4350_s0 + $0x2f8] sm:$0xff]  ;;  %v2624_v18 = vcombine.low %v85_v6, %v93_v7  ;;  %v2641_v20 = vcombine.high %v101_v14, %v109_v15 }
  0xaf   :  { %3236 = vmatprep.subr.bf16.mxu1 %v3406_v19  ;;  %v2626_v19 = vcombine.low %v86_v8, %v94_v9  ;;  %v2643_v21 = vcombine.high %v102_v16, %v110_v17 }
  0xb1   :  { %3179 = vmatpush3.bf16.msra.mxu0 %v3405_v22  ;;  %v117_v22 = vld [vmem:[%s4350_s0 + $0x330] sm:$0xff] }
  0xb2   :  { %3237 = vmatpush3.bf16.msra.mxu1 %v3407_v25  ;;  %v126_v25 = vld [vmem:[%s4350_s0 + $0x378] sm:$0xff] }
  0xb3   :  { %2139 = vmatmul.mubr.bf16.gmra.mrb[72].mxu0 %v2620_v26  ;;  %v2640_v26 = vcombine.low %v101_v14, %v109_v15  ;;  %v2658_v38 = vcombine.low %v118_v24, %v126_v25 }
  0xb4   :  { %2228 = vmatmul.mubr.bf16.gmra.mrb[72].mxu1 %v2622_v27  ;;  %2146 = vmatprep.mubr.bf16.mxu0 %v2637_v28  ;;  %v2642_v27 = vcombine.low %v102_v16, %v110_v17  ;;  %v2657_v28 = vcombine.high %v117_v22, %v125_v23 }
  0xb5   :  { %2235 = vmatprep.mubr.bf16.mxu1 %v2639_v29  ;;  %v2659_v29 = vcombine.high %v118_v24, %v126_v25 }
  0xbb   :  { %2147 = vmatmul.mubr.bf16.gmra.mrb[76].mxu0 %v2636_v34  ;;  %v2656_v34 = vcombine.low %v117_v22, %v125_v23 }
  0xbc   :  { %2236 = vmatmul.mubr.bf16.gmra.mrb[76].mxu1 %v2638_v35  ;;  %2154 = vmatprep.mubr.bf16.mxu0 %v2653_v36 }
  0xbd   :  { %2243 = vmatprep.mubr.bf16.mxu1 %v2655_v37 }
  0xc3   :  { %2155 = vmatmul.mubr.bf16.gmra.mrb[80].mxu0 %v2652_v42 }
  0xc4   :  { %2244 = vmatmul.mubr.bf16.gmra.mrb[80].mxu1 %v2654_v43  ;;  %2284 = vmatprep.mubr.bf16.mxu0 %v2561_v44 }
  0xc5   :  { %2373 = vmatprep.mubr.bf16.mxu1 %v2563_v45 }
  0xcb   :  { %2285 = vmatmul.mubr.bf16.vlgmr.msra.gmra.mrb[84].mxu0 %v2560_v50 }
  0xcc   :  { %2374 = vmatmul.mubr.bf16.vlgmr.msra.gmra.mrb[84].mxu1 %v2562_v51  ;;  %2292 = vmatprep.mubr.bf16.mxu0 %v2577_v52 }
  0xcd   :  { %2381 = vmatprep.mubr.bf16.mxu1 %v2579_v53 }
  0xd3   :  { %2293 = vmatmul.mubr.bf16.gmra.mrb[88].mxu0 %v2576_v58 }
  0xd4   :  { %2382 = vmatmul.mubr.bf16.gmra.mrb[88].mxu1 %v2578_v59  ;;  %2300 = vmatprep.mubr.bf16.mxu0 %v2593_v60 }
  0xd5   :  { %2389 = vmatprep.mubr.bf16.mxu1 %v2595_v61 }
  0xdb   :  { %2301 = vmatmul.mubr.bf16.gmra.mrb[92].mxu0 %v2592_v2 }
  0xdc   :  { %2390 = vmatmul.mubr.bf16.gmra.mrb[92].mxu1 %v2594_v3  ;;  %2308 = vmatprep.mubr.bf16.mxu0 %v2609_v4 }
  0xdd   :  { %2397 = vmatprep.mubr.bf16.mxu1 %v2611_v5 }
  0xe3   :  { %2309 = vmatmul.mubr.bf16.gmra.mrb[96].mxu0 %v2608_v10 }
  0xe4   :  { %2398 = vmatmul.mubr.bf16.gmra.mrb[96].mxu1 %v2610_v11  ;;  %2316 = vmatprep.mubr.bf16.mxu0 %v2625_v12 }
  0xe5   :  { %2405 = vmatprep.mubr.bf16.mxu1 %v2627_v13 }
  0xeb   :  { %2317 = vmatmul.mubr.bf16.gmra.mrb[100].mxu0 %v2624_v18 }
  0xec   :  { %2406 = vmatmul.mubr.bf16.gmra.mrb[100].mxu1 %v2626_v19  ;;  %2324 = vmatprep.mubr.bf16.mxu0 %v2641_v20 }
  0xed   :  { %2413 = vmatprep.mubr.bf16.mxu1 %v2643_v21 }
  0xf3   :  { %2325 = vmatmul.mubr.bf16.gmra.mrb[104].mxu0 %v2640_v26 }
  0xf4   :  { %2414 = vmatmul.mubr.bf16.gmra.mrb[104].mxu1 %v2642_v27  ;;  %2332 = vmatprep.mubr.bf16.mxu0 %v2657_v28 }
  0xf5   :  { %2421 = vmatprep.mubr.bf16.mxu1 %v2659_v29 }
  0xf6   :  { %v2832_v30 = vpop.f32.mrb[0].mxu0 }
  0xf7   :  { %v2890_v31 = vpop.f32.mrb[0].mxu1  ;;  %v2833_v33 = vpop.f32.mrb[1].mxu0 }
  0xf8   :  { %v2834_v35 = vadd.f32 %v2833_v33, %v2832_v30  ;;  %v2891_v36 = vpop.f32.mrb[1].mxu1  ;;  %v2835_v37 = vpop.f32.mrb[2].mxu0 }
  0xf9   :  { %v2892_v39 = vadd.f32 %v2891_v36, %v2890_v31  ;;  %v2893_v40 = vpop.f32.mrb[2].mxu1  ;;  %v2836_v41 = vpop.f32.mrb[3].mxu0 }
  0xfa   :  { %v1753_v42 = vadd.f32 %v2834_v35, %v4151_v32  ;;  %v2837_v43 = vadd.f32 %v2836_v41, %v2835_v37  ;;  %v2894_v44 = vpop.f32.mrb[3].mxu1 }
  0xfb   :  { %v2895_v45 = vadd.f32 %v2894_v44, %v2893_v40  ;;  %2333 = vmatmul.mubr.bf16.gmra.mrb[108].mxu0 %v2656_v34 }
  0xfc   :  { %v4154_v46 = vadd.f32 %v2892_v39, %v1753_v42  ;;  %v1756_v47 = vadd.f32 %v2837_v43, %v4151_v32  ;;  %2422 = vmatmul.mubr.bf16.gmra.mrb[108].mxu1 %v2658_v38 }
  0xfe   :  { %v4157_v48 = vadd.f32 %v2895_v45, %v1756_v47  ;;  %v2838_v49 = vpop.f32.mrb[4].mxu0 }
  0xff   :  { %v2896_v50 = vpop.f32.mrb[4].mxu1  ;;  %v2839_v51 = vpop.f32.mrb[5].mxu0 }
 0x100   :  { %v2840_v52 = vadd.f32 %v2839_v51, %v2838_v49  ;;  %v2897_v53 = vpop.f32.mrb[5].mxu1  ;;  %v2841_v54 = vpop.f32.mrb[6].mxu0 }
 0x101   :  { %v2898_v55 = vadd.f32 %v2897_v53, %v2896_v50  ;;  %v2899_v56 = vpop.f32.mrb[6].mxu1  ;;  %v2842_v57 = vpop.f32.mrb[7].mxu0 }
 0x102   :  { %v1761_v58 = vadd.f32 %v2840_v52, %v4151_v32  ;;  %v2843_v59 = vadd.f32 %v2842_v57, %v2841_v54  ;;  %v2900_v60 = vpop.f32.mrb[7].mxu1 }
 0x103   :  { %v2901_v61 = vadd.f32 %v2900_v60, %v2899_v56 }
 0x104   :  { %v4160_v62 = vadd.f32 %v2898_v55, %v1761_v58  ;;  %v1764_v63 = vadd.f32 %v2843_v59, %v4151_v32 }
 0x106   :  { %v4163_v0 = vadd.f32 %v2901_v61, %v1764_v63  ;;  %v2844_v1 = vpop.f32.mrb[8].mxu0 }
 0x107   :  { %v2902_v2 = vpop.f32.mrb[8].mxu1  ;;  %v2845_v3 = vpop.f32.mrb[9].mxu0 }
 0x108   :  { %v2846_v4 = vadd.f32 %v2845_v3, %v2844_v1  ;;  %v2903_v5 = vpop.f32.mrb[9].mxu1  ;;  %v2847_v6 = vpop.f32.mrb[10].mxu0 }
 0x109   :  { %v2904_v7 = vadd.f32 %v2903_v5, %v2902_v2  ;;  %v2905_v8 = vpop.f32.mrb[10].mxu1  ;;  %v2848_v9 = vpop.f32.mrb[11].mxu0 }
 0x10a   :  { %v1769_v10 = vadd.f32 %v2846_v4, %v4151_v32  ;;  %v2849_v11 = vadd.f32 %v2848_v9, %v2847_v6  ;;  %v2906_v12 = vpop.f32.mrb[11].mxu1 }
 0x10b   :  { %v2907_v13 = vadd.f32 %v2906_v12, %v2905_v8 }
 0x10c   :  { %v4166_v14 = vadd.f32 %v2904_v7, %v1769_v10  ;;  %v1772_v15 = vadd.f32 %v2849_v11, %v4151_v32 }
 0x10e   :  { %v4169_v16 = vadd.f32 %v2907_v13, %v1772_v15  ;;  %v2850_v17 = vpop.f32.mrb[12].mxu0 }
 0x10f   :  { %v2908_v18 = vpop.f32.mrb[12].mxu1  ;;  %v2851_v19 = vpop.f32.mrb[13].mxu0 }
 0x110   :  { %v2852_v20 = vadd.f32 %v2851_v19, %v2850_v17  ;;  %v2909_v21 = vpop.f32.mrb[13].mxu1  ;;  %v2853_v22 = vpop.f32.mrb[14].mxu0 }
 0x111   :  { %v2910_v23 = vadd.f32 %v2909_v21, %v2908_v18  ;;  %v2911_v24 = vpop.f32.mrb[14].mxu1  ;;  %v2854_v25 = vpop.f32.mrb[15].mxu0 }
 0x112   :  { %v1777_v26 = vadd.f32 %v2852_v20, %v4151_v32  ;;  %v2855_v27 = vadd.f32 %v2854_v25, %v2853_v22  ;;  %v2912_v28 = vpop.f32.mrb[15].mxu1 }
 0x113   :  { %v2913_v29 = vadd.f32 %v2912_v28, %v2911_v24 }
 0x114   :  { %v4172_v30 = vadd.f32 %v2910_v23, %v1777_v26  ;;  %v1780_v31 = vadd.f32 %v2855_v27, %v4151_v32 }
 0x116   :  { %v4175_v33 = vadd.f32 %v2913_v29, %v1780_v31  ;;  %v2856_v34 = vpop.f32.mrb[16].mxu0 }
 0x117   :  { %v2914_v35 = vpop.f32.mrb[16].mxu1  ;;  %v2857_v36 = vpop.f32.mrb[17].mxu0 }
 0x118   :  { %v2858_v37 = vadd.f32 %v2857_v36, %v2856_v34  ;;  %v2915_v38 = vpop.f32.mrb[17].mxu1  ;;  %v2859_v39 = vpop.f32.mrb[18].mxu0 }
 0x119   :  { %v2916_v40 = vadd.f32 %v2915_v38, %v2914_v35  ;;  %v2917_v41 = vpop.f32.mrb[18].mxu1  ;;  %v2860_v42 = vpop.f32.mrb[19].mxu0 }
 0x11a   :  { %v1785_v43 = vadd.f32 %v2858_v37, %v4151_v32  ;;  %v2861_v44 = vadd.f32 %v2860_v42, %v2859_v39  ;;  %v2918_v45 = vpop.f32.mrb[19].mxu1 }
 0x11b   :  { %v2919_v47 = vadd.f32 %v2918_v45, %v2917_v41 }
 0x11c   :  { %v4178_v49 = vadd.f32 %v2916_v40, %v1785_v43  ;;  %v1788_v50 = vadd.f32 %v2861_v44, %v4151_v32 }
 0x11e   :  { %v4181_v51 = vadd.f32 %v2919_v47, %v1788_v50  ;;  %v2862_v52 = vpop.f32.mrb[20].mxu0 }
 0x11f   :  { %v2920_v53 = vpop.f32.mrb[20].mxu1  ;;  %v2863_v54 = vpop.f32.mrb[21].mxu0 }
 0x120   :  { %v2864_v55 = vadd.f32 %v2863_v54, %v2862_v52  ;;  %v2921_v56 = vpop.f32.mrb[21].mxu1  ;;  %v2865_v57 = vpop.f32.mrb[22].mxu0 }
 0x121   :  { %v2922_v58 = vadd.f32 %v2921_v56, %v2920_v53  ;;  %v2923_v59 = vpop.f32.mrb[22].mxu1  ;;  %v2866_v60 = vpop.f32.mrb[23].mxu0 }
 0x122   :  { %v1793_v61 = vadd.f32 %v2864_v55, %v4151_v32  ;;  %v2867_v63 = vadd.f32 %v2866_v60, %v2865_v57  ;;  %v2924_v1 = vpop.f32.mrb[23].mxu1 }
 0x123   :  { %v2925_v2 = vadd.f32 %v2924_v1, %v2923_v59 }
 0x124   :  { %v4184_v3 = vadd.f32 %v2922_v58, %v1793_v61  ;;  %v1796_v4 = vadd.f32 %v2867_v63, %v4151_v32 }
 0x126   :  { %v4187_v5 = vadd.f32 %v2925_v2, %v1796_v4  ;;  %v2868_v6 = vpop.f32.mrb[24].mxu0 }
 0x127   :  { %v2926_v7 = vpop.f32.mrb[24].mxu1  ;;  %v2869_v8 = vpop.f32.mrb[25].mxu0 }
 0x128   :  { %v2870_v9 = vadd.f32 %v2869_v8, %v2868_v6  ;;  %v2927_v10 = vpop.f32.mrb[25].mxu1  ;;  %v2871_v11 = vpop.f32.mrb[26].mxu0 }
 0x129   :  { %v2928_v12 = vadd.f32 %v2927_v10, %v2926_v7  ;;  %v2929_v13 = vpop.f32.mrb[26].mxu1  ;;  %v2872_v15 = vpop.f32.mrb[27].mxu0 }
 0x12a   :  { %v1801_v17 = vadd.f32 %v2870_v9, %v4151_v32  ;;  %v2873_v18 = vadd.f32 %v2872_v15, %v2871_v11  ;;  %v2930_v19 = vpop.f32.mrb[27].mxu1 }
 0x12b   :  { %v2931_v20 = vadd.f32 %v2930_v19, %v2929_v13 }
 0x12c   :  { %v4190_v21 = vadd.f32 %v2928_v12, %v1801_v17  ;;  %v1804_v22 = vadd.f32 %v2873_v18, %v4151_v32 }
 0x12e   :  { %v4193_v23 = vadd.f32 %v2931_v20, %v1804_v22  ;;  %v2948_v24 = vpop.f32.mrb[28].mxu0 }
 0x12f   :  { %v3006_v25 = vpop.f32.mrb[28].mxu1  ;;  %v2949_v26 = vpop.f32.mrb[29].mxu0 }
 0x130   :  { %v2950_v27 = vadd.f32 %v2949_v26, %v2948_v24  ;;  %v3007_v28 = vpop.f32.mrb[29].mxu1  ;;  %v2951_v29 = vpop.f32.mrb[30].mxu0 }
 0x131   :  { %v3008_v31 = vadd.f32 %v3007_v28, %v3006_v25  ;;  %v3009_v34 = vpop.f32.mrb[30].mxu1  ;;  %v2952_v35 = vpop.f32.mrb[31].mxu0 }
 0x132   :  { %v1931_v36 = vadd.f32 %v2950_v27, %v4154_v46  ;;  %v2953_v37 = vadd.f32 %v2952_v35, %v2951_v29  ;;  %v3010_v38 = vpop.f32.mrb[31].mxu1 }
 0x133   :  { %v3011_v39 = vadd.f32 %v3010_v38, %v3009_v34 }
 0x134   :  { %v4196_v40 = vadd.f32 %v3008_v31, %v1931_v36  ;;  %v1934_v32 = vadd.f32 %v2953_v37, %v4157_v48 }
 0x136   :  { %v4199_v41 = vadd.f32 %v3011_v39, %v1934_v32  ;;  %v2954_v42 = vpop.f32.mrb[32].mxu0 }
 0x137   :  { %v3012_v43 = vpop.f32.mrb[32].mxu1  ;;  %v2955_v44 = vpop.f32.mrb[33].mxu0 }
 0x138   :  { %v2956_v45 = vadd.f32 %v2955_v44, %v2954_v42  ;;  %v3013_v47 = vpop.f32.mrb[33].mxu1  ;;  %v2957_v50 = vpop.f32.mrb[34].mxu0 }
 0x139   :  { %v3014_v52 = vadd.f32 %v3013_v47, %v3012_v43  ;;  %v3015_v53 = vpop.f32.mrb[34].mxu1  ;;  %v2958_v54 = vpop.f32.mrb[35].mxu0 }
 0x13a   :  { %v1939_v46 = vadd.f32 %v2956_v45, %v4160_v62  ;;  %v2959_v55 = vadd.f32 %v2958_v54, %v2957_v50  ;;  %v3016_v56 = vpop.f32.mrb[35].mxu1 }
 0x13b   :  { %v3017_v57 = vadd.f32 %v3016_v56, %v3015_v53 }
 0x13c   :  { %v4202_v58 = vadd.f32 %v3014_v52, %v1939_v46  ;;  %v1942_v48 = vadd.f32 %v2959_v55, %v4163_v0 }
 0x13e   :  { %v4205_v59 = vadd.f32 %v3017_v57, %v1942_v48  ;;  %v2960_v60 = vpop.f32.mrb[36].mxu0 }
 0x13f   :  { %v3018_v61 = vpop.f32.mrb[36].mxu1  ;;  %v2961_v63 = vpop.f32.mrb[37].mxu0 }
 0x140   :  { %v2962_v1 = vadd.f32 %v2961_v63, %v2960_v60  ;;  %v3019_v2 = vpop.f32.mrb[37].mxu1  ;;  %v2963_v4 = vpop.f32.mrb[38].mxu0 }
 0x141   :  { %v3020_v6 = vadd.f32 %v3019_v2, %v3018_v61  ;;  %v3021_v7 = vpop.f32.mrb[38].mxu1  ;;  %v2964_v8 = vpop.f32.mrb[39].mxu0 }
 0x142   :  { %v1947_v62 = vadd.f32 %v2962_v1, %v4166_v14  ;;  %v2965_v9 = vadd.f32 %v2964_v8, %v2963_v4  ;;  %v3022_v10 = vpop.f32.mrb[39].mxu1 }
 0x143   :  { %v3023_v11 = vadd.f32 %v3022_v10, %v3021_v7 }
 0x144   :  { %v4208_v12 = vadd.f32 %v3020_v6, %v1947_v62  ;;  %v1950_v0 = vadd.f32 %v2965_v9, %v4169_v16 }
 0x146   :  { %v4211_v13 = vadd.f32 %v3023_v11, %v1950_v0  ;;  %v2966_v15 = vpop.f32.mrb[40].mxu0 }
 0x147   :  { %v3024_v17 = vpop.f32.mrb[40].mxu1  ;;  %v2967_v18 = vpop.f32.mrb[41].mxu0 }
 0x148   :  { %v2968_v19 = vadd.f32 %v2967_v18, %v2966_v15  ;;  %v3025_v20 = vpop.f32.mrb[41].mxu1  ;;  %v2969_v22 = vpop.f32.mrb[42].mxu0 }
 0x149   :  { %v3026_v24 = vadd.f32 %v3025_v20, %v3024_v17  ;;  %v3027_v25 = vpop.f32.mrb[42].mxu1  ;;  %v2970_v26 = vpop.f32.mrb[43].mxu0 }
 0x14a   :  { %v1955_v14 = vadd.f32 %v2968_v19, %v4172_v30  ;;  %v2971_v27 = vadd.f32 %v2970_v26, %v2969_v22  ;;  %v3028_v28 = vpop.f32.mrb[43].mxu1 }
 0x14b   :  { %v3029_v29 = vadd.f32 %v3028_v28, %v3027_v25 }
 0x14c   :  { %v4214_v31 = vadd.f32 %v3026_v24, %v1955_v14  ;;  %v1958_v16 = vadd.f32 %v2971_v27, %v4175_v33 }
 0x14e   :  { %v4217_v34 = vadd.f32 %v3029_v29, %v1958_v16  ;;  %v2972_v35 = vpop.f32.mrb[44].mxu0 }
 0x14f   :  { %v3030_v36 = vpop.f32.mrb[44].mxu1  ;;  %v2973_v37 = vpop.f32.mrb[45].mxu0 }
 0x150   :  { %v2974_v38 = vadd.f32 %v2973_v37, %v2972_v35  ;;  %v3031_v39 = vpop.f32.mrb[45].mxu1  ;;  %v2975_v32 = vpop.f32.mrb[46].mxu0 }
 0x151   :  { %v3032_v42 = vadd.f32 %v3031_v39, %v3030_v36  ;;  %v3033_v43 = vpop.f32.mrb[46].mxu1  ;;  %v2976_v44 = vpop.f32.mrb[47].mxu0 }
 0x152   :  { %v1963_v30 = vadd.f32 %v2974_v38, %v4178_v49  ;;  %v2977_v45 = vadd.f32 %v2976_v44, %v2975_v32  ;;  %v3034_v47 = vpop.f32.mrb[47].mxu1 }
 0x153   :  { %v3035_v50 = vadd.f32 %v3034_v47, %v3033_v43 }
 0x154   :  { %v4220_v52 = vadd.f32 %v3032_v42, %v1963_v30  ;;  %v1966_v33 = vadd.f32 %v2977_v45, %v4181_v51 }
 0x156   :  { %v4223_v53 = vadd.f32 %v3035_v50, %v1966_v33  ;;  %v2978_v54 = vpop.f32.mrb[48].mxu0 }
 0x157   :  { %v3036_v46 = vpop.f32.mrb[48].mxu1  ;;  %v2979_v55 = vpop.f32.mrb[49].mxu0 }
 0x158   :  { %v2980_v56 = vadd.f32 %v2979_v55, %v2978_v54  ;;  %v3037_v57 = vpop.f32.mrb[49].mxu1  ;;  %v2981_v48 = vpop.f32.mrb[50].mxu0 }
 0x159   :  { %v3038_v60 = vadd.f32 %v3037_v57, %v3036_v46  ;;  %v3039_v61 = vpop.f32.mrb[50].mxu1  ;;  %v2982_v63 = vpop.f32.mrb[51].mxu0 }
 0x15a   :  { %v1971_v49 = vadd.f32 %v2980_v56, %v4184_v3  ;;  %v2983_v1 = vadd.f32 %v2982_v63, %v2981_v48  ;;  %v3040_v2 = vpop.f32.mrb[51].mxu1 }
 0x15b   :  { %v3041_v4 = vadd.f32 %v3040_v2, %v3039_v61 }
 0x15c   :  { %v4226_v6 = vadd.f32 %v3038_v60, %v1971_v49  ;;  %v1974_v51 = vadd.f32 %v2983_v1, %v4187_v5 }
 0x15e   :  { %v4229_v7 = vadd.f32 %v3041_v4, %v1974_v51  ;;  %v2984_v8 = vpop.f32.mrb[52].mxu0 }
 0x15f   :  { %v3042_v62 = vpop.f32.mrb[52].mxu1  ;;  %v2985_v9 = vpop.f32.mrb[53].mxu0 }
 0x160   :  { %v2986_v10 = vadd.f32 %v2985_v9, %v2984_v8  ;;  %v3043_v11 = vpop.f32.mrb[53].mxu1  ;;  %v2987_v0 = vpop.f32.mrb[54].mxu0 }
 0x161   :  { %v3044_v15 = vadd.f32 %v3043_v11, %v3042_v62  ;;  %v3045_v17 = vpop.f32.mrb[54].mxu1  ;;  %v2988_v18 = vpop.f32.mrb[55].mxu0 }
 0x162   :  { %v1979_v3 = vadd.f32 %v2986_v10, %v4190_v21  ;;  %v2989_v19 = vadd.f32 %v2988_v18, %v2987_v0  ;;  %v3046_v20 = vpop.f32.mrb[55].mxu1 }
 0x163   :  { %v3047_v22 = vadd.f32 %v3046_v20, %v3045_v17 }
 0x164   :  { %v4232_v24 = vadd.f32 %v3044_v15, %v1979_v3  ;;  %v1982_v5 = vadd.f32 %v2989_v19, %v4193_v23 }
 0x166   :  { %v4235_v25 = vadd.f32 %v3047_v22, %v1982_v5  ;;  %v3064_v26 = vpop.f32.mrb[56].mxu0 }
 0x167   :  { %v3122_v14 = vpop.f32.mrb[56].mxu1  ;;  %v3065_v27 = vpop.f32.mrb[57].mxu0 }
 0x168   :  { %v3066_v28 = vadd.f32 %v3065_v27, %v3064_v26  ;;  %v3123_v29 = vpop.f32.mrb[57].mxu1  ;;  %v3067_v16 = vpop.f32.mrb[58].mxu0 }
 0x169   :  { %v3124_v35 = vadd.f32 %v3123_v29, %v3122_v14  ;;  %v3125_v36 = vpop.f32.mrb[58].mxu1  ;;  %v3068_v37 = vpop.f32.mrb[59].mxu0 }
 0x16a   :  { %v2109_v21 = vadd.f32 %v3066_v28, %v4196_v40  ;;  %v3069_v38 = vadd.f32 %v3068_v37, %v3067_v16  ;;  %v3126_v39 = vpop.f32.mrb[59].mxu1 }
 0x16b   :  { %v3127_v32 = vadd.f32 %v3126_v39, %v3125_v36 }
 0x16c   :  { %v4238_v42 = vadd.f32 %v3124_v35, %v2109_v21  ;;  %v2112_v23 = vadd.f32 %v3069_v38, %v4199_v41 }
 0x16e   :  { %v4241_v43 = vadd.f32 %v3127_v32, %v2112_v23  ;;  %v3070_v44 = vpop.f32.mrb[60].mxu0 }
 0x16f   :  { %v3128_v30 = vpop.f32.mrb[60].mxu1  ;;  %v3071_v45 = vpop.f32.mrb[61].mxu0 }
 0x170   :  { %v3072_v47 = vadd.f32 %v3071_v45, %v3070_v44  ;;  %v3129_v50 = vpop.f32.mrb[61].mxu1  ;;  %v3073_v33 = vpop.f32.mrb[62].mxu0 }
 0x171   :  { %v3130_v54 = vadd.f32 %v3129_v50, %v3128_v30  ;;  %v3131_v46 = vpop.f32.mrb[62].mxu1  ;;  %v3074_v55 = vpop.f32.mrb[63].mxu0 }
 0x172   :  { %v2117_v40 = vadd.f32 %v3072_v47, %v4202_v58  ;;  %v3075_v56 = vadd.f32 %v3074_v55, %v3073_v33  ;;  %v3132_v57 = vpop.f32.mrb[63].mxu1 }
 0x173   :  { %v3133_v48 = vadd.f32 %v3132_v57, %v3131_v46 }
 0x174   :  { %v4244_v60 = vadd.f32 %v3130_v54, %v2117_v40  ;;  %v2120_v41 = vadd.f32 %v3075_v56, %v4205_v59 }
 0x176   :  { %v4247_v61 = vadd.f32 %v3133_v48, %v2120_v41  ;;  %v3076_v63 = vpop.f32.mrb[64].mxu0 }
 0x177   :  { %v3134_v49 = vpop.f32.mrb[64].mxu1  ;;  %v3077_v1 = vpop.f32.mrb[65].mxu0 }
 0x178   :  { %v3078_v2 = vadd.f32 %v3077_v1, %v3076_v63  ;;  %v3135_v4 = vpop.f32.mrb[65].mxu1  ;;  %v3079_v51 = vpop.f32.mrb[66].mxu0 }
 0x179   :  { %v3136_v8 = vadd.f32 %v3135_v4, %v3134_v49  ;;  %v3137_v62 = vpop.f32.mrb[66].mxu1  ;;  %v3080_v9 = vpop.f32.mrb[67].mxu0 }
 0x17a   :  { %v2125_v58 = vadd.f32 %v3078_v2, %v4208_v12  ;;  %v3081_v10 = vadd.f32 %v3080_v9, %v3079_v51  ;;  %v3138_v11 = vpop.f32.mrb[67].mxu1 }
 0x17b   :  { %v3139_v0 = vadd.f32 %v3138_v11, %v3137_v62 }
 0x17c   :  { %v4250_v15 = vadd.f32 %v3136_v8, %v2125_v58  ;;  %v2128_v59 = vadd.f32 %v3081_v10, %v4211_v13 }
 0x17e   :  { %v4253_v17 = vadd.f32 %v3139_v0, %v2128_v59  ;;  %v3082_v18 = vpop.f32.mrb[68].mxu0 }
 0x17f   :  { %v3140_v3 = vpop.f32.mrb[68].mxu1  ;;  %v3083_v19 = vpop.f32.mrb[69].mxu0 }
 0x180   :  { %v3084_v20 = vadd.f32 %v3083_v19, %v3082_v18  ;;  %v3141_v22 = vpop.f32.mrb[69].mxu1  ;;  %v3085_v5 = vpop.f32.mrb[70].mxu0 }
 0x181   :  { %v3142_v26 = vadd.f32 %v3141_v22, %v3140_v3  ;;  %v3143_v14 = vpop.f32.mrb[70].mxu1  ;;  %v3086_v27 = vpop.f32.mrb[71].mxu0 }
 0x182   :  { %v2133_v12 = vadd.f32 %v3084_v20, %v4214_v31  ;;  %v3087_v28 = vadd.f32 %v3086_v27, %v3085_v5  ;;  %v3144_v29 = vpop.f32.mrb[71].mxu1 }
 0x183   :  { %v3145_v16 = vadd.f32 %v3144_v29, %v3143_v14 }
 0x184   :  { %v4256_v35 = vadd.f32 %v3142_v26, %v2133_v12  ;;  %v2136_v13 = vadd.f32 %v3087_v28, %v4217_v34 }
 0x186   :  { %v4259_v36 = vadd.f32 %v3145_v16, %v2136_v13  ;;  %v3088_v37 = vpop.f32.mrb[72].mxu0 }
 0x187   :  { %v3146_v21 = vpop.f32.mrb[72].mxu1  ;;  %v3089_v38 = vpop.f32.mrb[73].mxu0 }
 0x188   :  { %v3090_v39 = vadd.f32 %v3089_v38, %v3088_v37  ;;  %v3147_v32 = vpop.f32.mrb[73].mxu1  ;;  %v3091_v23 = vpop.f32.mrb[74].mxu0 }
 0x189   :  { %v3148_v44 = vadd.f32 %v3147_v32, %v3146_v21  ;;  %v3149_v30 = vpop.f32.mrb[74].mxu1  ;;  %v3092_v45 = vpop.f32.mrb[75].mxu0 }
 0x18a   :  { %v2141_v31 = vadd.f32 %v3090_v39, %v4220_v52  ;;  %v3093_v47 = vadd.f32 %v3092_v45, %v3091_v23  ;;  %v3150_v50 = vpop.f32.mrb[75].mxu1 }
 0x18b   :  { %v3151_v33 = vadd.f32 %v3150_v50, %v3149_v30 }
 0x18c   :  { %v4262_v54 = vadd.f32 %v3148_v44, %v2141_v31  ;;  %v2144_v34 = vadd.f32 %v3093_v47, %v4223_v53 }
 0x18e   :  { %v4265_v46 = vadd.f32 %v3151_v33, %v2144_v34  ;;  %v3094_v55 = vpop.f32.mrb[76].mxu0 }
 0x18f   :  { %v3152_v40 = vpop.f32.mrb[76].mxu1  ;;  %v3095_v56 = vpop.f32.mrb[77].mxu0 }
 0x190   :  { %v3096_v57 = vadd.f32 %v3095_v56, %v3094_v55  ;;  %v3153_v48 = vpop.f32.mrb[77].mxu1  ;;  %v3097_v41 = vpop.f32.mrb[78].mxu0 }
 0x191   :  { %v3154_v63 = vadd.f32 %v3153_v48, %v3152_v40  ;;  %v3155_v49 = vpop.f32.mrb[78].mxu1  ;;  %v3098_v1 = vpop.f32.mrb[79].mxu0 }
 0x192   :  { %v2149_v52 = vadd.f32 %v3096_v57, %v4226_v6  ;;  %v3099_v2 = vadd.f32 %v3098_v1, %v3097_v41  ;;  %v3156_v4 = vpop.f32.mrb[79].mxu1 }
 0x193   :  { %v3157_v51 = vadd.f32 %v3156_v4, %v3155_v49 }
 0x194   :  { %v4268_v8 = vadd.f32 %v3154_v63, %v2149_v52  ;;  %v2152_v53 = vadd.f32 %v3099_v2, %v4229_v7 }
 0x196   :  { %v4271_v62 = vadd.f32 %v3157_v51, %v2152_v53  ;;  %v3100_v9 = vpop.f32.mrb[80].mxu0 }
 0x197   :  { %v3158_v58 = vpop.f32.mrb[80].mxu1  ;;  %v3101_v10 = vpop.f32.mrb[81].mxu0 }
 0x198   :  { %v3102_v11 = vadd.f32 %v3101_v10, %v3100_v9  ;;  %v3159_v0 = vpop.f32.mrb[81].mxu1  ;;  %v3103_v59 = vpop.f32.mrb[82].mxu0 }
 0x199   :  { %v3160_v18 = vadd.f32 %v3159_v0, %v3158_v58  ;;  %v3161_v3 = vpop.f32.mrb[82].mxu1  ;;  %v3104_v19 = vpop.f32.mrb[83].mxu0 }
 0x19a   :  { %v2157_v6 = vadd.f32 %v3102_v11, %v4232_v24  ;;  %v3105_v20 = vadd.f32 %v3104_v19, %v3103_v59  ;;  %v3162_v22 = vpop.f32.mrb[83].mxu1 }
 0x19b   :  { %v3163_v5 = vadd.f32 %v3162_v22, %v3161_v3 }
 0x19c   :  { %v4274_v26 = vadd.f32 %v3160_v18, %v2157_v6  ;;  %v2160_v7 = vadd.f32 %v3105_v20, %v4235_v25 }
 0x19e   :  { %v4277_v14 = vadd.f32 %v3163_v5, %v2160_v7  ;;  %v3180_v27 = vpop.f32.mrb[84].mxu0 }
 0x19f   :  { %v3238_v12 = vpop.f32.mrb[84].mxu1  ;;  %v3181_v28 = vpop.f32.mrb[85].mxu0 }
 0x1a0   :  { %v3182_v29 = vadd.f32 %v3181_v28, %v3180_v27  ;;  %v3239_v16 = vpop.f32.mrb[85].mxu1  ;;  %v3183_v13 = vpop.f32.mrb[86].mxu0 }
 0x1a1   :  { %v3240_v37 = vadd.f32 %v3239_v16, %v3238_v12  ;;  %v3241_v21 = vpop.f32.mrb[86].mxu1  ;;  %v3184_v38 = vpop.f32.mrb[87].mxu0 }
 0x1a2   :  { %v2287_v24 = vadd.f32 %v3182_v29, %v4238_v42  ;;  %v3185_v39 = vadd.f32 %v3184_v38, %v3183_v13  ;;  %v3242_v32 = vpop.f32.mrb[87].mxu1 }
 0x1a3   :  { %v3243_v23 = vadd.f32 %v3242_v32, %v3241_v21 }
 0x1a4   :  { %v2376_v44 = vadd.f32 %v3240_v37, %v2287_v24  ;;  %v2290_v30 = vadd.f32 %v3185_v39, %v4241_v43 }
 0x1a6   :  { %vm2430_vm0 = vcmp.ge.f32.partialorder %v2376_v44, 0.0  ;;  %v2444_v25 = vmul.f32 0.2, %v2376_v44  ;;  %v2379_v45 = vadd.f32 %v3243_v23, %v2290_v30  ;;  %v3186_v31 = vpop.f32.mrb[88].mxu0 }
 0x1a7   :  { %v3244_v47 = vpop.f32.mrb[88].mxu1  ;;  %v3187_v50 = vpop.f32.mrb[89].mxu0 }
 0x1a8   :  { %v2458_v33 = vsel %vm2430_vm0, %v2376_v44, %v2444_v25  ;;  %vm2431_vm2 = vcmp.ge.f32.partialorder %v2379_v45, 0.0  ;;  %v2445_v34 = vmul.f32 0.2, %v2379_v45  ;;  %v3188_v55 = vadd.f32 %v3187_v50, %v3186_v31  ;;  %v3245_v40 = vpop.f32.mrb[89].mxu1  ;;  %v3189_v56 = vpop.f32.mrb[90].mxu0 }
 0x1a9   :  { %v2802_v42 = vpack.c.bf16 %v2458_v33, %v2458_v33  ;;  %v3246_v57 = vadd.f32 %v3245_v40, %v3244_v47  ;;  %v3247_v48 = vpop.f32.mrb[90].mxu1  ;;  %v3190_v41 = vpop.f32.mrb[91].mxu0 }
 0x1aa   :  { %v2459_v63 = vsel %vm2431_vm2, %v2379_v45, %v2445_v34  ;;  %v2295_v43 = vadd.f32 %v3188_v55, %v4244_v60  ;;  %v3191_v49 = vadd.f32 %v3190_v41, %v3189_v56  ;;  %v3248_v1 = vpop.f32.mrb[91].mxu1 }
 0x1ab   :  { %2529 = vst.msk [vmem:[%s4352_s3] sm:$0xf] %vm2528_vm1, %v2802_v42  ;;  %v2803_v52 = vpack.c.bf16 %v2459_v63, %v2459_v63  ;;  %v3249_v2 = vadd.f32 %v3248_v1, %v3247_v48 }
 0x1ac   :  { %v2384_v4 = vadd.f32 %v3246_v57, %v2295_v43  ;;  %v2298_v51 = vadd.f32 %v3191_v49, %v4247_v61 }
 0x1ad   :  { %2530 = vst.msk [vmem:[%s4352_s3 + $0x4] sm:$0xf] %vm2528_vm1, %v2803_v52 }
 0x1ae   :  { %vm2432_vm3 = vcmp.ge.f32.partialorder %v2384_v4, 0.0  ;;  %v2446_v53 = vmul.f32 0.2, %v2384_v4  ;;  %v2387_v60 = vadd.f32 %v3249_v2, %v2298_v51  ;;  %v3192_v9 = vpop.f32.mrb[92].mxu0 }
 0x1af   :  { %v3250_v58 = vpop.f32.mrb[92].mxu1  ;;  %v3193_v10 = vpop.f32.mrb[93].mxu0 }
 0x1b0   :  { %v2460_v11 = vsel %vm2432_vm3, %v2384_v4, %v2446_v53  ;;  %vm2433_vm4 = vcmp.ge.f32.partialorder %v2387_v60, 0.0  ;;  %v2447_v0 = vmul.f32 0.2, %v2387_v60  ;;  %v3194_v59 = vadd.f32 %v3193_v10, %v3192_v9  ;;  %v3251_v18 = vpop.f32.mrb[93].mxu1  ;;  %v3195_v3 = vpop.f32.mrb[94].mxu0 }
 0x1b1   :  { %v2804_v19 = vpack.c.bf16 %v2460_v11, %v2460_v11  ;;  %v3252_v6 = vadd.f32 %v3251_v18, %v3250_v58  ;;  %v3253_v61 = vpop.f32.mrb[94].mxu1  ;;  %v3196_v20 = vpop.f32.mrb[95].mxu0 }
 0x1b2   :  { %v2461_v22 = vsel %vm2433_vm4, %v2387_v60, %v2447_v0  ;;  %v2303_v5 = vadd.f32 %v3194_v59, %v4250_v15  ;;  %v3197_v7 = vadd.f32 %v3196_v20, %v3195_v3  ;;  %v3254_v27 = vpop.f32.mrb[95].mxu1 }
 0x1b3   :  { %2531 = vst.msk [vmem:[%s4352_s3 + $0x8] sm:$0xf] %vm2528_vm1, %v2804_v19  ;;  %v2805_v12 = vpack.c.bf16 %v2461_v22, %v2461_v22  ;;  %v3255_v28 = vadd.f32 %v3254_v27, %v3253_v61 }
 0x1b4   :  { %v2392_v29 = vadd.f32 %v3252_v6, %v2303_v5  ;;  %v2306_v16 = vadd.f32 %v3197_v7, %v4253_v17 }
 0x1b5   :  { %2532 = vst.msk [vmem:[%s4352_s3 + $0xc] sm:$0xf] %vm2528_vm1, %v2805_v12 }
 0x1b6   :  { %vm2434_vm5 = vcmp.ge.f32.partialorder %v2392_v29, 0.0  ;;  %v2448_v13 = vmul.f32 0.2, %v2392_v29  ;;  %v2395_v15 = vadd.f32 %v3255_v28, %v2306_v16  ;;  %v3198_v37 = vpop.f32.mrb[96].mxu0 }
 0x1b7   :  { %v3256_v21 = vpop.f32.mrb[96].mxu1  ;;  %v3199_v38 = vpop.f32.mrb[97].mxu0 }
 0x1b8   :  { %v2462_v24 = vsel %vm2434_vm5, %v2392_v29, %v2448_v13  ;;  %vm2435_vm6 = vcmp.ge.f32.partialorder %v2395_v15, 0.0  ;;  %v2449_v39 = vmul.f32 0.2, %v2395_v15  ;;  %v3200_v32 = vadd.f32 %v3199_v38, %v3198_v37  ;;  %v3257_v23 = vpop.f32.mrb[97].mxu1  ;;  %v3201_v44 = vpop.f32.mrb[98].mxu0 }
 0x1b9   :  { %v2806_v30 = vpack.c.bf16 %v2462_v24, %v2462_v24  ;;  %v3258_v25 = vadd.f32 %v3257_v23, %v3256_v21  ;;  %v3259_v17 = vpop.f32.mrb[98].mxu1  ;;  %v3202_v45 = vpop.f32.mrb[99].mxu0 }
 0x1ba   :  { %v2463_v31 = vsel %vm2435_vm6, %v2395_v15, %v2449_v39  ;;  %v2311_v47 = vadd.f32 %v3200_v32, %v4256_v35  ;;  %v3203_v50 = vadd.f32 %v3202_v45, %v3201_v44  ;;  %v3260_v33 = vpop.f32.mrb[99].mxu1 }
 0x1bb   :  { %2533 = vst.msk [vmem:[%s4352_s3 + $0x10] sm:$0xf] %vm2528_vm1, %v2806_v30  ;;  %v2807_v34 = vpack.c.bf16 %v2463_v31, %v2463_v31  ;;  %v3261_v55 = vadd.f32 %v3260_v33, %v3259_v17 }
 0x1bc   :  { %v2400_v40 = vadd.f32 %v3258_v25, %v2311_v47  ;;  %v2314_v56 = vadd.f32 %v3203_v50, %v4259_v36 }
 0x1bd   :  { %2534 = vst.msk [vmem:[%s4352_s3 + $0x14] sm:$0xf] %vm2528_vm1, %v2807_v34 }
 0x1be   :  { %vm2436_vm7 = vcmp.ge.f32.partialorder %v2400_v40, 0.0  ;;  %v2450_v42 = vmul.f32 0.2, %v2400_v40  ;;  %v2403_v35 = vadd.f32 %v3261_v55, %v2314_v56  ;;  %v3204_v57 = vpop.f32.mrb[100].mxu0 }
 0x1bf   :  { %v3262_v48 = vpop.f32.mrb[100].mxu1  ;;  %v3205_v41 = vpop.f32.mrb[101].mxu0 }
 0x1c0   :  { %v2464_v63 = vsel %vm2436_vm7, %v2400_v40, %v2450_v42  ;;  %vm2437_vm8 = vcmp.ge.f32.partialorder %v2403_v35, 0.0  ;;  %v2451_v43 = vmul.f32 0.2, %v2403_v35  ;;  %v3206_v49 = vadd.f32 %v3205_v41, %v3204_v57  ;;  %v3263_v1 = vpop.f32.mrb[101].mxu1  ;;  %v3207_v52 = vpop.f32.mrb[102].mxu0 }
 0x1c1   :  { %v2808_v2 = vpack.c.bf16 %v2464_v63, %v2464_v63  ;;  %v3264_v4 = vadd.f32 %v3263_v1, %v3262_v48  ;;  %v3265_v36 = vpop.f32.mrb[102].mxu1  ;;  %v3208_v51 = vpop.f32.mrb[103].mxu0 }
 0x1c2   :  { %v2465_v53 = vsel %vm2437_vm8, %v2403_v35, %v2451_v43  ;;  %v2319_v60 = vadd.f32 %v3206_v49, %v4262_v54  ;;  %v3209_v9 = vadd.f32 %v3208_v51, %v3207_v52  ;;  %v3266_v58 = vpop.f32.mrb[103].mxu1 }
 0x1c3   :  { %2535 = vst.msk [vmem:[%s4352_s3 + $0x18] sm:$0xf] %vm2528_vm1, %v2808_v2  ;;  %v2809_v10 = vpack.c.bf16 %v2465_v53, %v2465_v53  ;;  %v3267_v11 = vadd.f32 %v3266_v58, %v3265_v36 }
 0x1c4   :  { %v2408_v0 = vadd.f32 %v3264_v4, %v2319_v60  ;;  %v2322_v59 = vadd.f32 %v3209_v9, %v4265_v46 }
 0x1c5   :  { %2536 = vst.msk [vmem:[%s4352_s3 + $0x1c] sm:$0xf] %vm2528_vm1, %v2809_v10 }
 0x1c6   :  { %vm2438_vm9 = vcmp.ge.f32.partialorder %v2408_v0, 0.0  ;;  %v2452_v18 = vmul.f32 0.2, %v2408_v0  ;;  %v2411_v54 = vadd.f32 %v3267_v11, %v2322_v59  ;;  %v3210_v3 = vpop.f32.mrb[104].mxu0 }
 0x1c7   :  { %v3268_v19 = vpop.f32.mrb[104].mxu1  ;;  %v3211_v6 = vpop.f32.mrb[105].mxu0 }
 0x1c8   :  { %v2466_v61 = vsel %vm2438_vm9, %v2408_v0, %v2452_v18  ;;  %vm2439_vm10 = vcmp.ge.f32.partialorder %v2411_v54, 0.0  ;;  %v2453_v20 = vmul.f32 0.2, %v2411_v54  ;;  %v3212_v22 = vadd.f32 %v3211_v6, %v3210_v3  ;;  %v3269_v5 = vpop.f32.mrb[105].mxu1  ;;  %v3213_v7 = vpop.f32.mrb[106].mxu0 }
 0x1c9   :  { %v2810_v27 = vpack.c.bf16 %v2466_v61, %v2466_v61  ;;  %v3270_v12 = vadd.f32 %v3269_v5, %v3268_v19  ;;  %v3271_v46 = vpop.f32.mrb[106].mxu1  ;;  %v3214_v28 = vpop.f32.mrb[107].mxu0 }
 0x1ca   :  { %v2467_v29 = vsel %vm2439_vm10, %v2411_v54, %v2453_v20  ;;  %v2327_v16 = vadd.f32 %v3212_v22, %v4268_v8  ;;  %v3215_v13 = vadd.f32 %v3214_v28, %v3213_v7  ;;  %v3272_v15 = vpop.f32.mrb[107].mxu1 }
 0x1cb   :  { %2537 = vst.msk [vmem:[%s4352_s3 + $0x20] sm:$0xf] %vm2528_vm1, %v2810_v27  ;;  %v2811_v37 = vpack.c.bf16 %v2467_v29, %v2467_v29  ;;  %v3273_v21 = vadd.f32 %v3272_v15, %v3271_v46 }
 0x1cc   :  { %v2416_v38 = vadd.f32 %v3270_v12, %v2327_v16  ;;  %v2330_v24 = vadd.f32 %v3215_v13, %v4271_v62 }
 0x1cd   :  { %2538 = vst.msk [vmem:[%s4352_s3 + $0x24] sm:$0xf] %vm2528_vm1, %v2811_v37 }
 0x1ce   :  { %vm2440_vm11 = vcmp.ge.f32.partialorder %v2416_v38, 0.0  ;;  %v2454_v39 = vmul.f32 0.2, %v2416_v38  ;;  %v2419_v8 = vadd.f32 %v3273_v21, %v2330_v24  ;;  %v3216_v32 = vpop.f32.mrb[108].mxu0 }
 0x1cf   :  { %v3274_v23 = vpop.f32.mrb[108].mxu1  ;;  %v3217_v44 = vpop.f32.mrb[109].mxu0 }
 0x1d0   :  { %v2468_v30 = vsel %vm2440_vm11, %v2416_v38, %v2454_v39  ;;  %vm2441_vm12 = vcmp.ge.f32.partialorder %v2419_v8, 0.0  ;;  %v2455_v25 = vmul.f32 0.2, %v2419_v8  ;;  %v3218_v17 = vadd.f32 %v3217_v44, %v3216_v32  ;;  %v3275_v45 = vpop.f32.mrb[109].mxu1  ;;  %v3219_v31 = vpop.f32.mrb[110].mxu0 }
 0x1d1   :  { %v2812_v47 = vpack.c.bf16 %v2468_v30, %v2468_v30  ;;  %v3276_v50 = vadd.f32 %v3275_v45, %v3274_v23  ;;  %v3277_v62 = vpop.f32.mrb[110].mxu1  ;;  %v3220_v33 = vpop.f32.mrb[111].mxu0 }
 0x1d2   :  { %v2469_v34 = vsel %vm2441_vm12, %v2419_v8, %v2455_v25  ;;  %v2335_v55 = vadd.f32 %v3218_v17, %v4274_v26  ;;  %v3221_v40 = vadd.f32 %v3220_v33, %v3219_v31  ;;  %v3278_v56 = vpop.f32.mrb[111].mxu1 }
 0x1d3   :  { %2539 = vst.msk [vmem:[%s4352_s3 + $0x28] sm:$0xf] %vm2528_vm1, %v2812_v47  ;;  %v2813_v42 = vpack.c.bf16 %v2469_v34, %v2469_v34  ;;  %v3279_v35 = vadd.f32 %v3278_v56, %v3277_v62 }
 0x1d4   :  { %v2424_v57 = vadd.f32 %v3276_v50, %v2335_v55  ;;  %v2338_v48 = vadd.f32 %v3221_v40, %v4277_v14 }
 0x1d5   :  { %2540 = vst.msk [vmem:[%s4352_s3 + $0x2c] sm:$0xf] %vm2528_vm1, %v2813_v42 }
 0x1d6   :  { %vm2442_vm13 = vcmp.ge.f32.partialorder %v2424_v57, 0.0  ;;  %v2456_v41 = vmul.f32 0.2, %v2424_v57  ;;  %v2427_v26 = vadd.f32 %v3279_v35, %v2338_v48 }
 0x1d8   :  { %v2470_v63 = vsel %vm2442_vm13, %v2424_v57, %v2456_v41  ;;  %vm2443_vm14 = vcmp.ge.f32.partialorder %v2427_v26, 0.0  ;;  %v2457_v43 = vmul.f32 0.2, %v2427_v26 }
 0x1d9   :  { %v2814_v49 = vpack.c.bf16 %v2470_v63, %v2470_v63 }
 0x1da   :  { %v2471_v1 = vsel %vm2443_vm14, %v2427_v26, %v2457_v43 }
 0x1db   :  { %2541 = vst.msk [vmem:[%s4352_s3 + $0x30] sm:$0xf] %vm2528_vm1, %v2814_v49  ;;  %v2815_v52 = vpack.c.bf16 %v2471_v1, %v2471_v1 }
 0x1dd   :  { %2542 = vst.msk [vmem:[%s4352_s3 + $0x34] sm:$0xf] %vm2528_vm1, %v2815_v52 }

// kernel: dann_forward.5
= control target key start
LH: loop header
LB: loop body
LE: loop exit
PB: predicated region body
PF: predicated region fallthrough
CT: control target
= control target key end

     0   :  { %vm4115_vm0 = vcmask 523264   ;;  %vm7690_vm1 = vmmov 0   ;;  %vm5460_vm8 = vcmask 261120   ;;  %s9895_s1 = inlined_call_operand.vmem [shape: bf16[3136,288], index: 1, kind: input, shape index: {}]   ;;  %s9896_s0 = inlined_call_operand.vmem [shape: bf16[16,3136], index: 0, kind: input, shape index: {}]   ;;  %s9897_s2 = inlined_call_operand.vmem [shape: f32[1,288], index: 2, kind: input, shape index: {}]   ;;  %s9898_s3 = inlined_call_operand.vmem [shape: bf16[288,256], index: 3, kind: input, shape index: {}]   ;;  %s9899_s5 = inlined_call_operand.vmem [shape: bf16[256,128], index: 5, kind: input, shape index: {}]   ;;  %s9900_s4 = inlined_call_operand.vmem [shape: f32[1,256], index: 4, kind: input, shape index: {}]   ;;  %s9901_s6 = inlined_call_operand.vmem [shape: f32[1,128], index: 6, kind: input, shape index: {}]   ;;  %s9902_s7 = inlined_call_operand.vmem [shape: f32[16,128], index: 7, kind: output, shape index: {}]  }
   0x1   :  { %v6786_v0 = vld [vmem:[%s9895_s1 + $0x4] ss:$12 sps:$4 sm:$0xff]   ;;  %v6790_v2 = vld [vmem:[%s9895_s1] ss:$12 sps:$4 sm:$0xff]   ;;  %v6792_v4 = vld [vmem:[%s9895_s1 + $0x1c] ss:$12 sps:$4 sm:$0xff]  }
   0x2   :  { %v6788_v1 = vld [vmem:[%s9895_s1 + $0x304] ss:$12 sps:$4 sm:$0xff]   ;;  %4119 = vmatprep.subr.bf16.mxu1 %v6786_v0  ;;  %v6791_v3 = vld [vmem:[%s9895_s1 + $0x300] ss:$12 sps:$4 sm:$0xff]   ;;  %v6794_v5 = vld [vmem:[%s9895_s1 + $0x31c] ss:$12 sps:$4 sm:$0xff]  }
   0x3   :  { %4205 = vmatprep.subr.bf16.mxu0 %v6788_v1  ;;  %4120 = vmatpush1.bf16.msra.mxu1 %v6790_v2  ;;  %v6796_v6 = vld [vmem:[%s9895_s1 + $0x18] ss:$12 sps:$4 sm:$0xff]   ;;  %v6798_v8 = vld [vmem:[%s9895_s1 + $0x34] ss:$12 sps:$4 sm:$0xff]   ;;  %v6802_v10 = vld [vmem:[%s9895_s1 + $0x30] ss:$12 sps:$4 sm:$0xff]  }
   0x4   :  { %4206 = vmatpush1.bf16.msra.mxu0 %v6791_v3  ;;  %4121 = vmatprep.subr.bf16.mxu1 %v6792_v4  ;;  %v6797_v7 = vld [vmem:[%s9895_s1 + $0x318] ss:$12 sps:$4 sm:$0xff]   ;;  %v6800_v9 = vld [vmem:[%s9895_s1 + $0x334] ss:$12 sps:$4 sm:$0xff]   ;;  %v6803_v11 = vld [vmem:[%s9895_s1 + $0x330] ss:$12 sps:$4 sm:$0xff]  }
   0x5   :  { %4207 = vmatprep.subr.bf16.mxu0 %v6794_v5  ;;  %v6804_v12 = vld [vmem:[%s9895_s1 + $0x4c] ss:$12 sps:$4 sm:$0xff]   ;;  %v6808_v14 = vld [vmem:[%s9895_s1 + $0x48] ss:$12 sps:$4 sm:$0xff]   ;;  %v6810_v16 = vld [vmem:[%s9895_s1 + $0x64] ss:$12 sps:$4 sm:$0xff]  }
   0x6   :  { %v6806_v13 = vld [vmem:[%s9895_s1 + $0x34c] ss:$12 sps:$4 sm:$0xff]   ;;  %v6809_v15 = vld [vmem:[%s9895_s1 + $0x348] ss:$12 sps:$4 sm:$0xff]   ;;  %v6812_v17 = vld [vmem:[%s9895_s1 + $0x364] ss:$12 sps:$4 sm:$0xff]  }
   0x7   :  { %4122 = vmatpush1.bf16.msra.mxu1 %v6796_v6  ;;  %v6814_v18 = vld [vmem:[%s9895_s1 + $0x60] ss:$12 sps:$4 sm:$0xff]   ;;  %v6816_v20 = vld [vmem:[%s9895_s1 + $0x7c] ss:$12 sps:$4 sm:$0xff]   ;;  %v6820_v22 = vld [vmem:[%s9895_s1 + $0x78] ss:$12 sps:$4 sm:$0xff]  }
   0x8   :  { %4208 = vmatpush1.bf16.msra.mxu0 %v6797_v7  ;;  %4123 = vmatprep.subr.bf16.mxu1 %v6798_v8  ;;  %v6815_v19 = vld [vmem:[%s9895_s1 + $0x360] ss:$12 sps:$4 sm:$0xff]   ;;  %v6818_v21 = vld [vmem:[%s9895_s1 + $0x37c] ss:$12 sps:$4 sm:$0xff]   ;;  %v6821_v23 = vld [vmem:[%s9895_s1 + $0x378] ss:$12 sps:$4 sm:$0xff]  }
   0x9   :  { %4209 = vmatprep.subr.bf16.mxu0 %v6800_v9  ;;  %v6822_v24 = vld [vmem:[%s9895_s1 + $0x94] ss:$12 sps:$4 sm:$0xff]   ;;  %v6826_v26 = vld [vmem:[%s9895_s1 + $0x90] ss:$12 sps:$4 sm:$0xff]   ;;  %v6828_v28 = vld [vmem:[%s9895_s1 + $0xac] ss:$12 sps:$4 sm:$0xff]  }
   0xa   :  { %v6824_v25 = vld [vmem:[%s9895_s1 + $0x394] ss:$12 sps:$4 sm:$0xff]   ;;  %v6827_v27 = vld [vmem:[%s9895_s1 + $0x390] ss:$12 sps:$4 sm:$0xff]   ;;  %v6830_v29 = vld [vmem:[%s9895_s1 + $0x3ac] ss:$12 sps:$4 sm:$0xff]  }
   0xb   :  { %4124 = vmatpush1.bf16.msra.mxu1 %v6802_v10  ;;  %v6832_v30 = vld [vmem:[%s9895_s1 + $0xa8] ss:$12 sps:$4 sm:$0xff]   ;;  %v6834_v32 = vld [vmem:[%s9895_s1 + $0xc4] ss:$12 sps:$4 sm:$0xff]   ;;  %v6838_v34 = vld [vmem:[%s9895_s1 + $0xc0] ss:$12 sps:$4 sm:$0xff]  }
   0xc   :  { %4210 = vmatpush1.bf16.msra.mxu0 %v6803_v11  ;;  %4125 = vmatprep.subr.bf16.mxu1 %v6804_v12  ;;  %v6833_v31 = vld [vmem:[%s9895_s1 + $0x3a8] ss:$12 sps:$4 sm:$0xff]   ;;  %v6836_v33 = vld [vmem:[%s9895_s1 + $0x3c4] ss:$12 sps:$4 sm:$0xff]   ;;  %v6839_v35 = vld [vmem:[%s9895_s1 + $0x3c0] ss:$12 sps:$4 sm:$0xff]  }
   0xd   :  { %4211 = vmatprep.subr.bf16.mxu0 %v6806_v13  ;;  %v6840_v36 = vld [vmem:[%s9895_s1 + $0xdc] ss:$12 sps:$4 sm:$0xff]   ;;  %v6844_v38 = vld [vmem:[%s9895_s1 + $0xd8] ss:$12 sps:$4 sm:$0xff]   ;;  %v6846_v40 = vld [vmem:[%s9895_s1 + $0xf4] ss:$12 sps:$4 sm:$0xff]  }
   0xe   :  { %v6842_v37 = vld [vmem:[%s9895_s1 + $0x3dc] ss:$12 sps:$4 sm:$0xff]   ;;  %v6845_v39 = vld [vmem:[%s9895_s1 + $0x3d8] ss:$12 sps:$4 sm:$0xff]   ;;  %v6848_v41 = vld [vmem:[%s9895_s1 + $0x3f4] ss:$12 sps:$4 sm:$0xff]  }
   0xf   :  { %4126 = vmatpush1.bf16.msra.mxu1 %v6808_v14  ;;  %v6850_v42 = vld [vmem:[%s9895_s1 + $0xf0] ss:$12 sps:$4 sm:$0xff]   ;;  %v6852_v44 = vld [vmem:[%s9895_s1 + $0x10c] ss:$12 sps:$4 sm:$0xff]   ;;  %v6856_v46 = vld [vmem:[%s9895_s1 + $0x108] ss:$12 sps:$4 sm:$0xff]  }
  0x10   :  { %4212 = vmatpush1.bf16.msra.mxu0 %v6809_v15  ;;  %4127 = vmatprep.subr.bf16.mxu1 %v6810_v16  ;;  %v6851_v43 = vld [vmem:[%s9895_s1 + $0x3f0] ss:$12 sps:$4 sm:$0xff]   ;;  %v6854_v45 = vld [vmem:[%s9895_s1 + $0x40c] ss:$12 sps:$4 sm:$0xff]   ;;  %v6857_v47 = vld [vmem:[%s9895_s1 + $0x408] ss:$12 sps:$4 sm:$0xff]  }
  0x11   :  { %4213 = vmatprep.subr.bf16.mxu0 %v6812_v17  ;;  %v7878_v48 = vld [vmem:[%s9896_s0 + $0x4] ss:$100 sps:$4 sm:$0xff]   ;;  %v6890_v51 = vld [vmem:[%s9896_s0 + $0x14] ss:$100 sps:$4 sm:$0xff]   ;;  %v6862_v52 = vld [vmem:[%s9895_s1 + $0x120] ss:$12 sps:$4 sm:$0xff]  }
  0x12   :  { %v6858_v49 = vld [vmem:[%s9895_s1 + $0x124] ss:$12 sps:$4 sm:$0xff]   ;;  %4151 = vmatprep.mubr.bf16.mxu1 %v7878_v48  ;;  %v6863_v53 = vld [vmem:[%s9895_s1 + $0x420] ss:$12 sps:$4 sm:$0xff]   ;;  %v6864_v54 = vld [vmem:[%s9895_s1 + $0x13c] ss:$12 sps:$4 sm:$0xff]   ;;  %4237 = vmatprep.mubr.bf16.mxu0 %v6890_v51 }
  0x13   :  { %4128 = vmatpush1.bf16.msra.mxu1 %v6814_v18  ;;  %v6860_v50 = vld [vmem:[%s9895_s1 + $0x424] ss:$12 sps:$4 sm:$0xff]   ;;  %v6866_v55 = vld [vmem:[%s9895_s1 + $0x43c] ss:$12 sps:$4 sm:$0xff]   ;;  %v6870_v58 = vld [vmem:[%s9895_s1 + $0x154] ss:$12 sps:$4 sm:$0xff]  }
  0x14   :  { %4214 = vmatpush1.bf16.msra.mxu0 %v6815_v19  ;;  %4129 = vmatprep.subr.bf16.mxu1 %v6816_v20  ;;  %v6868_v56 = vld [vmem:[%s9895_s1 + $0x138] ss:$12 sps:$4 sm:$0xff]   ;;  %v6872_v59 = vld [vmem:[%s9895_s1 + $0x454] ss:$12 sps:$4 sm:$0xff]   ;;  %v6874_v60 = vld [vmem:[%s9895_s1 + $0x150] ss:$12 sps:$4 sm:$0xff]  }
  0x15   :  { %4215 = vmatprep.subr.bf16.mxu0 %v6818_v21  ;;  %v6869_v57 = vld [vmem:[%s9895_s1 + $0x438] ss:$12 sps:$4 sm:$0xff]   ;;  %v6875_v61 = vld [vmem:[%s9895_s1 + $0x450] ss:$12 sps:$4 sm:$0xff]   ;;  %v6880_v0 = vld [vmem:[%s9895_s1 + $0x168] ss:$12 sps:$4 sm:$0xff]  }
  0x16   :  { %v6876_v62 = vld [vmem:[%s9895_s1 + $0x16c] ss:$12 sps:$4 sm:$0xff]   ;;  %v6881_v1 = vld [vmem:[%s9895_s1 + $0x468] ss:$12 sps:$4 sm:$0xff]   ;;  %v6887_v2 = vld [vmem:[%s9895_s1 + $0x184] ss:$12 sps:$4 sm:$0xff]  }
  0x17   :  { %4130 = vmatpush1.bf16.msra.mxu1 %v6820_v22  ;;  %v6878_v63 = vld [vmem:[%s9895_s1 + $0x46c] ss:$12 sps:$4 sm:$0xff]   ;;  %v6893_v3 = vld [vmem:[%s9895_s1 + $0x484] ss:$12 sps:$4 sm:$0xff]   ;;  %v6896_v8 = vld [vmem:[%s9895_s1 + $0x19c] ss:$12 sps:$4 sm:$0xff]  }
  0x18   :  { %4216 = vmatpush1.bf16.msra.mxu0 %v6821_v23  ;;  %4131 = vmatprep.subr.bf16.mxu1 %v6822_v24  ;;  %v7941_v4 = vld [vmem:[%s9896_s0] ss:$100 sps:$4 sm:$0xff]   ;;  %v6888_v6 = vld [vmem:[%s9896_s0 + $0x10] ss:$100 sps:$4 sm:$0xff]   ;;  %v6899_v9 = vld [vmem:[%s9895_s1 + $0x49c] ss:$12 sps:$4 sm:$0xff]  }
  0x19   :  { %4217 = vmatprep.subr.bf16.mxu0 %v6824_v25  ;;  %v6885_v5 = vld [vmem:[%s9895_s1 + $0x180] ss:$12 sps:$4 sm:$0xff]   ;;  %v6894_v10 = vld [vmem:[%s9895_s1 + $0x198] ss:$12 sps:$4 sm:$0xff]   ;;  %v6900_v14 = vld [vmem:[%s9895_s1 + $0x1b0] ss:$12 sps:$4 sm:$0xff]  }
  0x1a   :  { %v6891_v7 = vld [vmem:[%s9895_s1 + $0x480] ss:$12 sps:$4 sm:$0xff]   ;;  %v6897_v11 = vld [vmem:[%s9895_s1 + $0x498] ss:$12 sps:$4 sm:$0xff]   ;;  %v6903_v15 = vld [vmem:[%s9895_s1 + $0x4b0] ss:$12 sps:$4 sm:$0xff]  }
  0x1b   :  { %4132 = vmatpush1.bf16.msra.mxu1 %v6826_v26  ;;  %v6902_v12 = vld [vmem:[%s9895_s1 + $0x1b4] ss:$12 sps:$4 sm:$0xff]   ;;  %v6908_v16 = vld [vmem:[%s9895_s1 + $0x1cc] ss:$12 sps:$4 sm:$0xff]   ;;  %v6914_v20 = vld [vmem:[%s9895_s1 + $0x1e4] ss:$12 sps:$4 sm:$0xff]  }
  0x1c   :  { %4218 = vmatpush1.bf16.msra.mxu0 %v6827_v27  ;;  %4133 = vmatprep.subr.bf16.mxu1 %v6828_v28  ;;  %v6905_v13 = vld [vmem:[%s9895_s1 + $0x4b4] ss:$12 sps:$4 sm:$0xff]   ;;  %v6911_v17 = vld [vmem:[%s9895_s1 + $0x4cc] ss:$12 sps:$4 sm:$0xff]   ;;  %v6917_v21 = vld [vmem:[%s9895_s1 + $0x4e4] ss:$12 sps:$4 sm:$0xff]  }
  0x1d   :  { %4219 = vmatprep.subr.bf16.mxu0 %v6830_v29  ;;  %v6906_v18 = vld [vmem:[%s9895_s1 + $0x1c8] ss:$12 sps:$4 sm:$0xff]   ;;  %v6912_v22 = vld [vmem:[%s9895_s1 + $0x1e0] ss:$12 sps:$4 sm:$0xff]   ;;  %v6918_v26 = vld [vmem:[%s9895_s1 + $0x1f8] ss:$12 sps:$4 sm:$0xff]  }
  0x1e   :  { %v6909_v19 = vld [vmem:[%s9895_s1 + $0x4c8] ss:$12 sps:$4 sm:$0xff]   ;;  %v6915_v23 = vld [vmem:[%s9895_s1 + $0x4e0] ss:$12 sps:$4 sm:$0xff]   ;;  %v6921_v27 = vld [vmem:[%s9895_s1 + $0x4f8] ss:$12 sps:$4 sm:$0xff]  }
  0x1f   :  { %4134 = vmatpush1.bf16.msra.mxu1 %v6832_v30  ;;  %v6920_v24 = vld [vmem:[%s9895_s1 + $0x1fc] ss:$12 sps:$4 sm:$0xff]   ;;  %v6926_v28 = vld [vmem:[%s9895_s1 + $0x214] ss:$12 sps:$4 sm:$0xff]   ;;  %v6956_v51 = vld [vmem:[%s9895_s1 + $0x28c] ss:$12 sps:$4 sm:$0xff]  }
  0x20   :  { %4220 = vmatpush1.bf16.msra.mxu0 %v6833_v31  ;;  %4135 = vmatprep.subr.bf16.mxu1 %v6834_v32  ;;  %v6923_v25 = vld [vmem:[%s9895_s1 + $0x4fc] ss:$12 sps:$4 sm:$0xff]   ;;  %v6929_v29 = vld [vmem:[%s9895_s1 + $0x514] ss:$12 sps:$4 sm:$0xff]   ;;  %v6932_v32 = vld [vmem:[%s9895_s1 + $0x22c] ss:$12 sps:$4 sm:$0xff]  }
  0x21   :  { %4221 = vmatprep.subr.bf16.mxu0 %v6836_v33  ;;  %v6924_v30 = vld [vmem:[%s9895_s1 + $0x210] ss:$12 sps:$4 sm:$0xff]   ;;  %v6935_v33 = vld [vmem:[%s9895_s1 + $0x52c] ss:$12 sps:$4 sm:$0xff]  }
  0x22   :  { %v6927_v31 = vld [vmem:[%s9895_s1 + $0x510] ss:$12 sps:$4 sm:$0xff]  }
  0x23   :  { %4136 = vmatpush1.bf16.msra.mxu1 %v6838_v34  ;;  %v8034_v34 = vld [vmem:[%s9896_s0 + $0xc] ss:$100 sps:$4 sm:$0xff]  }
  0x24   :  { %4222 = vmatpush1.bf16.msra.mxu0 %v6839_v35  ;;  %4137 = vmatprep.subr.bf16.mxu1 %v6840_v36  ;;  %v6989_v35 = vld [vmem:[%s9896_s0 + $0x1c] ss:$100 sps:$4 sm:$0xff]   ;;  %v6930_v36 = vld [vmem:[%s9895_s1 + $0x228] ss:$12 sps:$4 sm:$0xff]  }
  0x25   :  { %4223 = vmatprep.subr.bf16.mxu0 %v6842_v37  ;;  %v6933_v37 = vld [vmem:[%s9895_s1 + $0x528] ss:$12 sps:$4 sm:$0xff]  }
  0x27   :  { %4138 = vmatpush1.bf16.msra.mxu1 %v6844_v38  ;;  %v6938_v38 = vld [vmem:[%s9895_s1 + $0x244] ss:$12 sps:$4 sm:$0xff]  }
  0x28   :  { %4224 = vmatpush1.bf16.msra.mxu0 %v6845_v39  ;;  %4139 = vmatprep.subr.bf16.mxu1 %v6846_v40  ;;  %v6941_v39 = vld [vmem:[%s9895_s1 + $0x544] ss:$12 sps:$4 sm:$0xff]   ;;  %v6936_v40 = vld [vmem:[%s9895_s1 + $0x240] ss:$12 sps:$4 sm:$0xff]  }
  0x29   :  { %4225 = vmatprep.subr.bf16.mxu0 %v6848_v41  ;;  %v6939_v41 = vld [vmem:[%s9895_s1 + $0x540] ss:$12 sps:$4 sm:$0xff]  }
  0x2b   :  { %4140 = vmatpush1.bf16.msra.mxu1 %v6850_v42  ;;  %v6944_v42 = vld [vmem:[%s9895_s1 + $0x25c] ss:$12 sps:$4 sm:$0xff]  }
  0x2c   :  { %4226 = vmatpush1.bf16.msra.mxu0 %v6851_v43  ;;  %4141 = vmatprep.subr.bf16.mxu1 %v6852_v44  ;;  %v6947_v43 = vld [vmem:[%s9895_s1 + $0x55c] ss:$12 sps:$4 sm:$0xff]   ;;  %v6942_v44 = vld [vmem:[%s9895_s1 + $0x258] ss:$12 sps:$4 sm:$0xff]  }
  0x2d   :  { %4227 = vmatprep.subr.bf16.mxu0 %v6854_v45  ;;  %v6945_v45 = vld [vmem:[%s9895_s1 + $0x558] ss:$12 sps:$4 sm:$0xff]  }
  0x2f   :  { %4142 = vmatpush1.bf16.msra.mxu1 %v6856_v46  ;;  %v6950_v46 = vld [vmem:[%s9895_s1 + $0x274] ss:$12 sps:$4 sm:$0xff]  }
  0x30   :  { %4228 = vmatpush1.bf16.msra.mxu0 %v6857_v47  ;;  %4143 = vmatprep.subr.bf16.mxu1 %v6858_v49  ;;  %v6953_v47 = vld [vmem:[%s9895_s1 + $0x574] ss:$12 sps:$4 sm:$0xff]   ;;  %v6948_v49 = vld [vmem:[%s9895_s1 + $0x270] ss:$12 sps:$4 sm:$0xff]  }
  0x31   :  { %4229 = vmatprep.subr.bf16.mxu0 %v6860_v50  ;;  %v6951_v50 = vld [vmem:[%s9895_s1 + $0x570] ss:$12 sps:$4 sm:$0xff]  }
  0x33   :  { %4144 = vmatpush1.bf16.msra.mxu1 %v6862_v52  ;;  %v6959_v52 = vld [vmem:[%s9895_s1 + $0x58c] ss:$12 sps:$4 sm:$0xff]  }
  0x34   :  { %4230 = vmatpush1.bf16.msra.mxu0 %v6863_v53  ;;  %4145 = vmatprep.subr.bf16.mxu1 %v6864_v54  ;;  %v6954_v53 = vld [vmem:[%s9895_s1 + $0x288] ss:$12 sps:$4 sm:$0xff]  }
  0x35   :  { %4231 = vmatprep.subr.bf16.mxu0 %v6866_v55  ;;  %v6957_v54 = vld [vmem:[%s9895_s1 + $0x588] ss:$12 sps:$4 sm:$0xff]   ;;  %v6962_v55 = vld [vmem:[%s9895_s1 + $0x2a4] ss:$12 sps:$4 sm:$0xff]  }
  0x37   :  { %4146 = vmatpush1.bf16.msra.mxu1 %v6868_v56  ;;  %v6965_v56 = vld [vmem:[%s9895_s1 + $0x5a4] ss:$12 sps:$4 sm:$0xff]  }
  0x38   :  { %4232 = vmatpush1.bf16.msra.mxu0 %v6869_v57  ;;  %4147 = vmatprep.subr.bf16.mxu1 %v6870_v58  ;;  %v6960_v57 = vld [vmem:[%s9895_s1 + $0x2a0] ss:$12 sps:$4 sm:$0xff]  }
  0x39   :  { %4233 = vmatprep.subr.bf16.mxu0 %v6872_v59  ;;  %v6963_v58 = vld [vmem:[%s9895_s1 + $0x5a0] ss:$12 sps:$4 sm:$0xff]   ;;  %v6968_v59 = vld [vmem:[%s9895_s1 + $0x2bc] ss:$12 sps:$4 sm:$0xff]  }
  0x3b   :  { %4148 = vmatpush1.bf16.msra.mxu1 %v6874_v60  ;;  %v6971_v60 = vld [vmem:[%s9895_s1 + $0x5bc] ss:$12 sps:$4 sm:$0xff]  }
  0x3c   :  { %4234 = vmatpush1.bf16.msra.mxu0 %v6875_v61  ;;  %4149 = vmatprep.subr.bf16.mxu1 %v6876_v62  ;;  %v6966_v61 = vld [vmem:[%s9895_s1 + $0x2b8] ss:$12 sps:$4 sm:$0xff]  }
  0x3d   :  { %4235 = vmatprep.subr.bf16.mxu0 %v6878_v63  ;;  %v6969_v62 = vld [vmem:[%s9895_s1 + $0x5b8] ss:$12 sps:$4 sm:$0xff]   ;;  %v6974_v63 = vld [vmem:[%s9895_s1 + $0x2d4] ss:$12 sps:$4 sm:$0xff]  }
  0x3f   :  { %4150 = vmatpush1.bf16.msra.mxu1 %v6880_v0  ;;  %v6977_v0 = vld [vmem:[%s9895_s1 + $0x5d4] ss:$12 sps:$4 sm:$0xff]  }
  0x40   :  { %4236 = vmatpush1.bf16.msra.mxu0 %v6881_v1  ;;  %4162 = vmatprep.subr.bf16.mxu1 %v6887_v2  ;;  %v6972_v1 = vld [vmem:[%s9895_s1 + $0x2d0] ss:$12 sps:$4 sm:$0xff]  }
  0x41   :  { %4248 = vmatprep.subr.bf16.mxu0 %v6893_v3  ;;  %v6975_v2 = vld [vmem:[%s9895_s1 + $0x5d0] ss:$12 sps:$4 sm:$0xff]   ;;  %v6980_v3 = vld [vmem:[%s9895_s1 + $0x2ec] ss:$12 sps:$4 sm:$0xff]  }
  0x42   :  { %4152 = vmatmul.mubr.bf16.vlgmr.msra.gmra.mrb[0].mxu1 %v7941_v4 }
  0x43   :  { %4238 = vmatmul.mubr.bf16.vlgmr.msra.gmra.mrb[0].mxu0 %v6888_v6  ;;  %4163 = vmatpush1.bf16.msra.mxu1 %v6885_v5  ;;  %v6983_v5 = vld [vmem:[%s9895_s1 + $0x5ec] ss:$12 sps:$4 sm:$0xff]   ;;  %v6978_v6 = vld [vmem:[%s9895_s1 + $0x2e8] ss:$12 sps:$4 sm:$0xff]  }
  0x44   :  { %4249 = vmatpush1.bf16.msra.mxu0 %v6891_v7  ;;  %4164 = vmatprep.subr.bf16.mxu1 %v6896_v8  ;;  %v6981_v7 = vld [vmem:[%s9895_s1 + $0x5e8] ss:$12 sps:$4 sm:$0xff]   ;;  %v6992_v8 = vld [vmem:[%s9895_s1 + $0x604] ss:$12 sps:$4 sm:$0xff]  }
  0x45   :  { %4250 = vmatprep.subr.bf16.mxu0 %v6899_v9  ;;  %4194 = vmatprep.mubr.bf16.mxu1 %v8034_v34  ;;  %v8148_v9 = vld [vmem:[%s9896_s0 + $0x8] ss:$100 sps:$4 sm:$0xff]  }
  0x46   :  { %4280 = vmatprep.mubr.bf16.mxu0 %v6989_v35  ;;  %v7023_v35 = vld [vmem:[%s9895_s1 + $0xe0] ss:$12 sps:$4 sm:$0xff]  }
  0x47   :  { %4165 = vmatpush1.bf16.msra.mxu1 %v6894_v10  ;;  %v6995_v10 = vld [vmem:[%s9895_s1 + $0x1204] ss:$12 sps:$4 sm:$0xff]  }
  0x48   :  { %4251 = vmatpush1.bf16.msra.mxu0 %v6897_v11  ;;  %4166 = vmatprep.subr.bf16.mxu1 %v6902_v12  ;;  %v6987_v11 = vld [vmem:[%s9896_s0 + $0x18] ss:$100 sps:$4 sm:$0xff]   ;;  %v6990_v12 = vld [vmem:[%s9895_s1 + $0x600] ss:$12 sps:$4 sm:$0xff]  }
  0x49   :  { %4252 = vmatprep.subr.bf16.mxu0 %v6905_v13  ;;  %v6993_v13 = vld [vmem:[%s9895_s1 + $0x1200] ss:$12 sps:$4 sm:$0xff]  }
  0x4b   :  { %4167 = vmatpush1.bf16.msra.mxu1 %v6900_v14  ;;  %v6998_v14 = vld [vmem:[%s9895_s1 + $0x61c] ss:$12 sps:$4 sm:$0xff]  }
  0x4c   :  { %4253 = vmatpush1.bf16.msra.mxu0 %v6903_v15  ;;  %4168 = vmatprep.subr.bf16.mxu1 %v6908_v16  ;;  %v7001_v15 = vld [vmem:[%s9895_s1 + $0x121c] ss:$12 sps:$4 sm:$0xff]   ;;  %v6996_v16 = vld [vmem:[%s9895_s1 + $0x618] ss:$12 sps:$4 sm:$0xff]  }
  0x4d   :  { %4254 = vmatprep.subr.bf16.mxu0 %v6911_v17  ;;  %v6999_v17 = vld [vmem:[%s9895_s1 + $0x1218] ss:$12 sps:$4 sm:$0xff]  }
  0x4f   :  { %4169 = vmatpush1.bf16.msra.mxu1 %v6906_v18  ;;  %v7004_v18 = vld [vmem:[%s9895_s1 + $0x634] ss:$12 sps:$4 sm:$0xff]  }
  0x50   :  { %4255 = vmatpush1.bf16.msra.mxu0 %v6909_v19  ;;  %4170 = vmatprep.subr.bf16.mxu1 %v6914_v20  ;;  %v7007_v19 = vld [vmem:[%s9895_s1 + $0x1234] ss:$12 sps:$4 sm:$0xff]   ;;  %v7688_v20 = vmov 0  }
  0x51   :  { %4256 = vmatprep.subr.bf16.mxu0 %v6917_v21  ;;  %v7002_v21 = vld [vmem:[%s9895_s1 + $0x630] ss:$12 sps:$4 sm:$0xff]  }
  0x53   :  { %4171 = vmatpush1.bf16.msra.mxu1 %v6912_v22  ;;  %v7005_v22 = vld [vmem:[%s9895_s1 + $0x1230] ss:$12 sps:$4 sm:$0xff]  }
  0x54   :  { %4257 = vmatpush1.bf16.msra.mxu0 %v6915_v23  ;;  %4172 = vmatprep.subr.bf16.mxu1 %v6920_v24  ;;  %v7010_v23 = vld [vmem:[%s9895_s1 + $0x64c] ss:$12 sps:$4 sm:$0xff]  }
  0x55   :  { %4258 = vmatprep.subr.bf16.mxu0 %v6923_v25  ;;  %v7013_v24 = vld [vmem:[%s9895_s1 + $0x124c] ss:$12 sps:$4 sm:$0xff]   ;;  %v7008_v25 = vld [vmem:[%s9895_s1 + $0x648] ss:$12 sps:$4 sm:$0xff]  }
  0x57   :  { %4173 = vmatpush1.bf16.msra.mxu1 %v6918_v26  ;;  %v7011_v26 = vld [vmem:[%s9895_s1 + $0x1248] ss:$12 sps:$4 sm:$0xff]  }
  0x58   :  { %4259 = vmatpush1.bf16.msra.mxu0 %v6921_v27  ;;  %4174 = vmatprep.subr.bf16.mxu1 %v6926_v28  ;;  %v7016_v27 = vld [vmem:[%s9895_s1 + $0x664] ss:$12 sps:$4 sm:$0xff]   ;;  %v7017_v28 = vld [vmem:[%s9895_s1 + $0xc8] ss:$12 sps:$4 sm:$0xff]  }
  0x59   :  { %4260 = vmatprep.subr.bf16.mxu0 %v6929_v29  ;;  %v7014_v29 = vld [vmem:[%s9895_s1 + $0x660] ss:$12 sps:$4 sm:$0xff]  }
  0x5b   :  { %4175 = vmatpush1.bf16.msra.mxu1 %v6924_v30  ;;  %v7018_v30 = vld [vmem:[%s9896_s0 + $0x60] ss:$100 sps:$4 sm:$0xff]  }
  0x5c   :  { %4261 = vmatpush1.bf16.msra.mxu0 %v6927_v31  ;;  %4176 = vmatprep.subr.bf16.mxu1 %v6932_v32  ;;  %v7077_v31 = vld [vmem:[%s9896_s0 + $0x24] ss:$100 sps:$4 sm:$0xff]  }
  0x5d   :  { %4262 = vmatprep.subr.bf16.mxu0 %v6935_v33  ;;  %v7019_v32 = vld [vmem:[%s9895_s1 + $0x8] ss:$12 sps:$4 sm:$0xff]  }
  0x5e   :  { %v7022_v33 = vld [vmem:[%s9895_s1 + $0x67c] ss:$12 sps:$4 sm:$0xff]  }
  0x5f   :  { %4177 = vmatpush1.bf16.msra.mxu1 %v6930_v36  ;;  %v7020_v36 = vld [vmem:[%s9895_s1 + $0x678] ss:$12 sps:$4 sm:$0xff]  }
  0x60   :  { %4263 = vmatpush1.bf16.msra.mxu0 %v6933_v37  ;;  %4178 = vmatprep.subr.bf16.mxu1 %v6938_v38  ;;  %v7024_v37 = vld [vmem:[%s9895_s1 + $0x20] ss:$12 sps:$4 sm:$0xff]  }
  0x61   :  { %4264 = vmatprep.subr.bf16.mxu0 %v6941_v39  ;;  %v7027_v38 = vld [vmem:[%s9895_s1 + $0x694] ss:$12 sps:$4 sm:$0xff]   ;;  %v7028_v39 = vld [vmem:[%s9895_s1 + $0xf8] ss:$12 sps:$4 sm:$0xff]  }
  0x63   :  { %4179 = vmatpush1.bf16.msra.mxu1 %v6936_v40  ;;  %v7025_v40 = vld [vmem:[%s9895_s1 + $0x690] ss:$12 sps:$4 sm:$0xff]  }
  0x64   :  { %4265 = vmatpush1.bf16.msra.mxu0 %v6939_v41  ;;  %4180 = vmatprep.subr.bf16.mxu1 %v6944_v42  ;;  %v7029_v41 = vld [vmem:[%s9895_s1 + $0x38] ss:$12 sps:$4 sm:$0xff]  }
  0x65   :  { %4266 = vmatprep.subr.bf16.mxu0 %v6947_v43  ;;  %v7032_v42 = vld [vmem:[%s9895_s1 + $0x6ac] ss:$12 sps:$4 sm:$0xff]   ;;  %v7030_v43 = vld [vmem:[%s9895_s1 + $0x6a8] ss:$12 sps:$4 sm:$0xff]  }
  0x67   :  { %4181 = vmatpush1.bf16.msra.mxu1 %v6942_v44  ;;  %v7034_v44 = vld [vmem:[%s9895_s1 + $0x50] ss:$12 sps:$4 sm:$0xff]  }
  0x68   :  { %4267 = vmatpush1.bf16.msra.mxu0 %v6945_v45  ;;  %4182 = vmatprep.subr.bf16.mxu1 %v6950_v46  ;;  %v7037_v45 = vld [vmem:[%s9895_s1 + $0x6c4] ss:$12 sps:$4 sm:$0xff]   ;;  %v7038_v46 = vld [vmem:[%s9895_s1 + $0x128] ss:$12 sps:$4 sm:$0xff]  }
  0x69   :  { %4268 = vmatprep.subr.bf16.mxu0 %v6953_v47  ;;  %v7035_v47 = vld [vmem:[%s9895_s1 + $0x6c0] ss:$12 sps:$4 sm:$0xff]  }
  0x6b   :  { %4183 = vmatpush1.bf16.msra.mxu1 %v6948_v49  ;;  %v7039_v49 = vld [vmem:[%s9895_s1 + $0x68] ss:$12 sps:$4 sm:$0xff]  }
  0x6c   :  { %4269 = vmatpush1.bf16.msra.mxu0 %v6951_v50  ;;  %4184 = vmatprep.subr.bf16.mxu1 %v6956_v51  ;;  %v7042_v50 = vld [vmem:[%s9895_s1 + $0x6dc] ss:$12 sps:$4 sm:$0xff]   ;;  %v7043_v51 = vld [vmem:[%s9895_s1 + $0x140] ss:$12 sps:$4 sm:$0xff]  }
  0x6d   :  { %4270 = vmatprep.subr.bf16.mxu0 %v6959_v52  ;;  %v7040_v52 = vld [vmem:[%s9895_s1 + $0x6d8] ss:$12 sps:$4 sm:$0xff]  }
  0x6f   :  { %4185 = vmatpush1.bf16.msra.mxu1 %v6954_v53  ;;  %v7044_v53 = vld [vmem:[%s9895_s1 + $0x80] ss:$12 sps:$4 sm:$0xff]  }
  0x70   :  { %4271 = vmatpush1.bf16.msra.mxu0 %v6957_v54  ;;  %4186 = vmatprep.subr.bf16.mxu1 %v6962_v55  ;;  %v7047_v54 = vld [vmem:[%s9895_s1 + $0x6f4] ss:$12 sps:$4 sm:$0xff]   ;;  %v7048_v55 = vld [vmem:[%s9895_s1 + $0x158] ss:$12 sps:$4 sm:$0xff]  }
  0x71   :  { %4272 = vmatprep.subr.bf16.mxu0 %v6965_v56  ;;  %v7045_v56 = vld [vmem:[%s9895_s1 + $0x6f0] ss:$12 sps:$4 sm:$0xff]  }
  0x73   :  { %4187 = vmatpush1.bf16.msra.mxu1 %v6960_v57  ;;  %v7049_v57 = vld [vmem:[%s9895_s1 + $0x98] ss:$12 sps:$4 sm:$0xff]  }
  0x74   :  { %4273 = vmatpush1.bf16.msra.mxu0 %v6963_v58  ;;  %4188 = vmatprep.subr.bf16.mxu1 %v6968_v59  ;;  %v7052_v58 = vld [vmem:[%s9895_s1 + $0x70c] ss:$12 sps:$4 sm:$0xff]   ;;  %v7053_v59 = vld [vmem:[%s9895_s1 + $0x170] ss:$12 sps:$4 sm:$0xff]  }
  0x75   :  { %4274 = vmatprep.subr.bf16.mxu0 %v6971_v60  ;;  %v7050_v60 = vld [vmem:[%s9895_s1 + $0x708] ss:$12 sps:$4 sm:$0xff]  }
  0x77   :  { %4189 = vmatpush1.bf16.msra.mxu1 %v6966_v61  ;;  %v7054_v61 = vld [vmem:[%s9895_s1 + $0xb0] ss:$12 sps:$4 sm:$0xff]  }
  0x78   :  { %4275 = vmatpush1.bf16.msra.mxu0 %v6969_v62  ;;  %4190 = vmatprep.subr.bf16.mxu1 %v6974_v63  ;;  %v7057_v62 = vld [vmem:[%s9895_s1 + $0x724] ss:$12 sps:$4 sm:$0xff]   ;;  %v7058_v63 = vld [vmem:[%s9895_s1 + $0x248] ss:$12 sps:$4 sm:$0xff]  }
  0x79   :  { %4276 = vmatprep.subr.bf16.mxu0 %v6977_v0  ;;  %v7055_v0 = vld [vmem:[%s9895_s1 + $0x720] ss:$12 sps:$4 sm:$0xff]  }
  0x7b   :  { %4191 = vmatpush1.bf16.msra.mxu1 %v6972_v1  ;;  %v7059_v1 = vld [vmem:[%s9895_s1 + $0x188] ss:$12 sps:$4 sm:$0xff]  }
  0x7c   :  { %4277 = vmatpush1.bf16.msra.mxu0 %v6975_v2  ;;  %4192 = vmatprep.subr.bf16.mxu1 %v6980_v3  ;;  %v7062_v2 = vld [vmem:[%s9895_s1 + $0x73c] ss:$12 sps:$4 sm:$0xff]   ;;  %v7063_v3 = vld [vmem:[%s9895_s1 + $0x260] ss:$12 sps:$4 sm:$0xff]  }
  0x7d   :  { %4278 = vmatprep.subr.bf16.mxu0 %v6983_v5  ;;  %v7060_v5 = vld [vmem:[%s9895_s1 + $0x738] ss:$12 sps:$4 sm:$0xff]  }
  0x7f   :  { %4193 = vmatpush1.bf16.msra.mxu1 %v6978_v6  ;;  %v7064_v6 = vld [vmem:[%s9895_s1 + $0x1a0] ss:$12 sps:$4 sm:$0xff]  }
  0x80   :  { %4279 = vmatpush1.bf16.msra.mxu0 %v6981_v7  ;;  %4635 = vmatprep.subr.bf16.mxu1 %v6995_v10  ;;  %v7067_v7 = vld [vmem:[%s9895_s1 + $0x754] ss:$12 sps:$4 sm:$0xff]   ;;  %v7069_v10 = vld [vmem:[%s9895_s1 + $0x1b8] ss:$12 sps:$4 sm:$0xff]  }
  0x81   :  { %4291 = vmatprep.subr.bf16.mxu0 %v6992_v8  ;;  %v7065_v8 = vld [vmem:[%s9895_s1 + $0x750] ss:$12 sps:$4 sm:$0xff]  }
  0x82   :  { %4195 = vmatmul.mubr.bf16.vlgmr.msra.gmra.mrb[0].mxu1 %v8148_v9 }
  0x83   :  { %4281 = vmatmul.mubr.bf16.vlgmr.msra.gmra.mrb[0].mxu0 %v6987_v11  ;;  %4636 = vmatpush1.bf16.msra.mxu1 %v6993_v13  ;;  %v7072_v11 = vld [vmem:[%s9895_s1 + $0x76c] ss:$12 sps:$4 sm:$0xff]   ;;  %v7074_v13 = vld [vmem:[%s9895_s1 + $0x1d0] ss:$12 sps:$4 sm:$0xff]  }
  0x84   :  { %4292 = vmatpush1.bf16.msra.mxu0 %v6990_v12  ;;  %4637 = vmatprep.subr.bf16.mxu1 %v7001_v15  ;;  %v7070_v12 = vld [vmem:[%s9895_s1 + $0x768] ss:$12 sps:$4 sm:$0xff]  }
  0x85   :  { %4293 = vmatprep.subr.bf16.mxu0 %v6998_v14  ;;  %4667 = vmatprep.mubr.bf16.mxu1 %v7688_v20  ;;  %v7080_v14 = vld [vmem:[%s9895_s1 + $0x784] ss:$12 sps:$4 sm:$0xff]   ;;  %v7081_v15 = vld [vmem:[%s9895_s1 + $0x2a8] ss:$12 sps:$4 sm:$0xff]  }
  0x86   :  { %4323 = vmatprep.mubr.bf16.mxu0 %v7077_v31  ;;  %v7093_v31 = vld [vmem:[%s9895_s1 + $0x7c8] ss:$12 sps:$4 sm:$0xff]  }
  0x87   :  { %4638 = vmatpush1.bf16.msra.mxu1 %v6999_v17  ;;  %v7078_v17 = vld [vmem:[%s9895_s1 + $0x780] ss:$12 sps:$4 sm:$0xff]  }
  0x88   :  { %4294 = vmatpush1.bf16.msra.mxu0 %v6996_v16  ;;  %4639 = vmatprep.subr.bf16.mxu1 %v7007_v19  ;;  %v8363_v16 = vld [vmem:[%s9896_s0 + $0x20] ss:$100 sps:$4 sm:$0xff]   ;;  %v7085_v19 = vld [vmem:[%s9895_s1 + $0x79c] ss:$12 sps:$4 sm:$0xff]  }
  0x89   :  { %4295 = vmatprep.subr.bf16.mxu0 %v7004_v18  ;;  %v7082_v18 = vld [vmem:[%s9895_s1 + $0x1e8] ss:$12 sps:$4 sm:$0xff]  }
  0x8b   :  { %4640 = vmatpush1.bf16.msra.mxu1 %v7005_v22  ;;  %v7083_v22 = vld [vmem:[%s9895_s1 + $0x798] ss:$12 sps:$4 sm:$0xff]  }
  0x8c   :  { %4296 = vmatpush1.bf16.msra.mxu0 %v7002_v21  ;;  %4641 = vmatprep.subr.bf16.mxu1 %v7013_v24  ;;  %v7086_v21 = vld [vmem:[%s9895_s1 + $0x2c0] ss:$12 sps:$4 sm:$0xff]  }
  0x8d   :  { %4297 = vmatprep.subr.bf16.mxu0 %v7010_v23  ;;  %v7087_v23 = vld [vmem:[%s9895_s1 + $0x200] ss:$12 sps:$4 sm:$0xff]  }
  0x8e   :  { %v7090_v24 = vld [vmem:[%s9895_s1 + $0x7b4] ss:$12 sps:$4 sm:$0xff]  }
  0x8f   :  { %4642 = vmatpush1.bf16.msra.mxu1 %v7011_v26  ;;  %v8393_v26 = vld [vmem:[%s9896_s0 + $0x2c] ss:$100 sps:$4 sm:$0xff]  }
  0x90   :  { %4298 = vmatpush1.bf16.msra.mxu0 %v7008_v25  ;;  %6420 = vmatprep.subr.bf16.mxu1 %v7017_v28  ;;  %v7091_v25 = vld [vmem:[%s9895_s1 + $0x2d8] ss:$12 sps:$4 sm:$0xff]  }
  0x91   :  { %4299 = vmatprep.subr.bf16.mxu0 %v7016_v27  ;;  %v7088_v27 = vld [vmem:[%s9895_s1 + $0x7b0] ss:$12 sps:$4 sm:$0xff]   ;;  %v7092_v28 = vld [vmem:[%s9895_s1 + $0x218] ss:$12 sps:$4 sm:$0xff]  }
  0x92   :  { %6364 = vmatmul.mubr.msk.bf16.vlgmr.msra.gmra.mrb[4].mxu1 %vm4115_vm0, %v7018_v30  ;;  %v7096_v30 = vld [vmem:[%s9895_s1 + $0x2f0] ss:$12 sps:$4 sm:$0xff]  }
  0x93   :  { %6421 = vmatpush3.bf16.msra.mxu1 %v7019_v32  ;;  %4710 = vmatprep.mubr.bf16.mxu1 %v7878_v48  ;;  %v7033_v48 = vld [vmem:[%s9895_s1 + $0x110] ss:$12 sps:$4 sm:$0xff]  }
  0x94   :  { %4300 = vmatpush1.bf16.msra.mxu0 %v7014_v29  ;;  %6422 = vmatprep.subr.bf16.mxu1 %v7023_v35  ;;  %v7095_v29 = vld [vmem:[%s9895_s1 + $0x7cc] ss:$12 sps:$4 sm:$0xff]   ;;  %v7097_v32 = vld [vmem:[%s9895_s1 + $0x230] ss:$12 sps:$4 sm:$0xff]   ;;  %v7101_v35 = vld [vmem:[%s9895_s1 + $0x3c8] ss:$12 sps:$4 sm:$0xff]  }
  0x95   :  { %4301 = vmatprep.subr.bf16.mxu0 %v7022_v33  ;;  %v7100_v33 = vld [vmem:[%s9895_s1 + $0x7e4] ss:$12 sps:$4 sm:$0xff]  }
  0x97   :  { %6423 = vmatpush3.bf16.msra.mxu1 %v7024_v37  ;;  %v7102_v37 = vld [vmem:[%s9895_s1 + $0x308] ss:$12 sps:$4 sm:$0xff]  }
  0x98   :  { %4302 = vmatpush1.bf16.msra.mxu0 %v7020_v36  ;;  %6424 = vmatprep.subr.bf16.mxu1 %v7028_v39  ;;  %v7098_v36 = vld [vmem:[%s9895_s1 + $0x7e0] ss:$12 sps:$4 sm:$0xff]  }
  0x99   :  { %4303 = vmatprep.subr.bf16.mxu0 %v7027_v38  ;;  %v7105_v38 = vld [vmem:[%s9895_s1 + $0x7fc] ss:$12 sps:$4 sm:$0xff]   ;;  %v7106_v39 = vld [vmem:[%s9895_s1 + $0x3e0] ss:$12 sps:$4 sm:$0xff]  }
  0x9b   :  { %6425 = vmatpush3.bf16.msra.mxu1 %v7029_v41  ;;  %v7107_v41 = vld [vmem:[%s9895_s1 + $0x320] ss:$12 sps:$4 sm:$0xff]  }
  0x9c   :  { %4304 = vmatpush1.bf16.msra.mxu0 %v7025_v40  ;;  %6426 = vmatprep.subr.bf16.mxu1 %v7033_v48  ;;  %v7103_v40 = vld [vmem:[%s9895_s1 + $0x7f8] ss:$12 sps:$4 sm:$0xff]   ;;  %v7108_v48 = vld [vmem:[%s9895_s1 + $0x810] ss:$12 sps:$4 sm:$0xff]  }
  0x9d   :  { %4305 = vmatprep.subr.bf16.mxu0 %v7032_v42  ;;  %v7110_v42 = vld [vmem:[%s9895_s1 + $0x814] ss:$12 sps:$4 sm:$0xff]  }
  0x9f   :  { %6427 = vmatpush3.bf16.msra.mxu1 %v7034_v44  ;;  %v7112_v44 = vld [vmem:[%s9895_s1 + $0x338] ss:$12 sps:$4 sm:$0xff]  }
  0xa0   :  { %4306 = vmatpush1.bf16.msra.mxu0 %v7030_v43  ;;  %6428 = vmatprep.subr.bf16.mxu1 %v7038_v46  ;;  %v7681_v43 = vld [vmem:[%s9896_s0 + $0x14] ss:$100 sps:$4 sm:$0xff]   ;;  %v7116_v46 = vld [vmem:[%s9895_s1 + $0x410] ss:$12 sps:$4 sm:$0xff]  }
  0xa1   :  { %4307 = vmatprep.subr.bf16.mxu0 %v7037_v45  ;;  %v7115_v45 = vld [vmem:[%s9895_s1 + $0x82c] ss:$12 sps:$4 sm:$0xff]  }
  0xa3   :  { %6429 = vmatpush3.bf16.msra.mxu1 %v7039_v49  ;;  %v7117_v49 = vld [vmem:[%s9895_s1 + $0x350] ss:$12 sps:$4 sm:$0xff]  }
  0xa4   :  { %4308 = vmatpush1.bf16.msra.mxu0 %v7035_v47  ;;  %6430 = vmatprep.subr.bf16.mxu1 %v7043_v51  ;;  %v7113_v47 = vld [vmem:[%s9895_s1 + $0x828] ss:$12 sps:$4 sm:$0xff]  }
  0xa5   :  { %4309 = vmatprep.subr.bf16.mxu0 %v7042_v50  ;;  %v7120_v50 = vld [vmem:[%s9895_s1 + $0x844] ss:$12 sps:$4 sm:$0xff]   ;;  %v7121_v51 = vld [vmem:[%s9895_s1 + $0x428] ss:$12 sps:$4 sm:$0xff]  }
  0xa7   :  { %6431 = vmatpush3.bf16.msra.mxu1 %v7044_v53  ;;  %v7122_v53 = vld [vmem:[%s9895_s1 + $0x368] ss:$12 sps:$4 sm:$0xff]  }
  0xa8   :  { %4310 = vmatpush1.bf16.msra.mxu0 %v7040_v52  ;;  %6432 = vmatprep.subr.bf16.mxu1 %v7048_v55  ;;  %v7118_v52 = vld [vmem:[%s9895_s1 + $0x840] ss:$12 sps:$4 sm:$0xff]  }
  0xa9   :  { %4311 = vmatprep.subr.bf16.mxu0 %v7047_v54  ;;  %v7125_v54 = vld [vmem:[%s9895_s1 + $0x85c] ss:$12 sps:$4 sm:$0xff]   ;;  %v7126_v55 = vld [vmem:[%s9895_s1 + $0x440] ss:$12 sps:$4 sm:$0xff]  }
  0xab   :  { %6433 = vmatpush3.bf16.msra.mxu1 %v7049_v57  ;;  %v7127_v57 = vld [vmem:[%s9895_s1 + $0x380] ss:$12 sps:$4 sm:$0xff]  }
  0xac   :  { %4312 = vmatpush1.bf16.msra.mxu0 %v7045_v56  ;;  %6434 = vmatprep.subr.bf16.mxu1 %v7053_v59  ;;  %v7123_v56 = vld [vmem:[%s9895_s1 + $0x858] ss:$12 sps:$4 sm:$0xff]  }
  0xad   :  { %4313 = vmatprep.subr.bf16.mxu0 %v7052_v58  ;;  %v7130_v58 = vld [vmem:[%s9895_s1 + $0x874] ss:$12 sps:$4 sm:$0xff]   ;;  %v7131_v59 = vld [vmem:[%s9895_s1 + $0x458] ss:$12 sps:$4 sm:$0xff]  }
  0xaf   :  { %6435 = vmatpush3.bf16.msra.mxu1 %v7054_v61  ;;  %v7132_v61 = vld [vmem:[%s9895_s1 + $0x398] ss:$12 sps:$4 sm:$0xff]  }
  0xb0   :  { %4314 = vmatpush1.bf16.msra.mxu0 %v7050_v60  ;;  %6442 = vmatprep.subr.bf16.mxu1 %v7058_v63  ;;  %v7128_v60 = vld [vmem:[%s9895_s1 + $0x870] ss:$12 sps:$4 sm:$0xff]  }
  0xb1   :  { %4315 = vmatprep.subr.bf16.mxu0 %v7057_v62  ;;  %v7135_v62 = vld [vmem:[%s9895_s1 + $0x88c] ss:$12 sps:$4 sm:$0xff]   ;;  %v7136_v63 = vld [vmem:[%s9895_s1 + $0x470] ss:$12 sps:$4 sm:$0xff]  }
  0xb2   :  { %4711 = vmatmul.mubr.bf16.vlgmr.msra.gmra.mrb[8].mxu1 %v7941_v4  ;;  %v7068_v4 = vld [vmem:[%s9895_s1 + $0x278] ss:$12 sps:$4 sm:$0xff]  }
  0xb3   :  { %6443 = vmatpush3.bf16.msra.mxu1 %v7059_v1  ;;  %4751 = vmatprep.mubr.bf16.mxu1 %v8034_v34  ;;  %v7073_v34 = vld [vmem:[%s9895_s1 + $0x290] ss:$12 sps:$4 sm:$0xff]  }
  0xb4   :  { %4316 = vmatpush1.bf16.msra.mxu0 %v7055_v0  ;;  %6444 = vmatprep.subr.bf16.mxu1 %v7063_v3  ;;  %v7133_v0 = vld [vmem:[%s9895_s1 + $0x888] ss:$12 sps:$4 sm:$0xff]   ;;  %v7137_v1 = vld [vmem:[%s9895_s1 + $0x3b0] ss:$12 sps:$4 sm:$0xff]  }
  0xb5   :  { %4317 = vmatprep.subr.bf16.mxu0 %v7062_v2  ;;  %v7140_v2 = vld [vmem:[%s9895_s1 + $0x8a4] ss:$12 sps:$4 sm:$0xff]   ;;  %v7141_v3 = vld [vmem:[%s9895_s1 + $0x548] ss:$12 sps:$4 sm:$0xff]  }
  0xb7   :  { %6445 = vmatpush3.bf16.msra.mxu1 %v7064_v6  ;;  %v7142_v6 = vld [vmem:[%s9895_s1 + $0x488] ss:$12 sps:$4 sm:$0xff]  }
  0xb8   :  { %4318 = vmatpush1.bf16.msra.mxu0 %v7060_v5  ;;  %6446 = vmatprep.subr.bf16.mxu1 %v7068_v4  ;;  %v7138_v5 = vld [vmem:[%s9895_s1 + $0x8a0] ss:$12 sps:$4 sm:$0xff]  }
  0xb9   :  { %4319 = vmatprep.subr.bf16.mxu0 %v7067_v7  ;;  %v7145_v7 = vld [vmem:[%s9895_s1 + $0x8bc] ss:$12 sps:$4 sm:$0xff]   ;;  %v7146_v4 = vld [vmem:[%s9895_s1 + $0x560] ss:$12 sps:$4 sm:$0xff]  }
  0xbb   :  { %6447 = vmatpush3.bf16.msra.mxu1 %v7069_v10  ;;  %v7682_v10 = vld [vmem:[%s9896_s0 + $0x10] ss:$100 sps:$4 sm:$0xff]  }
  0xbc   :  { %4320 = vmatpush1.bf16.msra.mxu0 %v7065_v8  ;;  %6448 = vmatprep.subr.bf16.mxu1 %v7073_v34  ;;  %v7143_v8 = vld [vmem:[%s9895_s1 + $0x8b8] ss:$12 sps:$4 sm:$0xff]   ;;  %v7150_v34 = vld [vmem:[%s9895_s1 + $0x8d4] ss:$12 sps:$4 sm:$0xff]  }
  0xbd   :  { %4321 = vmatprep.subr.bf16.mxu0 %v7072_v11  ;;  %v7147_v11 = vld [vmem:[%s9895_s1 + $0x4a0] ss:$12 sps:$4 sm:$0xff]  }
  0xbf   :  { %6449 = vmatpush3.bf16.msra.mxu1 %v7074_v13  ;;  %v7683_v13 = vld [vmem:[%s9896_s0 + $0x1c] ss:$100 sps:$4 sm:$0xff]  }
  0xc0   :  { %4322 = vmatpush1.bf16.msra.mxu0 %v7070_v12  ;;  %6450 = vmatprep.subr.bf16.mxu1 %v7081_v15  ;;  %v7151_v12 = vld [vmem:[%s9895_s1 + $0x578] ss:$12 sps:$4 sm:$0xff]  }
  0xc1   :  { %4334 = vmatprep.subr.bf16.mxu0 %v7080_v14  ;;  %v7148_v14 = vld [vmem:[%s9895_s1 + $0x8d0] ss:$12 sps:$4 sm:$0xff]   ;;  %v7152_v15 = vld [vmem:[%s9895_s1 + $0x4b8] ss:$12 sps:$4 sm:$0xff]  }
  0xc3   :  { %4324 = vmatmul.mubr.bf16.vlgmr.msra.gmra.mrb[0].mxu0 %v8363_v16  ;;  %6451 = vmatpush3.bf16.msra.mxu1 %v7082_v18  ;;  %v7156_v18 = vld [vmem:[%s9895_s1 + $0x590] ss:$12 sps:$4 sm:$0xff]  }
  0xc4   :  { %4335 = vmatpush1.bf16.msra.mxu0 %v7078_v17  ;;  %6452 = vmatprep.subr.bf16.mxu1 %v7086_v21  ;;  %v7155_v17 = vld [vmem:[%s9895_s1 + $0x8ec] ss:$12 sps:$4 sm:$0xff]   ;;  %v7157_v21 = vld [vmem:[%s9895_s1 + $0x4d0] ss:$12 sps:$4 sm:$0xff]  }
  0xc5   :  { %4336 = vmatprep.subr.bf16.mxu0 %v7085_v19  ;;  %4366 = vmatprep.mubr.bf16.mxu0 %v8393_v26  ;;  %v7153_v19 = vld [vmem:[%s9895_s1 + $0x8e8] ss:$12 sps:$4 sm:$0xff]  }
  0xc7   :  { %6453 = vmatpush3.bf16.msra.mxu1 %v7087_v23  ;;  %v7164_v23 = vld [vmem:[%s9895_s1 + $0x5a8] ss:$12 sps:$4 sm:$0xff]  }
  0xc8   :  { %4337 = vmatpush1.bf16.msra.mxu0 %v7083_v22  ;;  %6454 = vmatprep.subr.bf16.mxu1 %v7091_v25  ;;  %v7163_v22 = vld [vmem:[%s9895_s1 + $0x904] ss:$12 sps:$4 sm:$0xff]   ;;  %v7161_v25 = vld [vmem:[%s9895_s1 + $0x900] ss:$12 sps:$4 sm:$0xff]  }
  0xc9   :  { %4338 = vmatprep.subr.bf16.mxu0 %v7090_v24  ;;  %v8577_v24 = vld [vmem:[%s9896_s0 + $0x28] ss:$100 sps:$4 sm:$0xff]  }
  0xcb   :  { %6455 = vmatpush3.bf16.msra.mxu1 %v7092_v28  ;;  %v7168_v28 = vld [vmem:[%s9895_s1 + $0x91c] ss:$12 sps:$4 sm:$0xff]  }
  0xcc   :  { %4339 = vmatpush1.bf16.msra.mxu0 %v7088_v27  ;;  %6456 = vmatprep.subr.bf16.mxu1 %v7096_v30  ;;  %v7165_v27 = vld [vmem:[%s9895_s1 + $0x4e8] ss:$12 sps:$4 sm:$0xff]  }
  0xcd   :  { %4340 = vmatprep.subr.bf16.mxu0 %v7095_v29  ;;  %v7169_v29 = vld [vmem:[%s9895_s1 + $0x5c0] ss:$12 sps:$4 sm:$0xff]   ;;  %v8594_v30 = vld [vmem:[%s9896_s0 + $0x34] ss:$100 sps:$4 sm:$0xff]  }
  0xcf   :  { %6457 = vmatpush3.bf16.msra.mxu1 %v7097_v32  ;;  %v7170_v32 = vld [vmem:[%s9895_s1 + $0x500] ss:$12 sps:$4 sm:$0xff]  }
  0xd0   :  { %4341 = vmatpush1.bf16.msra.mxu0 %v7093_v31  ;;  %6464 = vmatprep.subr.bf16.mxu1 %v7101_v35  ;;  %v7166_v31 = vld [vmem:[%s9895_s1 + $0x918] ss:$12 sps:$4 sm:$0xff]  }
  0xd1   :  { %4342 = vmatprep.subr.bf16.mxu0 %v7100_v33  ;;  %v7173_v33 = vld [vmem:[%s9895_s1 + $0x934] ss:$12 sps:$4 sm:$0xff]   ;;  %v7174_v35 = vld [vmem:[%s9895_s1 + $0x5d8] ss:$12 sps:$4 sm:$0xff]  }
  0xd2   :  { %4752 = vmatmul.mubr.bf16.vlgmr.msra.gmra.mrb[12].mxu1 %v8148_v9  ;;  %v7111_v9 = vld [vmem:[%s9895_s1 + $0x3f8] ss:$12 sps:$4 sm:$0xff]  }
  0xd3   :  { %6465 = vmatpush3.bf16.msra.mxu1 %v7102_v37  ;;  %4792 = vmatprep.mubr.bf16.mxu1 %v7681_v43  ;;  %v7175_v37 = vld [vmem:[%s9895_s1 + $0x518] ss:$12 sps:$4 sm:$0xff]   ;;  %v7185_v43 = vld [vmem:[%s9895_s1 + $0x608] ss:$12 sps:$4 sm:$0xff]  }
  0xd4   :  { %4343 = vmatpush1.bf16.msra.mxu0 %v7098_v36  ;;  %6466 = vmatprep.subr.bf16.mxu1 %v7106_v39  ;;  %v7171_v36 = vld [vmem:[%s9895_s1 + $0x930] ss:$12 sps:$4 sm:$0xff]  }
  0xd5   :  { %4344 = vmatprep.subr.bf16.mxu0 %v7105_v38  ;;  %v7178_v38 = vld [vmem:[%s9895_s1 + $0x94c] ss:$12 sps:$4 sm:$0xff]   ;;  %v7179_v39 = vld [vmem:[%s9895_s1 + $0x5f0] ss:$12 sps:$4 sm:$0xff]  }
  0xd7   :  { %6467 = vmatpush3.bf16.msra.mxu1 %v7107_v41  ;;  %v7180_v41 = vld [vmem:[%s9895_s1 + $0x530] ss:$12 sps:$4 sm:$0xff]  }
  0xd8   :  { %4345 = vmatpush1.bf16.msra.mxu0 %v7103_v40  ;;  %6468 = vmatprep.subr.bf16.mxu1 %v7111_v9  ;;  %v7176_v40 = vld [vmem:[%s9895_s1 + $0x948] ss:$12 sps:$4 sm:$0xff]  }
  0xd9   :  { %4346 = vmatprep.subr.bf16.mxu0 %v7110_v42  ;;  %v7183_v42 = vld [vmem:[%s9895_s1 + $0x964] ss:$12 sps:$4 sm:$0xff]   ;;  %v7184_v9 = vld [vmem:[%s9895_s1 + $0x6c8] ss:$12 sps:$4 sm:$0xff]  }
  0xdb   :  { %6469 = vmatpush3.bf16.msra.mxu1 %v7112_v44  ;;  %v7188_v44 = vld [vmem:[%s9895_s1 + $0x97c] ss:$12 sps:$4 sm:$0xff]  }
  0xdc   :  { %4347 = vmatpush1.bf16.msra.mxu0 %v7108_v48  ;;  %6470 = vmatprep.subr.bf16.mxu1 %v7116_v46  ;;  %v7181_v48 = vld [vmem:[%s9895_s1 + $0x960] ss:$12 sps:$4 sm:$0xff]   ;;  %v7684_v46 = vld [vmem:[%s9896_s0 + $0x18] ss:$100 sps:$4 sm:$0xff]  }
  0xdd   :  { %4348 = vmatprep.subr.bf16.mxu0 %v7115_v45  ;;  %v7189_v45 = vld [vmem:[%s9895_s1 + $0x6e0] ss:$12 sps:$4 sm:$0xff]  }
  0xdf   :  { %6471 = vmatpush3.bf16.msra.mxu1 %v7117_v49  ;;  %v7190_v49 = vld [vmem:[%s9895_s1 + $0x620] ss:$12 sps:$4 sm:$0xff]  }
  0xe0   :  { %4349 = vmatpush1.bf16.msra.mxu0 %v7113_v47  ;;  %6472 = vmatprep.subr.bf16.mxu1 %v7121_v51  ;;  %v7186_v47 = vld [vmem:[%s9895_s1 + $0x978] ss:$12 sps:$4 sm:$0xff]  }
  0xe1   :  { %4350 = vmatprep.subr.bf16.mxu0 %v7120_v50  ;;  %v7193_v50 = vld [vmem:[%s9895_s1 + $0x994] ss:$12 sps:$4 sm:$0xff]   ;;  %v7194_v51 = vld [vmem:[%s9895_s1 + $0x6f8] ss:$12 sps:$4 sm:$0xff]  }
  0xe3   :  { %6473 = vmatpush3.bf16.msra.mxu1 %v7122_v53  ;;  %v7191_v53 = vld [vmem:[%s9895_s1 + $0x990] ss:$12 sps:$4 sm:$0xff]  }
  0xe4   :  { %4351 = vmatpush1.bf16.msra.mxu0 %v7118_v52  ;;  %6474 = vmatprep.subr.bf16.mxu1 %v7126_v55  ;;  %v7685_v52 = vld [vmem:[%s9896_s0 + $0x24] ss:$100 sps:$4 sm:$0xff]   ;;  %v7198_v55 = vld [vmem:[%s9895_s1 + $0x9ac] ss:$12 sps:$4 sm:$0xff]  }
  0xe5   :  { %4352 = vmatprep.subr.bf16.mxu0 %v7125_v54  ;;  %v7195_v54 = vld [vmem:[%s9895_s1 + $0x638] ss:$12 sps:$4 sm:$0xff]  }
  0xe7   :  { %6475 = vmatpush3.bf16.msra.mxu1 %v7127_v57  ;;  %v7196_v57 = vld [vmem:[%s9895_s1 + $0x9a8] ss:$12 sps:$4 sm:$0xff]  }
  0xe8   :  { %4353 = vmatpush1.bf16.msra.mxu0 %v7123_v56  ;;  %6476 = vmatprep.subr.bf16.mxu1 %v7131_v59  ;;  %v7199_v56 = vld [vmem:[%s9895_s1 + $0x710] ss:$12 sps:$4 sm:$0xff]  }
  0xe9   :  { %4354 = vmatprep.subr.bf16.mxu0 %v7130_v58  ;;  %v7200_v58 = vld [vmem:[%s9895_s1 + $0x650] ss:$12 sps:$4 sm:$0xff]  }
  0xea   :  { %v7203_v59 = vld [vmem:[%s9895_s1 + $0x9c4] ss:$12 sps:$4 sm:$0xff]  }
  0xeb   :  { %6477 = vmatpush3.bf16.msra.mxu1 %v7132_v61  ;;  %v7201_v61 = vld [vmem:[%s9895_s1 + $0x9c0] ss:$12 sps:$4 sm:$0xff]  }
  0xec   :  { %4355 = vmatpush1.bf16.msra.mxu0 %v7128_v60  ;;  %6478 = vmatprep.subr.bf16.mxu1 %v7136_v63  ;;  %v7204_v60 = vld [vmem:[%s9895_s1 + $0x728] ss:$12 sps:$4 sm:$0xff]  }
  0xed   :  { %4356 = vmatprep.subr.bf16.mxu0 %v7135_v62  ;;  %v7205_v62 = vld [vmem:[%s9895_s1 + $0x668] ss:$12 sps:$4 sm:$0xff]  }
  0xee   :  { %v7208_v63 = vld [vmem:[%s9895_s1 + $0x9dc] ss:$12 sps:$4 sm:$0xff]  }
  0xef   :  { %6479 = vmatpush3.bf16.msra.mxu1 %v7137_v1  ;;  %v7206_v1 = vld [vmem:[%s9895_s1 + $0x9d8] ss:$12 sps:$4 sm:$0xff]  }
  0xf0   :  { %4357 = vmatpush1.bf16.msra.mxu0 %v7133_v0  ;;  %6486 = vmatprep.subr.bf16.mxu1 %v7141_v3  ;;  %v7209_v0 = vld [vmem:[%s9895_s1 + $0x740] ss:$12 sps:$4 sm:$0xff]  }
  0xf1   :  { %4358 = vmatprep.subr.bf16.mxu0 %v7140_v2  ;;  %v7210_v2 = vld [vmem:[%s9895_s1 + $0x680] ss:$12 sps:$4 sm:$0xff]  }
  0xf2   :  { %4793 = vmatmul.mubr.bf16.vlgmr.msra.gmra.mrb[16].mxu1 %v7682_v10  ;;  %v7213_v3 = vld [vmem:[%s9895_s1 + $0x9f4] ss:$12 sps:$4 sm:$0xff]  }
  0xf3   :  { %6487 = vmatpush3.bf16.msra.mxu1 %v7142_v6  ;;  %4833 = vmatprep.mubr.bf16.mxu1 %v7683_v13  ;;  %v7211_v6 = vld [vmem:[%s9895_s1 + $0x9f0] ss:$12 sps:$4 sm:$0xff]   ;;  %v7216_v10 = vld [vmem:[%s9895_s1 + $0xa08] ss:$12 sps:$4 sm:$0xff]   ;;  %v7221_v13 = vld [vmem:[%s9895_s1 + $0xa20] ss:$12 sps:$4 sm:$0xff]  }
  0xf4   :  { %4359 = vmatpush1.bf16.msra.mxu0 %v7138_v5  ;;  %6488 = vmatprep.subr.bf16.mxu1 %v7146_v4  ;;  %v7214_v5 = vld [vmem:[%s9895_s1 + $0x758] ss:$12 sps:$4 sm:$0xff]  }
  0xf5   :  { %4360 = vmatprep.subr.bf16.mxu0 %v7145_v7  ;;  %v7215_v7 = vld [vmem:[%s9895_s1 + $0x698] ss:$12 sps:$4 sm:$0xff]  }
  0xf6   :  { %v7218_v4 = vld [vmem:[%s9895_s1 + $0xa0c] ss:$12 sps:$4 sm:$0xff]  }
  0xf7   :  { %6489 = vmatpush3.bf16.msra.mxu1 %v7147_v11  ;;  %v7220_v11 = vld [vmem:[%s9895_s1 + $0x6b0] ss:$12 sps:$4 sm:$0xff]  }
  0xf8   :  { %4361 = vmatpush1.bf16.msra.mxu0 %v7143_v8  ;;  %6490 = vmatprep.subr.bf16.mxu1 %v7151_v12  ;;  %v7219_v8 = vld [vmem:[%s9895_s1 + $0x770] ss:$12 sps:$4 sm:$0xff]   ;;  %v7224_v12 = vld [vmem:[%s9895_s1 + $0x848] ss:$12 sps:$4 sm:$0xff]  }
  0xf9   :  { %4362 = vmatprep.subr.bf16.mxu0 %v7150_v34  ;;  %v7223_v34 = vld [vmem:[%s9895_s1 + $0xa24] ss:$12 sps:$4 sm:$0xff]  }
  0xfb   :  { %6491 = vmatpush3.bf16.msra.mxu1 %v7152_v15  ;;  %v7228_v15 = vld [vmem:[%s9895_s1 + $0xa3c] ss:$12 sps:$4 sm:$0xff]  }
  0xfc   :  { %4363 = vmatpush1.bf16.msra.mxu0 %v7148_v14  ;;  %6492 = vmatprep.subr.bf16.mxu1 %v7156_v18  ;;  %v7225_v14 = vld [vmem:[%s9895_s1 + $0x788] ss:$12 sps:$4 sm:$0xff]   ;;  %v7226_v18 = vld [vmem:[%s9895_s1 + $0xa38] ss:$12 sps:$4 sm:$0xff]  }
  0xfd   :  { %4364 = vmatprep.subr.bf16.mxu0 %v7155_v17  ;;  %v7229_v17 = vld [vmem:[%s9895_s1 + $0x860] ss:$12 sps:$4 sm:$0xff]  }
  0xff   :  { %6493 = vmatpush3.bf16.msra.mxu1 %v7157_v21  ;;  %v7233_v21 = vld [vmem:[%s9895_s1 + $0xa54] ss:$12 sps:$4 sm:$0xff]  }
 0x100   :  { %4365 = vmatpush1.bf16.msra.mxu0 %v7153_v19  ;;  %6494 = vmatprep.subr.bf16.mxu1 %v7164_v23  ;;  %v7230_v19 = vld [vmem:[%s9895_s1 + $0x7a0] ss:$12 sps:$4 sm:$0xff]   ;;  %v7235_v23 = vld [vmem:[%s9895_s1 + $0x7b8] ss:$12 sps:$4 sm:$0xff]  }
 0x101   :  { %4377 = vmatprep.subr.bf16.mxu0 %v7163_v22  ;;  %v7231_v22 = vld [vmem:[%s9895_s1 + $0xa50] ss:$12 sps:$4 sm:$0xff]  }
 0x103   :  { %4367 = vmatmul.mubr.bf16.vlgmr.msra.gmra.mrb[0].mxu0 %v8577_v24  ;;  %6495 = vmatpush3.bf16.msra.mxu1 %v7165_v27  ;;  %v7236_v27 = vld [vmem:[%s9895_s1 + $0xa68] ss:$12 sps:$4 sm:$0xff]  }
 0x104   :  { %4378 = vmatpush1.bf16.msra.mxu0 %v7161_v25  ;;  %6496 = vmatprep.subr.bf16.mxu1 %v7169_v29  ;;  %v7238_v25 = vld [vmem:[%s9895_s1 + $0xa6c] ss:$12 sps:$4 sm:$0xff]   ;;  %v7246_v29 = vld [vmem:[%s9895_s1 + $0xa84] ss:$12 sps:$4 sm:$0xff]  }
 0x105   :  { %4379 = vmatprep.subr.bf16.mxu0 %v7168_v28  ;;  %4409 = vmatprep.mubr.bf16.mxu0 %v8594_v30  ;;  %v7240_v28 = vld [vmem:[%s9895_s1 + $0x7d0] ss:$12 sps:$4 sm:$0xff]  }
 0x107   :  { %6497 = vmatpush3.bf16.msra.mxu1 %v7170_v32  ;;  %v7247_v32 = vld [vmem:[%s9895_s1 + $0x8a8] ss:$12 sps:$4 sm:$0xff]  }
 0x108   :  { %4380 = vmatpush1.bf16.msra.mxu0 %v7166_v31  ;;  %6498 = vmatprep.subr.bf16.mxu1 %v7174_v35  ;;  %v8786_v31 = vld [vmem:[%s9896_s0 + $0x30] ss:$100 sps:$4 sm:$0xff]  }
 0x109   :  { %4381 = vmatprep.subr.bf16.mxu0 %v7173_v33  ;;  %v7244_v33 = vld [vmem:[%s9895_s1 + $0xa80] ss:$12 sps:$4 sm:$0xff]   ;;  %v7248_v35 = vld [vmem:[%s9895_s1 + $0x7e8] ss:$12 sps:$4 sm:$0xff]  }
 0x10b   :  { %6499 = vmatpush3.bf16.msra.mxu1 %v7175_v37  ;;  %v7252_v37 = vld [vmem:[%s9895_s1 + $0x8c0] ss:$12 sps:$4 sm:$0xff]  }
 0x10c   :  { %4382 = vmatpush1.bf16.msra.mxu0 %v7171_v36  ;;  %6500 = vmatprep.subr.bf16.mxu1 %v7179_v39  ;;  %v7251_v36 = vld [vmem:[%s9895_s1 + $0xa9c] ss:$12 sps:$4 sm:$0xff]   ;;  %v7249_v39 = vld [vmem:[%s9895_s1 + $0xa98] ss:$12 sps:$4 sm:$0xff]  }
 0x10d   :  { %4383 = vmatprep.subr.bf16.mxu0 %v7178_v38  ;;  %v8806_v38 = vld [vmem:[%s9896_s0 + $0x3c] ss:$100 sps:$4 sm:$0xff]  }
 0x10f   :  { %6501 = vmatpush3.bf16.msra.mxu1 %v7180_v41  ;;  %v7256_v41 = vld [vmem:[%s9895_s1 + $0xab4] ss:$12 sps:$4 sm:$0xff]  }
 0x110   :  { %4384 = vmatpush1.bf16.msra.mxu0 %v7176_v40  ;;  %6508 = vmatprep.subr.bf16.mxu1 %v7184_v9  ;;  %v7253_v40 = vld [vmem:[%s9895_s1 + $0x800] ss:$12 sps:$4 sm:$0xff]   ;;  %v7254_v9 = vld [vmem:[%s9895_s1 + $0xab0] ss:$12 sps:$4 sm:$0xff]  }
 0x111   :  { %4385 = vmatprep.subr.bf16.mxu0 %v7183_v42  ;;  %v7257_v42 = vld [vmem:[%s9895_s1 + $0x8d8] ss:$12 sps:$4 sm:$0xff]  }
 0x112   :  { %4834 = vmatmul.mubr.bf16.vlgmr.msra.gmra.mrb[20].mxu1 %v7684_v46  ;;  %v7263_v46 = vld [vmem:[%s9895_s1 + $0x830] ss:$12 sps:$4 sm:$0xff]  }
 0x113   :  { %6509 = vmatpush3.bf16.msra.mxu1 %v7185_v43  ;;  %4874 = vmatprep.mubr.bf16.mxu1 %v7685_v52  ;;  %v7261_v43 = vld [vmem:[%s9895_s1 + $0xacc] ss:$12 sps:$4 sm:$0xff]   ;;  %v7271_v52 = vld [vmem:[%s9895_s1 + $0xafc] ss:$12 sps:$4 sm:$0xff]  }
 0x114   :  { %4386 = vmatpush1.bf16.msra.mxu0 %v7181_v48  ;;  %6510 = vmatprep.subr.bf16.mxu1 %v7189_v45  ;;  %v7258_v48 = vld [vmem:[%s9895_s1 + $0x818] ss:$12 sps:$4 sm:$0xff]   ;;  %v7259_v45 = vld [vmem:[%s9895_s1 + $0xac8] ss:$12 sps:$4 sm:$0xff]  }
 0x115   :  { %4387 = vmatprep.subr.bf16.mxu0 %v7188_v44  ;;  %v7262_v44 = vld [vmem:[%s9895_s1 + $0x8f0] ss:$12 sps:$4 sm:$0xff]  }
 0x117   :  { %6511 = vmatpush3.bf16.msra.mxu1 %v7190_v49  ;;  %v7267_v49 = vld [vmem:[%s9895_s1 + $0x9c8] ss:$12 sps:$4 sm:$0xff]  }
 0x118   :  { %4388 = vmatpush1.bf16.msra.mxu0 %v7186_v47  ;;  %6512 = vmatprep.subr.bf16.mxu1 %v7194_v51  ;;  %v7266_v47 = vld [vmem:[%s9895_s1 + $0xae4] ss:$12 sps:$4 sm:$0xff]   ;;  %v7268_v51 = vld [vmem:[%s9895_s1 + $0x908] ss:$12 sps:$4 sm:$0xff]  }
 0x119   :  { %4389 = vmatprep.subr.bf16.mxu0 %v7193_v50  ;;  %v7264_v50 = vld [vmem:[%s9895_s1 + $0xae0] ss:$12 sps:$4 sm:$0xff]  }
 0x11b   :  { %6513 = vmatpush3.bf16.msra.mxu1 %v7195_v54  ;;  %v7269_v54 = vld [vmem:[%s9895_s1 + $0xaf8] ss:$12 sps:$4 sm:$0xff]  }
 0x11c   :  { %4390 = vmatpush1.bf16.msra.mxu0 %v7191_v53  ;;  %6514 = vmatprep.subr.bf16.mxu1 %v7199_v56  ;;  %v7272_v53 = vld [vmem:[%s9895_s1 + $0x9e0] ss:$12 sps:$4 sm:$0xff]  }
 0x11d   :  { %4391 = vmatprep.subr.bf16.mxu0 %v7198_v55  ;;  %v7273_v55 = vld [vmem:[%s9895_s1 + $0x920] ss:$12 sps:$4 sm:$0xff]  }
 0x11e   :  { %v7276_v56 = vld [vmem:[%s9895_s1 + $0xb14] ss:$12 sps:$4 sm:$0xff]  }
 0x11f   :  { %6515 = vmatpush3.bf16.msra.mxu1 %v7200_v58  ;;  %v7278_v58 = vld [vmem:[%s9895_s1 + $0x938] ss:$12 sps:$4 sm:$0xff]  }
 0x120   :  { %4392 = vmatpush1.bf16.msra.mxu0 %v7196_v57  ;;  %6516 = vmatprep.subr.bf16.mxu1 %v7204_v60  ;;  %v7277_v57 = vld [vmem:[%s9895_s1 + $0x9f8] ss:$12 sps:$4 sm:$0xff]  }
 0x121   :  { %4393 = vmatprep.subr.bf16.mxu0 %v7203_v59 }
 0x123   :  { %6517 = vmatpush3.bf16.msra.mxu1 %v7205_v62 }
 0x124   :  { %4394 = vmatpush1.bf16.msra.mxu0 %v7201_v61  ;;  %6518 = vmatprep.subr.bf16.mxu1 %v7209_v0  ;;  %v7281_v61 = vld [vmem:[%s9895_s1 + $0xb2c] ss:$12 sps:$4 sm:$0xff]  }
 0x125   :  { %4395 = vmatprep.subr.bf16.mxu0 %v7208_v63  ;;  %v7282_v63 = vld [vmem:[%s9895_s1 + $0xa10] ss:$12 sps:$4 sm:$0xff]  }
 0x127   :  { %6519 = vmatpush3.bf16.msra.mxu1 %v7210_v2  ;;  %v7286_v2 = vld [vmem:[%s9895_s1 + $0xb44] ss:$12 sps:$4 sm:$0xff]  }
 0x128   :  { %4396 = vmatpush1.bf16.msra.mxu0 %v7206_v1  ;;  %6520 = vmatprep.subr.bf16.mxu1 %v7214_v5  ;;  %v7283_v1 = vld [vmem:[%s9895_s1 + $0x950] ss:$12 sps:$4 sm:$0xff]   ;;  %v7284_v5 = vld [vmem:[%s9895_s1 + $0xb40] ss:$12 sps:$4 sm:$0xff]  }
 0x129   :  { %4397 = vmatprep.subr.bf16.mxu0 %v7213_v3  ;;  %v7287_v3 = vld [vmem:[%s9895_s1 + $0xa28] ss:$12 sps:$4 sm:$0xff]  }
 0x12b   :  { %6521 = vmatpush3.bf16.msra.mxu1 %v7215_v7  ;;  %v7291_v7 = vld [vmem:[%s9895_s1 + $0xb5c] ss:$12 sps:$4 sm:$0xff]  }
 0x12c   :  { %4398 = vmatpush1.bf16.msra.mxu0 %v7211_v6  ;;  %6522 = vmatprep.subr.bf16.mxu1 %v7219_v8  ;;  %v7288_v6 = vld [vmem:[%s9895_s1 + $0x968] ss:$12 sps:$4 sm:$0xff]   ;;  %v7289_v8 = vld [vmem:[%s9895_s1 + $0xb58] ss:$12 sps:$4 sm:$0xff]  }
 0x12d   :  { %4399 = vmatprep.subr.bf16.mxu0 %v7218_v4  ;;  %v7292_v4 = vld [vmem:[%s9895_s1 + $0xa40] ss:$12 sps:$4 sm:$0xff]  }
 0x12f   :  { %6523 = vmatpush3.bf16.msra.mxu1 %v7220_v11  ;;  %v7296_v11 = vld [vmem:[%s9895_s1 + $0xb74] ss:$12 sps:$4 sm:$0xff]  }
 0x130   :  { %4400 = vmatpush1.bf16.msra.mxu0 %v7216_v10  ;;  %6530 = vmatprep.subr.bf16.mxu1 %v7224_v12  ;;  %v7293_v10 = vld [vmem:[%s9895_s1 + $0x980] ss:$12 sps:$4 sm:$0xff]   ;;  %v7294_v12 = vld [vmem:[%s9895_s1 + $0xb70] ss:$12 sps:$4 sm:$0xff]  }
 0x131   :  { %4401 = vmatprep.subr.bf16.mxu0 %v7223_v34  ;;  %v7297_v34 = vld [vmem:[%s9895_s1 + $0xa58] ss:$12 sps:$4 sm:$0xff]  }
 0x132   :  { %4875 = vmatmul.mubr.bf16.vlgmr.msra.gmra.mrb[24].mxu1 %v8363_v16  ;;  %v7234_v16 = vld [vmem:[%s9895_s1 + $0x878] ss:$12 sps:$4 sm:$0xff]  }
 0x133   :  { %6531 = vmatpush3.bf16.msra.mxu1 %v7225_v14  ;;  %4915 = vmatprep.mubr.bf16.mxu1 %v8393_v26  ;;  %v7239_v26 = vld [vmem:[%s9895_s1 + $0x890] ss:$12 sps:$4 sm:$0xff]   ;;  %v7298_v14 = vld [vmem:[%s9895_s1 + $0x998] ss:$12 sps:$4 sm:$0xff]  }
 0x134   :  { %4402 = vmatpush1.bf16.msra.mxu0 %v7221_v13  ;;  %6532 = vmatprep.subr.bf16.mxu1 %v7229_v17  ;;  %v7302_v17 = vld [vmem:[%s9895_s1 + $0xa70] ss:$12 sps:$4 sm:$0xff]  }
 0x135   :  { %4403 = vmatprep.subr.bf16.mxu0 %v7228_v15  ;;  %v7301_v15 = vld [vmem:[%s9895_s1 + $0xb8c] ss:$12 sps:$4 sm:$0xff]  }
 0x137   :  { %6533 = vmatpush3.bf16.msra.mxu1 %v7230_v19  ;;  %v7299_v19 = vld [vmem:[%s9895_s1 + $0xb88] ss:$12 sps:$4 sm:$0xff]  }
 0x138   :  { %4404 = vmatpush1.bf16.msra.mxu0 %v7226_v18  ;;  %6534 = vmatprep.subr.bf16.mxu1 %v7234_v16 }
 0x139   :  { %4405 = vmatprep.subr.bf16.mxu0 %v7233_v21  ;;  %v7303_v21 = vld [vmem:[%s9895_s1 + $0x9b0] ss:$12 sps:$4 sm:$0xff]  }
 0x13b   :  { %6535 = vmatpush3.bf16.msra.mxu1 %v7235_v23  ;;  %v7307_v23 = vld [vmem:[%s9895_s1 + $0xb48] ss:$12 sps:$4 sm:$0xff]  }
 0x13c   :  { %4406 = vmatpush1.bf16.msra.mxu0 %v7231_v22  ;;  %6536 = vmatprep.subr.bf16.mxu1 %v7239_v26  ;;  %v7306_v22 = vld [vmem:[%s9895_s1 + $0xba4] ss:$12 sps:$4 sm:$0xff]  }
 0x13d   :  { %4407 = vmatprep.subr.bf16.mxu0 %v7238_v25  ;;  %v7304_v25 = vld [vmem:[%s9895_s1 + $0xba0] ss:$12 sps:$4 sm:$0xff]  }
 0x13f   :  { %6537 = vmatpush3.bf16.msra.mxu1 %v7240_v28  ;;  %v7311_v28 = vld [vmem:[%s9895_s1 + $0xbbc] ss:$12 sps:$4 sm:$0xff]  }
 0x140   :  { %4408 = vmatpush1.bf16.msra.mxu0 %v7236_v27  ;;  %6538 = vmatprep.subr.bf16.mxu1 %v7247_v32  ;;  %v7308_v27 = vld [vmem:[%s9895_s1 + $0xa88] ss:$12 sps:$4 sm:$0xff]   ;;  %v7309_v32 = vld [vmem:[%s9895_s1 + $0xbb8] ss:$12 sps:$4 sm:$0xff]  }
 0x141   :  { %4420 = vmatprep.subr.bf16.mxu0 %v7246_v29  ;;  %v7312_v29 = vld [vmem:[%s9895_s1 + $0xb60] ss:$12 sps:$4 sm:$0xff]  }
 0x143   :  { %4410 = vmatmul.mubr.bf16.vlgmr.msra.gmra.mrb[0].mxu0 %v8786_v31  ;;  %6539 = vmatpush3.bf16.msra.mxu1 %v7248_v35  ;;  %v7316_v35 = vld [vmem:[%s9895_s1 + $0xbd4] ss:$12 sps:$4 sm:$0xff]  }
 0x144   :  { %4421 = vmatpush1.bf16.msra.mxu0 %v7244_v33  ;;  %6540 = vmatprep.subr.bf16.mxu1 %v7252_v37  ;;  %v7313_v33 = vld [vmem:[%s9895_s1 + $0xaa0] ss:$12 sps:$4 sm:$0xff]   ;;  %v7318_v37 = vld [vmem:[%s9895_s1 + $0xab8] ss:$12 sps:$4 sm:$0xff]  }
 0x145   :  { %4422 = vmatprep.subr.bf16.mxu0 %v7251_v36  ;;  %4452 = vmatprep.mubr.bf16.mxu0 %v8806_v38  ;;  %v7314_v36 = vld [vmem:[%s9895_s1 + $0xbd0] ss:$12 sps:$4 sm:$0xff]  }
 0x147   :  { %6541 = vmatpush3.bf16.msra.mxu1 %v7253_v40  ;;  %v7322_v40 = vld [vmem:[%s9895_s1 + $0xb90] ss:$12 sps:$4 sm:$0xff]  }
 0x148   :  { %4423 = vmatpush1.bf16.msra.mxu0 %v7249_v39  ;;  %6542 = vmatprep.subr.bf16.mxu1 %v7257_v42  ;;  %v7321_v39 = vld [vmem:[%s9895_s1 + $0xbec] ss:$12 sps:$4 sm:$0xff]  }
 0x149   :  { %4424 = vmatprep.subr.bf16.mxu0 %v7256_v41  ;;  %v7323_v41 = vld [vmem:[%s9895_s1 + $0xad0] ss:$12 sps:$4 sm:$0xff]  }
 0x14a   :  { %v7324_v42 = vld [vmem:[%s9896_s0 + $0x38] ss:$100 sps:$4 sm:$0xff]  }
 0x14b   :  { %6543 = vmatpush3.bf16.msra.mxu1 %v7258_v48  ;;  %v7330_v48 = vld [vmem:[%s9895_s1 + $0xba8] ss:$12 sps:$4 sm:$0xff]  }
 0x14c   :  { %4425 = vmatpush1.bf16.msra.mxu0 %v7254_v9  ;;  %6544 = vmatprep.subr.bf16.mxu1 %v7262_v44  ;;  %v7329_v9 = vld [vmem:[%s9895_s1 + $0xc04] ss:$12 sps:$4 sm:$0xff]   ;;  %v7331_v44 = vld [vmem:[%s9895_s1 + $0xae8] ss:$12 sps:$4 sm:$0xff]  }
 0x14d   :  { %4426 = vmatprep.subr.bf16.mxu0 %v7261_v43  ;;  %v7327_v43 = vld [vmem:[%s9895_s1 + $0xc00] ss:$12 sps:$4 sm:$0xff]  }
 0x14f   :  { %6545 = vmatpush3.bf16.msra.mxu1 %v7263_v46  ;;  %v7335_v46 = vld [vmem:[%s9895_s1 + $0xbc0] ss:$12 sps:$4 sm:$0xff]  }
 0x150   :  { %4427 = vmatpush1.bf16.msra.mxu0 %v7259_v45  ;;  %6552 = vmatprep.subr.bf16.mxu1 %v7267_v49  ;;  %v7334_v45 = vld [vmem:[%s9895_s1 + $0xc1c] ss:$12 sps:$4 sm:$0xff]   ;;  %v7336_v49 = vld [vmem:[%s9895_s1 + $0xb00] ss:$12 sps:$4 sm:$0xff]  }
 0x151   :  { %4428 = vmatprep.subr.bf16.mxu0 %v7266_v47  ;;  %v7332_v47 = vld [vmem:[%s9895_s1 + $0xc18] ss:$12 sps:$4 sm:$0xff]  }
 0x152   :  { %4916 = vmatmul.mubr.bf16.vlgmr.msra.gmra.mrb[28].mxu1 %v8577_v24  ;;  %v7274_v24 = vld [vmem:[%s9895_s1 + $0xb10] ss:$12 sps:$4 sm:$0xff]  }
 0x153   :  { %6553 = vmatpush3.bf16.msra.mxu1 %v7268_v51  ;;  %4956 = vmatprep.mubr.bf16.mxu1 %v8594_v30  ;;  %v7279_v30 = vld [vmem:[%s9895_s1 + $0xb28] ss:$12 sps:$4 sm:$0xff]  }
 0x154   :  { %4429 = vmatpush1.bf16.msra.mxu0 %v7264_v50  ;;  %6554 = vmatprep.subr.bf16.mxu1 %v7272_v53  ;;  %v7339_v50 = vld [vmem:[%s9895_s1 + $0xc34] ss:$12 sps:$4 sm:$0xff]   ;;  %v7389_v51 = vld [vmem:[%s9896_s0 + $0x44] ss:$100 sps:$4 sm:$0xff]  }
 0x155   :  { %4430 = vmatprep.subr.bf16.mxu0 %v7271_v52  ;;  %v8878_v59 = vpop.f32.mrb[0].mxu1  ;;  %v7340_v52 = vld [vmem:[%s9895_s1 + $0xbd8] ss:$12 sps:$4 sm:$0xff]  }
 0x156   :  { %v8880_v60 = vpop.f32.mrb[1].mxu1 }
 0x157   :  { %6555 = vmatpush3.bf16.msra.mxu1 %v7273_v55  ;;  %v8885_v62 = vpop.f32.mrb[2].mxu1  ;;  %v7341_v55 = vld [vmem:[%s9895_s1 + $0xb18] ss:$12 sps:$4 sm:$0xff]  }
 0x158   :  { %4431 = vmatpush1.bf16.msra.mxu0 %v7269_v54  ;;  %6556 = vmatprep.subr.bf16.mxu1 %v7277_v57  ;;  %v8890_v0 = vpop.f32.mrb[3].mxu1  ;;  %v7337_v54 = vld [vmem:[%s9895_s1 + $0xc30] ss:$12 sps:$4 sm:$0xff]   ;;  %v7344_v57 = vld [vmem:[%s9895_s1 + $0xc4c] ss:$12 sps:$4 sm:$0xff]  }
 0x159   :  { %4432 = vmatprep.subr.bf16.mxu0 %v7276_v56 }
 0x15b   :  { %6557 = vmatpush3.bf16.msra.mxu1 %v7278_v58  ;;  %v7345_v58 = vld [vmem:[%s9895_s1 + $0xbf0] ss:$12 sps:$4 sm:$0xff]  }
 0x15c   :  { %4433 = vmatpush1.bf16.msra.mxu0 %v7274_v24  ;;  %6558 = vmatprep.subr.bf16.mxu1 %v7282_v63 }
 0x15d   :  { %4434 = vmatprep.subr.bf16.mxu0 %v7281_v61  ;;  %v7342_v61 = vld [vmem:[%s9895_s1 + $0xc48] ss:$12 sps:$4 sm:$0xff]  }
 0x15f   :  { %6559 = vmatpush3.bf16.msra.mxu1 %v7283_v1  ;;  %v7349_v1 = vld [vmem:[%s9895_s1 + $0xc64] ss:$12 sps:$4 sm:$0xff]  }
 0x160   :  { %4435 = vmatpush1.bf16.msra.mxu0 %v7279_v30  ;;  %6560 = vmatprep.subr.bf16.mxu1 %v7287_v3  ;;  %v7346_v30 = vld [vmem:[%s9895_s1 + $0xb30] ss:$12 sps:$4 sm:$0xff]  }
 0x161   :  { %4436 = vmatprep.subr.bf16.mxu0 %v7286_v2  ;;  %v7350_v2 = vld [vmem:[%s9895_s1 + $0xcc8] ss:$12 sps:$4 sm:$0xff]  }
 0x163   :  { %6561 = vmatpush3.bf16.msra.mxu1 %v7288_v6  ;;  %v7347_v6 = vld [vmem:[%s9895_s1 + $0xc60] ss:$12 sps:$4 sm:$0xff]  }
 0x164   :  { %4437 = vmatpush1.bf16.msra.mxu0 %v7284_v5  ;;  %6562 = vmatprep.subr.bf16.mxu1 %v7292_v4  ;;  %v7354_v4 = vld [vmem:[%s9895_s1 + $0xc7c] ss:$12 sps:$4 sm:$0xff]  }
 0x165   :  { %4438 = vmatprep.subr.bf16.mxu0 %v7291_v7  ;;  %v8931_v13 = vpop.f32.mrb[4].mxu1  ;;  %v7351_v7 = vld [vmem:[%s9895_s1 + $0xc08] ss:$12 sps:$4 sm:$0xff]  }
 0x166   :  { %v8942_v18 = vpop.f32.mrb[5].mxu1 }
 0x167   :  { %6563 = vmatpush3.bf16.msra.mxu1 %v7293_v10  ;;  %v8950_v16 = vpop.f32.mrb[6].mxu1  ;;  %v7352_v10 = vld [vmem:[%s9895_s1 + $0xc78] ss:$12 sps:$4 sm:$0xff]  }
 0x168   :  { %4439 = vmatpush1.bf16.msra.mxu0 %v7289_v8  ;;  %6564 = vmatprep.subr.bf16.mxu1 %v7297_v34  ;;  %v8961_v26 = vpop.f32.mrb[7].mxu1  ;;  %v7355_v8 = vld [vmem:[%s9895_s1 + $0xce0] ss:$12 sps:$4 sm:$0xff]  }
 0x169   :  { %4440 = vmatprep.subr.bf16.mxu0 %v7296_v11  ;;  %v7356_v11 = vld [vmem:[%s9895_s1 + $0xc20] ss:$12 sps:$4 sm:$0xff]  }
 0x16a   :  { %v7359_v34 = vld [vmem:[%s9895_s1 + $0xc94] ss:$12 sps:$4 sm:$0xff]  }
 0x16b   :  { %6565 = vmatpush3.bf16.msra.mxu1 %v7298_v14  ;;  %v7357_v14 = vld [vmem:[%s9895_s1 + $0xc90] ss:$12 sps:$4 sm:$0xff]  }
 0x16c   :  { %4441 = vmatpush1.bf16.msra.mxu0 %v7294_v12  ;;  %6566 = vmatprep.subr.bf16.mxu1 %v7302_v17  ;;  %v7360_v12 = vld [vmem:[%s9895_s1 + $0xcf8] ss:$12 sps:$4 sm:$0xff]  }
 0x16d   :  { %4442 = vmatprep.subr.bf16.mxu0 %v7301_v15  ;;  %v839_v15 = vlaneseq  ;;  %v7361_v17 = vld [vmem:[%s9895_s1 + $0xc38] ss:$12 sps:$4 sm:$0xff]  }
 0x16f   :  { %6567 = vmatpush3.bf16.msra.mxu1 %v7303_v21  ;;  %v7365_v21 = vld [vmem:[%s9895_s1 + $0xd10] ss:$12 sps:$4 sm:$0xff]  }
 0x170   :  { %4443 = vmatpush1.bf16.msra.mxu0 %v7299_v19  ;;  %6574 = vmatprep.subr.bf16.mxu1 %v7307_v23  ;;  %v7364_v19 = vld [vmem:[%s9895_s1 + $0xcac] ss:$12 sps:$4 sm:$0xff]   ;;  %v7366_v23 = vld [vmem:[%s9895_s1 + $0xc50] ss:$12 sps:$4 sm:$0xff]  }
 0x171   :  { %4444 = vmatprep.subr.bf16.mxu0 %v7306_v22  ;;  %v7362_v22 = vld [vmem:[%s9895_s1 + $0xca8] ss:$12 sps:$4 sm:$0xff]  }
 0x172   :  { %4957 = vmatmul.mubr.bf16.vlgmr.msra.gmra.mrb[32].mxu1 %v8786_v31  ;;  %v7317_v31 = vld [vmem:[%s9895_s1 + $0xb78] ss:$12 sps:$4 sm:$0xff]  }
 0x173   :  { %6575 = vmatpush3.bf16.msra.mxu1 %v7308_v27  ;;  %4997 = vmatprep.mubr.bf16.mxu1 %v8806_v38  ;;  %v7319_v38 = vld [vmem:[%s9895_s1 + $0xbe8] ss:$12 sps:$4 sm:$0xff]   ;;  %v7369_v27 = vld [vmem:[%s9895_s1 + $0xcc4] ss:$12 sps:$4 sm:$0xff]  }
 0x174   :  { %4445 = vmatpush1.bf16.msra.mxu0 %v7304_v25  ;;  %6576 = vmatprep.subr.bf16.mxu1 %v7312_v29  ;;  %v9111_v25 = vshrl.u32 %v839_v15, 7 }
 0x175   :  { %4446 = vmatprep.subr.bf16.mxu0 %v7311_v28  ;;  %v7370_v28 = vld [vmem:[%s9895_s1 + $0xd28] ss:$12 sps:$4 sm:$0xff]  }
 0x176   :  { %v849_v29 = vsub.s32 2, %v9111_v25 }
 0x177   :  { %6577 = vmatpush3.bf16.msra.mxu1 %v7313_v33  ;;  %v7367_v33 = vld [vmem:[%s9895_s1 + $0xcc0] ss:$12 sps:$4 sm:$0xff]  }
 0x178   :  { %4447 = vmatpush1.bf16.msra.mxu0 %v7309_v32  ;;  %6578 = vmatprep.subr.bf16.mxu1 %v7317_v31  ;;  %v837_v32 = vld [vmem:[%s9897_s2] sm:$0x7]  ;;  %v7374_v31 = vld [vmem:[%s9895_s1 + $0xcdc] ss:$12 sps:$4 sm:$0xff]  }
 0x179   :  { %4448 = vmatprep.subr.bf16.mxu0 %v7316_v35  ;;  %v7371_v35 = vld [vmem:[%s9895_s1 + $0xc68] ss:$12 sps:$4 sm:$0xff]  }
 0x17b   :  { %6579 = vmatpush3.bf16.msra.mxu1 %v7318_v37  ;;  %v850_v37 = vrot.slane %v837_v32, %v849_v29  ;;  %v7422_v29 = vld [vmem:[%s9895_s1 + $0xdb4] ss:$12 sps:$4 sm:$0xff]   ;;  %v7423_v32 = vld [vmem:[%s9895_s1 + $0xed8] ss:$12 sps:$4 sm:$0xff]  }
 0x17c   :  { %4449 = vmatpush1.bf16.msra.mxu0 %v7314_v36  ;;  %6580 = vmatprep.subr.bf16.mxu1 %v7322_v40  ;;  %v7375_v36 = vld [vmem:[%s9895_s1 + $0xd40] ss:$12 sps:$4 sm:$0xff]  }
 0x17d   :  { %4450 = vmatprep.subr.bf16.mxu0 %v7321_v39  ;;  %v7372_v39 = vld [vmem:[%s9895_s1 + $0xcd8] ss:$12 sps:$4 sm:$0xff]   ;;  %v7376_v40 = vld [vmem:[%s9895_s1 + $0xc80] ss:$12 sps:$4 sm:$0xff]  }
 0x17f   :  { %6581 = vmatpush3.bf16.msra.mxu1 %v7323_v41  ;;  %v7380_v41 = vld [vmem:[%s9895_s1 + $0xd58] ss:$12 sps:$4 sm:$0xff]  }
 0x180   :  { %4451 = vmatpush1.bf16.msra.mxu0 %v7319_v38  ;;  %6582 = vmatprep.subr.bf16.mxu1 %v7330_v48  ;;  %v7379_v38 = vld [vmem:[%s9895_s1 + $0xcf4] ss:$12 sps:$4 sm:$0xff]  }
 0x181   :  { %4463 = vmatprep.subr.bf16.mxu0 %v7329_v9  ;;  %v7381_v9 = vld [vmem:[%s9895_s1 + $0xc98] ss:$12 sps:$4 sm:$0xff]  }
 0x183   :  { %4453 = vmatmul.mubr.bf16.vlgmr.msra.gmra.mrb[0].mxu0 %v7324_v42  ;;  %6583 = vmatpush3.bf16.msra.mxu1 %v7331_v44  ;;  %v7384_v44 = vld [vmem:[%s9895_s1 + $0xd0c] ss:$12 sps:$4 sm:$0xff]  }
 0x184   :  { %4464 = vmatpush1.bf16.msra.mxu0 %v7327_v43  ;;  %6584 = vmatprep.subr.bf16.mxu1 %v7335_v46  ;;  %v7385_v46 = vld [vmem:[%s9895_s1 + $0xd70] ss:$12 sps:$4 sm:$0xff]  }
 0x185   :  { %4465 = vmatprep.subr.bf16.mxu0 %v7334_v45  ;;  %4495 = vmatprep.mubr.bf16.mxu0 %v7389_v51  ;;  %v6436_v53 = vpop.f32.mrb[8].mxu1 }
 0x186   :  { %v6437_v56 = vpop.f32.mrb[9].mxu1 }
 0x187   :  { %6585 = vmatpush3.bf16.msra.mxu1 %v7336_v49  ;;  %v9049_v24 = vadd.f32 %v6437_v56, %v6436_v53  ;;  %v6439_v63 = vpop.f32.mrb[10].mxu1 }
 0x188   :  { %4466 = vmatpush1.bf16.msra.mxu0 %v7332_v47  ;;  %6586 = vmatprep.subr.bf16.mxu1 %v7340_v52  ;;  %v6440_v3 = vpop.f32.mrb[11].mxu1 }
 0x189   :  { %4467 = vmatprep.subr.bf16.mxu0 %v7339_v50  ;;  %v9066_v5 = vadd.f32 %v6440_v3, %v6439_v63  ;;  %v4713_v48 = vadd.f32 %v9049_v24, %v850_v37  ;;  %v7392_v24 = vld [vmem:[%s9895_s1 + $0xd24] ss:$12 sps:$4 sm:$0xff]   ;;  %v7394_v63 = vld [vmem:[%s9895_s1 + $0xd88] ss:$12 sps:$4 sm:$0xff]  }
 0x18a   :  { %v7395_v3 = vld [vmem:[%s9895_s1 + $0xd38] ss:$12 sps:$4 sm:$0xff]  }
 0x18b   :  { %6587 = vmatpush3.bf16.msra.mxu1 %v7341_v55  ;;  %v4716_v47 = vadd.f32 %v9066_v5, %v850_v37  ;;  %v7386_v55 = vld [vmem:[%s9895_s1 + $0xcb0] ss:$12 sps:$4 sm:$0xff]   ;;  %v7399_v5 = vld [vmem:[%s9895_s1 + $0xda0] ss:$12 sps:$4 sm:$0xff]  }
 0x18c   :  { %4468 = vmatpush1.bf16.msra.mxu0 %v7337_v54  ;;  %6588 = vmatprep.subr.bf16.mxu1 %v7345_v58  ;;  %v7382_v54 = vld [vmem:[%s9895_s1 + $0xd08] ss:$12 sps:$4 sm:$0xff]  }
 0x18d   :  { %4469 = vmatprep.subr.bf16.mxu0 %v7344_v57  ;;  %v7387_v57 = vld [vmem:[%s9896_s0 + $0x40] ss:$100 sps:$4 sm:$0xff]   ;;  %v7393_v58 = vld [vmem:[%s9895_s1 + $0xe48] ss:$12 sps:$4 sm:$0xff]  }
 0x18f   :  { %6589 = vmatpush3.bf16.msra.mxu1 %v7346_v30  ;;  %v7397_v30 = vld [vmem:[%s9895_s1 + $0xd3c] ss:$12 sps:$4 sm:$0xff]  }
 0x190   :  { %4470 = vmatpush1.bf16.msra.mxu0 %v7342_v61  ;;  %6596 = vmatprep.subr.bf16.mxu1 %v7350_v2  ;;  %v7390_v61 = vld [vmem:[%s9895_s1 + $0xd20] ss:$12 sps:$4 sm:$0xff]  }
 0x191   :  { %4471 = vmatprep.subr.bf16.mxu0 %v7349_v1  ;;  %v7398_v1 = vld [vmem:[%s9895_s1 + $0xe60] ss:$12 sps:$4 sm:$0xff]  }
 0x192   :  { %4998 = vmatmul.mubr.bf16.vlgmr.msra.gmra.mrb[36].mxu1 %v7324_v42  ;;  %v7377_v42 = vld [vmem:[%s9895_s1 + $0xcf0] ss:$12 sps:$4 sm:$0xff]  }
 0x193   :  { %6597 = vmatpush3.bf16.msra.mxu1 %v7351_v7  ;;  %5038 = vmatprep.mubr.bf16.mxu1 %v7389_v51  ;;  %v7432_v2 = vld [vmem:[%s9896_s0 + $0x4c] ss:$100 sps:$4 sm:$0xff]   ;;  %v7403_v7 = vld [vmem:[%s9895_s1 + $0xe78] ss:$12 sps:$4 sm:$0xff]  }
 0x194   :  { %4472 = vmatpush1.bf16.msra.mxu0 %v7347_v6  ;;  %6598 = vmatprep.subr.bf16.mxu1 %v7355_v8  ;;  %v7402_v6 = vld [vmem:[%s9895_s1 + $0xd54] ss:$12 sps:$4 sm:$0xff]   ;;  %v7404_v8 = vld [vmem:[%s9895_s1 + $0xdb8] ss:$12 sps:$4 sm:$0xff]  }
 0x195   :  { %4473 = vmatprep.subr.bf16.mxu0 %v7354_v4  ;;  %v7400_v4 = vld [vmem:[%s9895_s1 + $0xd50] ss:$12 sps:$4 sm:$0xff]  }
 0x197   :  { %6599 = vmatpush3.bf16.msra.mxu1 %v7356_v11  ;;  %v7408_v11 = vld [vmem:[%s9895_s1 + $0xe90] ss:$12 sps:$4 sm:$0xff]  }
 0x198   :  { %4474 = vmatpush1.bf16.msra.mxu0 %v7352_v10  ;;  %6600 = vmatprep.subr.bf16.mxu1 %v7360_v12  ;;  %v7407_v10 = vld [vmem:[%s9895_s1 + $0xd6c] ss:$12 sps:$4 sm:$0xff]   ;;  %v7409_v12 = vld [vmem:[%s9895_s1 + $0xdd0] ss:$12 sps:$4 sm:$0xff]  }
 0x199   :  { %4475 = vmatprep.subr.bf16.mxu0 %v7359_v34  ;;  %v7405_v34 = vld [vmem:[%s9895_s1 + $0xd68] ss:$12 sps:$4 sm:$0xff]  }
 0x19b   :  { %6601 = vmatpush3.bf16.msra.mxu1 %v7361_v17  ;;  %v7413_v17 = vld [vmem:[%s9895_s1 + $0xea8] ss:$12 sps:$4 sm:$0xff]  }
 0x19c   :  { %4476 = vmatpush1.bf16.msra.mxu0 %v7357_v14  ;;  %6602 = vmatprep.subr.bf16.mxu1 %v7365_v21  ;;  %v7412_v14 = vld [vmem:[%s9895_s1 + $0xd84] ss:$12 sps:$4 sm:$0xff]   ;;  %v7414_v21 = vld [vmem:[%s9895_s1 + $0xde8] ss:$12 sps:$4 sm:$0xff]  }
 0x19d   :  { %4477 = vmatprep.subr.bf16.mxu0 %v7364_v19  ;;  %v7410_v19 = vld [vmem:[%s9895_s1 + $0xd80] ss:$12 sps:$4 sm:$0xff]  }
 0x19f   :  { %6603 = vmatpush3.bf16.msra.mxu1 %v7366_v23  ;;  %v7418_v23 = vld [vmem:[%s9895_s1 + $0xec0] ss:$12 sps:$4 sm:$0xff]  }
 0x1a0   :  { %4478 = vmatpush1.bf16.msra.mxu0 %v7362_v22  ;;  %6604 = vmatprep.subr.bf16.mxu1 %v7370_v28  ;;  %v7417_v22 = vld [vmem:[%s9895_s1 + $0xd9c] ss:$12 sps:$4 sm:$0xff]   ;;  %v7419_v28 = vld [vmem:[%s9895_s1 + $0xe00] ss:$12 sps:$4 sm:$0xff]  }
 0x1a1   :  { %4479 = vmatprep.subr.bf16.mxu0 %v7369_v27  ;;  %v7415_v27 = vld [vmem:[%s9895_s1 + $0xd98] ss:$12 sps:$4 sm:$0xff]  }
 0x1a3   :  { %6605 = vmatpush3.bf16.msra.mxu1 %v7371_v35 }
 0x1a4   :  { %4480 = vmatpush1.bf16.msra.mxu0 %v7367_v33  ;;  %6606 = vmatprep.subr.bf16.mxu1 %v7375_v36  ;;  %v7420_v33 = vld [vmem:[%s9895_s1 + $0xdb0] ss:$12 sps:$4 sm:$0xff]   ;;  %v7427_v36 = vld [vmem:[%s9895_s1 + $0xdcc] ss:$12 sps:$4 sm:$0xff]  }
 0x1a5   :  { %4481 = vmatprep.subr.bf16.mxu0 %v7374_v31  ;;  %v6458_v43 = vpop.f32.mrb[12].mxu1  ;;  %v7424_v31 = vld [vmem:[%s9895_s1 + $0xe18] ss:$12 sps:$4 sm:$0xff]  }
 0x1a6   :  { %v6459_v45 = vpop.f32.mrb[13].mxu1 }
 0x1a7   :  { %6607 = vmatpush3.bf16.msra.mxu1 %v7376_v40  ;;  %v6460_v49 = vadd.f32 %v6459_v45, %v6458_v43  ;;  %v6461_v50 = vpop.f32.mrb[14].mxu1  ;;  %v7436_v45 = vld [vmem:[%s9895_s1 + $0xfc8] ss:$12 sps:$4 sm:$0xff]  }
 0x1a8   :  { %4482 = vmatpush1.bf16.msra.mxu0 %v7372_v39  ;;  %6608 = vmatprep.subr.bf16.mxu1 %v7380_v41  ;;  %v6462_v51 = vpop.f32.mrb[15].mxu1 }
 0x1a9   :  { %4483 = vmatprep.subr.bf16.mxu0 %v7379_v38  ;;  %v9161_v52 = vadd.f32 %v6460_v49, %v4713_v48  ;;  %v6463_v53 = vadd.f32 %v6462_v51, %v6461_v50  ;;  %v7428_v38 = vld [vmem:[%s9895_s1 + $0xef0] ss:$12 sps:$4 sm:$0xff]   ;;  %v7433_v49 = vld [vmem:[%s9895_s1 + $0xde0] ss:$12 sps:$4 sm:$0xff]   ;;  %v7437_v50 = vld [vmem:[%s9895_s1 + $0xf08] ss:$12 sps:$4 sm:$0xff]  }
 0x1aa   :  { %v7440_v51 = vld [vmem:[%s9895_s1 + $0xdfc] ss:$12 sps:$4 sm:$0xff]  }
 0x1ab   :  { %6609 = vmatpush3.bf16.msra.mxu1 %v7381_v9  ;;  %v9169_v56 = vadd.f32 %v6463_v53, %v4716_v47  ;;  %v7429_v9 = vld [vmem:[%s9895_s1 + $0xe30] ss:$12 sps:$4 sm:$0xff]   ;;  %v9288_v47 = vld [vmem:[%s9896_s0 + $0x48] ss:$100 sps:$4 sm:$0xff]   ;;  %v9305_v53 = vld [vmem:[%s9896_s0 + $0x54] ss:$100 sps:$4 sm:$0xff]  }
 0x1ac   :  { %4484 = vmatpush1.bf16.msra.mxu0 %v7377_v42  ;;  %6610 = vmatprep.subr.bf16.mxu1 %v7385_v46  ;;  %v7425_v42 = vld [vmem:[%s9895_s1 + $0xdc8] ss:$12 sps:$4 sm:$0xff]  }
 0x1ad   :  { %4485 = vmatprep.subr.bf16.mxu0 %v7384_v44  ;;  %v7435_v44 = vld [vmem:[%s9895_s1 + $0xde4] ss:$12 sps:$4 sm:$0xff]  }
 0x1af   :  { %6611 = vmatpush3.bf16.msra.mxu1 %v7386_v55  ;;  %v7442_v55 = vld [vmem:[%s9895_s1 + $0xf20] ss:$12 sps:$4 sm:$0xff]  }
 0x1b0   :  { %4486 = vmatpush1.bf16.msra.mxu0 %v7382_v54  ;;  %6618 = vmatprep.subr.bf16.mxu1 %v7393_v58  ;;  %v7438_v54 = vld [vmem:[%s9895_s1 + $0xdf8] ss:$12 sps:$4 sm:$0xff]  }
 0x1b1   :  { %4487 = vmatprep.subr.bf16.mxu0 %v7392_v24  ;;  %v7443_v24 = vld [vmem:[%s9895_s1 + $0xe10] ss:$12 sps:$4 sm:$0xff]   ;;  %v7447_v58 = vld [vmem:[%s9895_s1 + $0xf38] ss:$12 sps:$4 sm:$0xff]  }
 0x1b2   :  { %5039 = vmatmul.mubr.bf16.vlgmr.msra.gmra.mrb[40].mxu1 %v7387_v57 }
 0x1b3   :  { %6619 = vmatpush3.bf16.msra.mxu1 %v7394_v63  ;;  %5079 = vmatprep.mubr.bf16.mxu1 %v7432_v2  ;;  %v7451_v63 = vld [vmem:[%s9895_s1 + $0x1010] ss:$12 sps:$4 sm:$0xff]  }
 0x1b4   :  { %4488 = vmatpush1.bf16.msra.mxu0 %v7390_v61  ;;  %6620 = vmatprep.subr.bf16.mxu1 %v7398_v1  ;;  %v7450_v61 = vld [vmem:[%s9895_s1 + $0xe2c] ss:$12 sps:$4 sm:$0xff]   ;;  %v7452_v1 = vld [vmem:[%s9895_s1 + $0xf50] ss:$12 sps:$4 sm:$0xff]  }
 0x1b5   :  { %4489 = vmatprep.subr.bf16.mxu0 %v7397_v30  ;;  %v7448_v30 = vld [vmem:[%s9895_s1 + $0xe28] ss:$12 sps:$4 sm:$0xff]  }
 0x1b7   :  { %6621 = vmatpush3.bf16.msra.mxu1 %v7399_v5  ;;  %v7453_v5 = vld [vmem:[%s9895_s1 + $0xe40] ss:$12 sps:$4 sm:$0xff]  }
 0x1b8   :  { %4490 = vmatpush1.bf16.msra.mxu0 %v7395_v3  ;;  %6622 = vmatprep.subr.bf16.mxu1 %v7403_v7  ;;  %v7456_v3 = vld [vmem:[%s9895_s1 + $0x1028] ss:$12 sps:$4 sm:$0xff]  }
 0x1b9   :  { %4491 = vmatprep.subr.bf16.mxu0 %v7402_v6  ;;  %v7457_v6 = vld [vmem:[%s9895_s1 + $0xf68] ss:$12 sps:$4 sm:$0xff]  }
 0x1ba   :  { %v7460_v7 = vld [vmem:[%s9895_s1 + $0xe5c] ss:$12 sps:$4 sm:$0xff]  }
 0x1bb   :  { %6623 = vmatpush3.bf16.msra.mxu1 %v7404_v8  ;;  %v7458_v8 = vld [vmem:[%s9895_s1 + $0xe58] ss:$12 sps:$4 sm:$0xff]  }
 0x1bc   :  { %4492 = vmatpush1.bf16.msra.mxu0 %v7400_v4  ;;  %6624 = vmatprep.subr.bf16.mxu1 %v7408_v11  ;;  %v7461_v4 = vld [vmem:[%s9895_s1 + $0x1040] ss:$12 sps:$4 sm:$0xff]  }
 0x1bd   :  { %4493 = vmatprep.subr.bf16.mxu0 %v7407_v10  ;;  %v7462_v10 = vld [vmem:[%s9895_s1 + $0xf80] ss:$12 sps:$4 sm:$0xff]  }
 0x1be   :  { %v7465_v11 = vld [vmem:[%s9895_s1 + $0xe74] ss:$12 sps:$4 sm:$0xff]  }
 0x1bf   :  { %6625 = vmatpush3.bf16.msra.mxu1 %v7409_v12 }
 0x1c0   :  { %4494 = vmatpush1.bf16.msra.mxu0 %v7405_v34  ;;  %6626 = vmatprep.subr.bf16.mxu1 %v7413_v17  ;;  %v7466_v34 = vld [vmem:[%s9895_s1 + $0x1058] ss:$12 sps:$4 sm:$0xff]   ;;  %v7463_v17 = vld [vmem:[%s9895_s1 + $0xe70] ss:$12 sps:$4 sm:$0xff]  }
 0x1c1   :  { %4506 = vmatprep.subr.bf16.mxu0 %v7412_v14 }
 0x1c3   :  { %4496 = vmatmul.mubr.bf16.vlgmr.msra.gmra.mrb[0].mxu0 %v7387_v57  ;;  %6627 = vmatpush3.bf16.msra.mxu1 %v7414_v21  ;;  %v7446_v57 = vld [vmem:[%s9895_s1 + $0xff8] ss:$12 sps:$4 sm:$0xff]  }
 0x1c4   :  { %4507 = vmatpush1.bf16.msra.mxu0 %v7410_v19  ;;  %6628 = vmatprep.subr.bf16.mxu1 %v7418_v23  ;;  %v7467_v19 = vld [vmem:[%s9895_s1 + $0xf98] ss:$12 sps:$4 sm:$0xff]  }
 0x1c5   :  { %4508 = vmatprep.subr.bf16.mxu0 %v7417_v22  ;;  %v6480_v35 = vpop.f32.mrb[16].mxu1  ;;  %4538 = vmatprep.mubr.bf16.mxu0 %v7432_v2  ;;  %v7455_v2 = vld [vmem:[%s9895_s1 + $0xe44] ss:$12 sps:$4 sm:$0xff]   ;;  %v7470_v23 = vld [vmem:[%s9895_s1 + $0xe8c] ss:$12 sps:$4 sm:$0xff]  }
 0x1c6   :  { %v6481_v37 = vpop.f32.mrb[17].mxu1 }
 0x1c7   :  { %6629 = vmatpush3.bf16.msra.mxu1 %v7419_v28  ;;  %v6482_v39 = vadd.f32 %v6481_v37, %v6480_v35  ;;  %v6483_v40 = vpop.f32.mrb[18].mxu1  ;;  %v7472_v35 = vld [vmem:[%s9895_s1 + $0xfb0] ss:$12 sps:$4 sm:$0xff]   ;;  %v7479_v37 = vld [vmem:[%s9895_s1 + $0x1148] ss:$12 sps:$4 sm:$0xff]  }
 0x1c8   :  { %4509 = vmatpush1.bf16.msra.mxu0 %v7415_v27  ;;  %6630 = vmatprep.subr.bf16.mxu1 %v7423_v32  ;;  %v6484_v41 = vpop.f32.mrb[19].mxu1  ;;  %v7471_v27 = vld [vmem:[%s9895_s1 + $0x1070] ss:$12 sps:$4 sm:$0xff]  }
 0x1c9   :  { %4510 = vmatprep.subr.bf16.mxu0 %v7422_v29  ;;  %v9274_v48 = vadd.f32 %v6482_v39, %v9161_v52  ;;  %v6485_v43 = vadd.f32 %v6484_v41, %v6483_v40  ;;  %v7441_v52 = vld [vmem:[%s9895_s1 + $0xfe0] ss:$12 sps:$4 sm:$0xff]   ;;  %v9402_v39 = vld [vmem:[%s9896_s0 + $0x50] ss:$100 sps:$4 sm:$0xff]   ;;  %v7483_v41 = vld [vmem:[%s9895_s1 + $0xebc] ss:$12 sps:$4 sm:$0xff]  }
 0x1ca   :  { %v7476_v40 = vld [vmem:[%s9895_s1 + $0xea0] ss:$12 sps:$4 sm:$0xff]  }
 0x1cb   :  { %6631 = vmatpush3.bf16.msra.mxu1 %v7424_v31  ;;  %v9283_v46 = vadd.f32 %v6485_v43, %v9169_v56  ;;  %v7445_v56 = vld [vmem:[%s9895_s1 + $0xe14] ss:$12 sps:$4 sm:$0xff]  }
 0x1cc   :  { %4511 = vmatpush1.bf16.msra.mxu0 %v7420_v33  ;;  %6632 = vmatprep.subr.bf16.mxu1 %v7428_v38  ;;  %v7468_v33 = vld [vmem:[%s9895_s1 + $0xe88] ss:$12 sps:$4 sm:$0xff]   ;;  %v7485_v43 = vld [vmem:[%s9895_s1 + $0x10a0] ss:$12 sps:$4 sm:$0xff]  }
 0x1cd   :  { %4512 = vmatprep.subr.bf16.mxu0 %v7427_v36  ;;  %v7478_v36 = vld [vmem:[%s9895_s1 + $0xea4] ss:$12 sps:$4 sm:$0xff]   ;;  %v7480_v38 = vld [vmem:[%s9895_s1 + $0x1088] ss:$12 sps:$4 sm:$0xff]  }
 0x1cf   :  { %6633 = vmatpush3.bf16.msra.mxu1 %v7429_v9  ;;  %v9419_v9 = vld [vmem:[%s9896_s0 + $0x5c] ss:$100 sps:$4 sm:$0xff]  }
 0x1d0   :  { %4513 = vmatpush1.bf16.msra.mxu0 %v7425_v42  ;;  %6640 = vmatprep.subr.bf16.mxu1 %v7436_v45  ;;  %v7484_v42 = vld [vmem:[%s9895_s1 + $0x1160] ss:$12 sps:$4 sm:$0xff]   ;;  %v7489_v45 = vld [vmem:[%s9895_s1 + $0x1178] ss:$12 sps:$4 sm:$0xff]  }
 0x1d1   :  { %4514 = vmatprep.subr.bf16.mxu0 %v7435_v44  ;;  %v7488_v44 = vld [vmem:[%s9895_s1 + $0xed4] ss:$12 sps:$4 sm:$0xff]  }
 0x1d2   :  { %5080 = vmatmul.mubr.bf16.vlgmr.msra.gmra.mrb[44].mxu1 %v9288_v47 }
 0x1d3   :  { %6641 = vmatpush3.bf16.msra.mxu1 %v7437_v50  ;;  %5120 = vmatprep.mubr.bf16.mxu1 %v9305_v53  ;;  %v7493_v50 = vld [vmem:[%s9895_s1 + $0xeec] ss:$12 sps:$4 sm:$0xff]  }
 0x1d4   :  { %4515 = vmatpush1.bf16.msra.mxu0 %v7433_v49  ;;  %6642 = vmatprep.subr.bf16.mxu1 %v7441_v52  ;;  %v7490_v49 = vld [vmem:[%s9895_s1 + $0x10b8] ss:$12 sps:$4 sm:$0xff]   ;;  %v7491_v52 = vld [vmem:[%s9895_s1 + $0xee8] ss:$12 sps:$4 sm:$0xff]  }
 0x1d5   :  { %4516 = vmatprep.subr.bf16.mxu0 %v7440_v51  ;;  %v7494_v51 = vld [vmem:[%s9895_s1 + $0x1190] ss:$12 sps:$4 sm:$0xff]  }
 0x1d7   :  { %6643 = vmatpush3.bf16.msra.mxu1 %v7442_v55  ;;  %v7498_v55 = vld [vmem:[%s9895_s1 + $0xf04] ss:$12 sps:$4 sm:$0xff]  }
 0x1d8   :  { %4517 = vmatpush1.bf16.msra.mxu0 %v7438_v54  ;;  %6644 = vmatprep.subr.bf16.mxu1 %v7446_v57  ;;  %v7495_v54 = vld [vmem:[%s9895_s1 + $0x10d0] ss:$12 sps:$4 sm:$0xff]   ;;  %v7496_v57 = vld [vmem:[%s9895_s1 + $0xf00] ss:$12 sps:$4 sm:$0xff]  }
 0x1d9   :  { %4518 = vmatprep.subr.bf16.mxu0 %v7445_v56  ;;  %v7499_v56 = vld [vmem:[%s9895_s1 + $0x11a8] ss:$12 sps:$4 sm:$0xff]  }
 0x1db   :  { %6645 = vmatpush3.bf16.msra.mxu1 %v7447_v58  ;;  %v7503_v58 = vld [vmem:[%s9895_s1 + $0xf1c] ss:$12 sps:$4 sm:$0xff]  }
 0x1dc   :  { %4519 = vmatpush1.bf16.msra.mxu0 %v7443_v24  ;;  %6646 = vmatprep.subr.bf16.mxu1 %v7451_v63  ;;  %v7500_v24 = vld [vmem:[%s9895_s1 + $0x10e8] ss:$12 sps:$4 sm:$0xff]   ;;  %v7501_v63 = vld [vmem:[%s9895_s1 + $0xf18] ss:$12 sps:$4 sm:$0xff]  }
 0x1dd   :  { %4520 = vmatprep.subr.bf16.mxu0 %v7450_v61  ;;  %v7504_v61 = vld [vmem:[%s9895_s1 + $0x11c0] ss:$12 sps:$4 sm:$0xff]  }
 0x1df   :  { %6647 = vmatpush3.bf16.msra.mxu1 %v7452_v1  ;;  %v7508_v1 = vld [vmem:[%s9895_s1 + $0xf34] ss:$12 sps:$4 sm:$0xff]  }
 0x1e0   :  { %4521 = vmatpush1.bf16.msra.mxu0 %v7448_v30  ;;  %6648 = vmatprep.subr.bf16.mxu1 %v7456_v3  ;;  %v7505_v30 = vld [vmem:[%s9895_s1 + $0x1100] ss:$12 sps:$4 sm:$0xff]  }
 0x1e1   :  { %4522 = vmatprep.subr.bf16.mxu0 %v7455_v2 }
 0x1e3   :  { %6649 = vmatpush3.bf16.msra.mxu1 %v7457_v6 }
 0x1e4   :  { %4523 = vmatpush1.bf16.msra.mxu0 %v7453_v5  ;;  %6650 = vmatprep.subr.bf16.mxu1 %v7461_v4  ;;  %v7510_v4 = vld [vmem:[%s9895_s1 + $0x1118] ss:$12 sps:$4 sm:$0xff]  }
 0x1e5   :  { %4524 = vmatprep.subr.bf16.mxu0 %v7460_v7  ;;  %v6502_v12 = vpop.f32.mrb[20].mxu1  ;;  %v7506_v7 = vld [vmem:[%s9895_s1 + $0xf30] ss:$12 sps:$4 sm:$0xff]  }
 0x1e6   :  { %v6503_v14 = vpop.f32.mrb[21].mxu1 }
 0x1e7   :  { %6651 = vmatpush3.bf16.msra.mxu1 %v7462_v10  ;;  %v6504_v21 = vadd.f32 %v6503_v14, %v6502_v12  ;;  %v6505_v22 = vpop.f32.mrb[22].mxu1  ;;  %v7514_v10 = vld [vmem:[%s9895_s1 + $0x11f0] ss:$12 sps:$4 sm:$0xff]   ;;  %v7511_v14 = vld [vmem:[%s9895_s1 + $0xf48] ss:$12 sps:$4 sm:$0xff]  }
 0x1e8   :  { %4525 = vmatpush1.bf16.msra.mxu0 %v7458_v8  ;;  %6652 = vmatprep.subr.bf16.mxu1 %v7466_v34  ;;  %v6506_v28 = vpop.f32.mrb[23].mxu1 }
 0x1e9   :  { %4526 = vmatprep.subr.bf16.mxu0 %v7465_v11  ;;  %v9382_v29 = vadd.f32 %v6504_v21, %v9274_v48  ;;  %v6507_v32 = vadd.f32 %v6506_v28, %v6505_v22  ;;  %v7481_v48 = vld [vmem:[%s9895_s1 + $0xeb8] ss:$12 sps:$4 sm:$0xff]   ;;  %v7519_v22 = vld [vmem:[%s9895_s1 + $0xf60] ss:$12 sps:$4 sm:$0xff]   ;;  %v7525_v28 = vld [vmem:[%s9895_s1 + $0xf7c] ss:$12 sps:$4 sm:$0xff]  }
 0x1ea   :  { %v9515_v21 = vld [vmem:[%s9896_s0 + $0x58] ss:$100 sps:$4 sm:$0xff]  }
 0x1eb   :  { %6653 = vmatpush3.bf16.msra.mxu1 %v7467_v19  ;;  %v9391_v31 = vadd.f32 %v6507_v32, %v9283_v46  ;;  %v7486_v46 = vld [vmem:[%s9895_s1 + $0xed0] ss:$12 sps:$4 sm:$0xff]   ;;  %v7526_v32 = vld [vmem:[%s9895_s1 + $0x1220] ss:$12 sps:$4 sm:$0xff]  }
 0x1ec   :  { %4527 = vmatpush1.bf16.msra.mxu0 %v7463_v17  ;;  %6654 = vmatprep.subr.bf16.mxu1 %v7471_v27  ;;  %v7515_v17 = vld [vmem:[%s9895_s1 + $0x1130] ss:$12 sps:$4 sm:$0xff]   ;;  %v7689_v27 = vmov 0.0  }
 0x1ed   :  { %4528 = vmatprep.subr.bf16.mxu0 %v7470_v23  ;;  %v7521_v19 = vld [vmem:[%s9895_s1 + $0xf64] ss:$12 sps:$4 sm:$0xff]   ;;  %v7522_v23 = vld [vmem:[%s9895_s1 + $0x1208] ss:$12 sps:$4 sm:$0xff]  }
 0x1ef   :  { %6655 = vmatpush3.bf16.msra.mxu1 %v7472_v35  ;;  %v7527_v35 = vld [vmem:[%s9895_s1 + $0xf90] ss:$12 sps:$4 sm:$0xff]  }
 0x1f0   :  { %4529 = vmatpush1.bf16.msra.mxu0 %v7468_v33  ;;  %6662 = vmatprep.subr.bf16.mxu1 %v7479_v37  ;;  %v7529_v33 = vld [vmem:[%s9895_s1 + $0xf94] ss:$12 sps:$4 sm:$0xff]  }
 0x1f1   :  { %4530 = vmatprep.subr.bf16.mxu0 %v7478_v36  ;;  %v7533_v36 = vld [vmem:[%s9895_s1 + $0xfac] ss:$12 sps:$4 sm:$0xff]   ;;  %v7531_v37 = vld [vmem:[%s9895_s1 + $0xfa8] ss:$12 sps:$4 sm:$0xff]  }
 0x1f2   :  { %5121 = vmatmul.mubr.bf16.vlgmr.msra.gmra.mrb[48].mxu1 %v9402_v39 }
 0x1f3   :  { %6663 = vmatpush3.bf16.msra.mxu1 %v7480_v38  ;;  %5161 = vmatprep.mubr.bf16.mxu1 %v9419_v9  ;;  %v7537_v38 = vld [vmem:[%s9895_s1 + $0xfc4] ss:$12 sps:$4 sm:$0xff]  }
 0x1f4   :  { %4531 = vmatpush1.bf16.msra.mxu0 %v7476_v40  ;;  %6664 = vmatprep.subr.bf16.mxu1 %v7484_v42  ;;  %v7534_v40 = vld [vmem:[%s9895_s1 + $0x1250] ss:$12 sps:$4 sm:$0xff]  }
 0x1f5   :  { %4532 = vmatprep.subr.bf16.mxu0 %v7483_v41  ;;  %v7535_v41 = vld [vmem:[%s9895_s1 + $0xfc0] ss:$12 sps:$4 sm:$0xff]   ;;  %v7540_v42 = vld [vmem:[%s9895_s1 + $0xfdc] ss:$12 sps:$4 sm:$0xff]  }
 0x1f7   :  { %6665 = vmatpush3.bf16.msra.mxu1 %v7485_v43  ;;  %v7538_v43 = vld [vmem:[%s9895_s1 + $0xfd8] ss:$12 sps:$4 sm:$0xff]  }
 0x1f8   :  { %4533 = vmatpush1.bf16.msra.mxu0 %v7481_v48  ;;  %6666 = vmatprep.subr.bf16.mxu1 %v7489_v45  ;;  %v7686_v48 = vld [vmem:[%s9896_s0 + $0x60] ss:$100 sps:$4 sm:$0xff]  }
 0x1f9   :  { %4534 = vmatprep.subr.bf16.mxu0 %v7488_v44  ;;  %v7543_v44 = vld [vmem:[%s9895_s1 + $0xff4] ss:$12 sps:$4 sm:$0xff]  }
 0x1fb   :  { %6667 = vmatpush3.bf16.msra.mxu1 %v7490_v49 }
 0x1fc   :  { %4535 = vmatpush1.bf16.msra.mxu0 %v7486_v46  ;;  %6668 = vmatprep.subr.bf16.mxu1 %v7494_v51  ;;  %v7541_v51 = vld [vmem:[%s9895_s1 + $0xff0] ss:$12 sps:$4 sm:$0xff]  }
 0x1fd   :  { %4536 = vmatprep.subr.bf16.mxu0 %v7493_v50 }
 0x1ff   :  { %6669 = vmatpush3.bf16.msra.mxu1 %v7495_v54  ;;  %v7546_v54 = vld [vmem:[%s9895_s1 + $0x100c] ss:$12 sps:$4 sm:$0xff]  }
 0x200   :  { %4537 = vmatpush1.bf16.msra.mxu0 %v7491_v52  ;;  %6670 = vmatprep.subr.bf16.mxu1 %v7499_v56 }
 0x201   :  { %4549 = vmatprep.subr.bf16.mxu0 %v7498_v55 }
 0x203   :  { %4539 = vmatmul.mubr.bf16.vlgmr.msra.gmra.mrb[0].mxu0 %v9288_v47  ;;  %6671 = vmatpush3.bf16.msra.mxu1 %v7500_v24  ;;  %v7509_v47 = vld [vmem:[%s9895_s1 + $0x11d8] ss:$12 sps:$4 sm:$0xff]   ;;  %v7544_v24 = vld [vmem:[%s9895_s1 + $0x1008] ss:$12 sps:$4 sm:$0xff]  }
 0x204   :  { %4550 = vmatpush1.bf16.msra.mxu0 %v7496_v57  ;;  %6672 = vmatprep.subr.bf16.mxu1 %v7504_v61  ;;  %v7547_v61 = vld [vmem:[%s9895_s1 + $0x1020] ss:$12 sps:$4 sm:$0xff]  }
 0x205   :  { %4551 = vmatprep.subr.bf16.mxu0 %v7503_v58  ;;  %v6524_v2 = vpop.f32.mrb[24].mxu1  ;;  %4581 = vmatprep.mubr.bf16.mxu0 %v9305_v53  ;;  %v7513_v53 = vld [vmem:[%s9895_s1 + $0xf4c] ss:$12 sps:$4 sm:$0xff]   ;;  %v7549_v58 = vld [vmem:[%s9895_s1 + $0x1024] ss:$12 sps:$4 sm:$0xff]  }
 0x206   :  { %v6525_v3 = vpop.f32.mrb[25].mxu1 }
 0x207   :  { %v6526_v5 = vadd.f32 %v6525_v3, %v6524_v2  ;;  %v6527_v6 = vpop.f32.mrb[26].mxu1  ;;  %6673 = vmatpush3.bf16.msra.mxu1 %v7505_v30  ;;  %v7550_v30 = vld [vmem:[%s9895_s1 + $0x1038] ss:$12 sps:$4 sm:$0xff]   ;;  %v7556_v3 = vld [vmem:[%s9895_s1 + $0x1068] ss:$12 sps:$4 sm:$0xff]  }
 0x208   :  { %4552 = vmatpush1.bf16.msra.mxu0 %v7501_v63  ;;  %v6528_v8 = vpop.f32.mrb[27].mxu1  ;;  %6674 = vmatprep.subr.bf16.mxu1 %v7509_v47  ;;  %v7552_v63 = vld [vmem:[%s9895_s1 + $0x103c] ss:$12 sps:$4 sm:$0xff]   ;;  %v7558_v2 = vld [vmem:[%s9895_s1 + $0x106c] ss:$12 sps:$4 sm:$0xff]  }
 0x209   :  { %4553 = vmatprep.subr.bf16.mxu0 %v7508_v1  ;;  %v9498_v11 = vadd.f32 %v6526_v5, %v9382_v29  ;;  %v6529_v34 = vadd.f32 %v6528_v8, %v6527_v6  ;;  %v7523_v29 = vld [vmem:[%s9895_s1 + $0xf78] ss:$12 sps:$4 sm:$0xff]   ;;  %v7555_v1 = vld [vmem:[%s9895_s1 + $0x1054] ss:$12 sps:$4 sm:$0xff]   ;;  %v7553_v47 = vld [vmem:[%s9895_s1 + $0x1050] ss:$12 sps:$4 sm:$0xff]  }
 0x20a   :  { %v7561_v5 = vld [vmem:[%s9895_s1 + $0x1084] ss:$12 sps:$4 sm:$0xff]   ;;  %v7559_v6 = vld [vmem:[%s9895_s1 + $0x1080] ss:$12 sps:$4 sm:$0xff]  }
 0x20b   :  { %v9501_v12 = vadd.f32 %v6529_v34, %v9391_v31  ;;  %6675 = vmatpush3.bf16.msra.mxu1 %v7510_v4  ;;  %v7530_v31 = vld [vmem:[%s9895_s1 + $0x1238] ss:$12 sps:$4 sm:$0xff]   ;;  %v7567_v8 = vld [vmem:[%s9895_s1 + $0x10b4] ss:$12 sps:$4 sm:$0xff]  }
 0x20c   :  { %4554 = vmatpush1.bf16.msra.mxu0 %v7506_v7  ;;  %6676 = vmatprep.subr.bf16.mxu1 %v7514_v10  ;;  %v7564_v7 = vld [vmem:[%s9895_s1 + $0x109c] ss:$12 sps:$4 sm:$0xff]   ;;  %v7562_v4 = vld [vmem:[%s9895_s1 + $0x1098] ss:$12 sps:$4 sm:$0xff]  }
 0x20d   :  { %4555 = vmatprep.subr.bf16.mxu0 %v7513_v53 }
 0x20f   :  { %6677 = vmatpush3.bf16.msra.mxu1 %v7515_v17 }
 0x210   :  { %4556 = vmatpush1.bf16.msra.mxu0 %v7511_v14  ;;  %6711 = vmatprep.subr.bf16.mxu1 %v7689_v27 }
 0x211   :  { %4557 = vmatprep.subr.bf16.mxu0 %v7521_v19 }
 0x212   :  { %5162 = vmatmul.mubr.bf16.vlgmr.msra.gmra.mrb[52].mxu1 %v9515_v21 }
 0x213   :  { %6712 = vmatpush3.bf16.msra.mxu1 %v7522_v23  ;;  %6719 = vmatprep.mubr.msk.bf16.mxu1 %vm7690_vm1, %v7689_v27  ;;  %v7573_v23 = vld [vmem:[%s9895_s1 + $0x10e4] ss:$12 sps:$4 sm:$0xff]  }
 0x214   :  { %4558 = vmatpush1.bf16.msra.mxu0 %v7519_v22  ;;  %6713 = vmatprep.subr.bf16.mxu1 %v7689_v27  ;;  %v7568_v22 = vld [vmem:[%s9895_s1 + $0x10c8] ss:$12 sps:$4 sm:$0xff]  }
 0x215   :  { %4559 = vmatprep.subr.bf16.mxu0 %v7525_v28  ;;  %v7576_v28 = vld [vmem:[%s9895_s1 + $0x10fc] ss:$12 sps:$4 sm:$0xff]  }
 0x217   :  { %6714 = vmatpush3.bf16.msra.mxu1 %v7526_v32  ;;  %v7579_v32 = vld [vmem:[%s9895_s1 + $0x1114] ss:$12 sps:$4 sm:$0xff]  }
 0x218   :  { %4560 = vmatpush1.bf16.msra.mxu0 %v7523_v29  ;;  %6715 = vmatprep.subr.bf16.mxu1 %v7689_v27  ;;  %v7574_v29 = vld [vmem:[%s9895_s1 + $0x10f8] ss:$12 sps:$4 sm:$0xff]  }
 0x219   :  { %4561 = vmatprep.subr.bf16.mxu0 %v7529_v33  ;;  %v7577_v33 = vld [vmem:[%s9895_s1 + $0x1110] ss:$12 sps:$4 sm:$0xff]  }
 0x21b   :  { %6716 = vmatpush3.bf16.msra.mxu1 %v7530_v31  ;;  %v7580_v31 = vld [vmem:[%s9895_s1 + $0x1128] ss:$12 sps:$4 sm:$0xff]  }
 0x21c   :  { %4562 = vmatpush1.bf16.msra.mxu0 %v7527_v35  ;;  %6717 = vmatprep.subr.bf16.mxu1 %v7689_v27  ;;  %v7571_v27 = vld [vmem:[%s9895_s1 + $0x10e0] ss:$12 sps:$4 sm:$0xff]  }
 0x21d   :  { %4563 = vmatprep.subr.bf16.mxu0 %v7533_v36  ;;  %v7582_v35 = vld [vmem:[%s9895_s1 + $0x112c] ss:$12 sps:$4 sm:$0xff]   ;;  %v7585_v36 = vld [vmem:[%s9895_s1 + $0x1144] ss:$12 sps:$4 sm:$0xff]  }
 0x21f   :  { %6718 = vmatpush3.bf16.msra.mxu1 %v7534_v40  ;;  %v7588_v40 = vld [vmem:[%s9895_s1 + $0x115c] ss:$12 sps:$4 sm:$0xff]  }
 0x220   :  { %4564 = vmatpush1.bf16.msra.mxu0 %v7531_v37  ;;  %v7583_v37 = vld [vmem:[%s9895_s1 + $0x1140] ss:$12 sps:$4 sm:$0xff]  }
 0x221   :  { %4565 = vmatprep.subr.bf16.mxu0 %v7537_v38  ;;  %v7586_v38 = vld [vmem:[%s9895_s1 + $0x1158] ss:$12 sps:$4 sm:$0xff]  }
 0x222   :  { %6720 = vmatmul.mubr.msk.bf16.vlgmr.msra.gmra.mrb[56].mxu1 %vm4115_vm0, %v7686_v48 }
 0x224   :  { %4566 = vmatpush1.bf16.msra.mxu0 %v7535_v41  ;;  %v7591_v41 = vld [vmem:[%s9895_s1 + $0x1174] ss:$12 sps:$4 sm:$0xff]  }
 0x225   :  { %4567 = vmatprep.subr.bf16.mxu0 %v7540_v42  ;;  %v6546_v45 = vpop.f32.mrb[28].mxu1 }
 0x226   :  { %v6547_v46 = vpop.f32.mrb[29].mxu1 }
 0x227   :  { %v6548_v49 = vadd.f32 %v6547_v46, %v6546_v45  ;;  %v6549_v50 = vpop.f32.mrb[30].mxu1  ;;  %v7589_v45 = vld [vmem:[%s9895_s1 + $0x1170] ss:$12 sps:$4 sm:$0xff]  }
 0x228   :  { %4568 = vmatpush1.bf16.msra.mxu0 %v7538_v43  ;;  %v6550_v52 = vpop.f32.mrb[31].mxu1 }
 0x229   :  { %4569 = vmatprep.subr.bf16.mxu0 %v7543_v44  ;;  %v4918_v55 = vadd.f32 %v6548_v49, %v9498_v11  ;;  %v6551_v56 = vadd.f32 %v6550_v52, %v6549_v50  ;;  %v7594_v49 = vld [vmem:[%s9895_s1 + $0x118c] ss:$12 sps:$4 sm:$0xff]  }
 0x22b   :  { %v4921_v57 = vadd.f32 %v6551_v56, %v9501_v12  ;;  %v7595_v56 = vld [vmem:[%s9895_s1 + $0x11a0] ss:$12 sps:$4 sm:$0xff]  }
 0x22c   :  { %4570 = vmatpush1.bf16.msra.mxu0 %v7541_v51 }
 0x22d   :  { %4571 = vmatprep.subr.bf16.mxu0 %v7546_v54  ;;  %v7592_v54 = vld [vmem:[%s9895_s1 + $0x1188] ss:$12 sps:$4 sm:$0xff]  }
 0x230   :  { %4572 = vmatpush1.bf16.msra.mxu0 %v7544_v24  ;;  %v7598_v24 = vld [vmem:[%s9895_s1 + $0x11b8] ss:$12 sps:$4 sm:$0xff]  }
 0x231   :  { %4573 = vmatprep.subr.bf16.mxu0 %v7549_v58  ;;  %v7603_v58 = vld [vmem:[%s9895_s1 + $0x11d4] ss:$12 sps:$4 sm:$0xff]  }
 0x234   :  { %4574 = vmatpush1.bf16.msra.mxu0 %v7547_v61  ;;  %v7601_v61 = vld [vmem:[%s9895_s1 + $0x11d0] ss:$12 sps:$4 sm:$0xff]  }
 0x235   :  { %4575 = vmatprep.subr.bf16.mxu0 %v7552_v63  ;;  %v7606_v63 = vld [vmem:[%s9895_s1 + $0x11ec] ss:$12 sps:$4 sm:$0xff]  }
 0x238   :  { %4576 = vmatpush1.bf16.msra.mxu0 %v7550_v30  ;;  %v7604_v30 = vld [vmem:[%s9895_s1 + $0x11e8] ss:$12 sps:$4 sm:$0xff]  }
 0x239   :  { %4577 = vmatprep.subr.bf16.mxu0 %v7555_v1  ;;  %v7607_v1 = vld [vmem:[%s9898_s3] ss:$8 sps:$4 sm:$0xff]  }
 0x23c   :  { %4578 = vmatpush1.bf16.msra.mxu0 %v7553_v47  ;;  %v7609_v47 = vld [vmem:[%s9898_s3 + $0x4] ss:$8 sps:$4 sm:$0xff]  }
 0x23d   :  { %4579 = vmatprep.subr.bf16.mxu0 %v7558_v2  ;;  %v7612_v2 = vld [vmem:[%s9898_s3 + $0x14] ss:$8 sps:$4 sm:$0xff]   ;;  %5464 = vmatprep.subr.bf16.mxu1 %v7609_v47 }
 0x23e   :  { %5465 = vmatpush1.bf16.msra.mxu1 %v7607_v1  ;;  %v7649_v1 = vld [vmem:[%s9898_s3 + $0xe0] ss:$8 sps:$4 sm:$0xff]   ;;  %v7654_v47 = vld [vmem:[%s9898_s3 + $0xf4] ss:$8 sps:$4 sm:$0xff]  }
 0x23f   :  { %5466 = vmatprep.subr.bf16.mxu1 %v7612_v2  ;;  %v7652_v2 = vld [vmem:[%s9898_s3 + $0xf0] ss:$8 sps:$4 sm:$0xff]  }
 0x240   :  { %4580 = vmatpush1.bf16.msra.mxu0 %v7556_v3  ;;  %v7610_v3 = vld [vmem:[%s9898_s3 + $0x10] ss:$8 sps:$4 sm:$0xff]  }
 0x241   :  { %4592 = vmatprep.subr.bf16.mxu0 %v7561_v5  ;;  %v7615_v5 = vld [vmem:[%s9898_s3 + $0x24] ss:$8 sps:$4 sm:$0xff]  }
 0x242   :  { %5467 = vmatpush1.bf16.msra.mxu1 %v7610_v3  ;;  %v7657_v3 = vld [vmem:[%s9898_s3 + $0x104] ss:$8 sps:$4 sm:$0xff]  }
 0x243   :  { %4582 = vmatmul.mubr.bf16.vlgmr.msra.gmra.mrb[0].mxu0 %v9402_v39  ;;  %v7565_v39 = vld [vmem:[%s9895_s1 + $0x10b0] ss:$12 sps:$4 sm:$0xff]   ;;  %5468 = vmatprep.subr.bf16.mxu1 %v7615_v5 }
 0x244   :  { %4593 = vmatpush1.bf16.msra.mxu0 %v7559_v6  ;;  %4624 = vmatprep.mubr.bf16.mxu0 %v9419_v9  ;;  %v7570_v9 = vld [vmem:[%s9895_s1 + $0x10cc] ss:$12 sps:$4 sm:$0xff]  }
 0x245   :  { %4594 = vmatprep.subr.bf16.mxu0 %v7564_v7  ;;  %v6568_v53 = vpop.f32.mrb[32].mxu1 }
 0x246   :  { %v6569_v10 = vpop.f32.mrb[33].mxu1 }
 0x247   :  { %v6570_v11 = vadd.f32 %v6569_v10, %v6568_v53  ;;  %v6571_v34 = vpop.f32.mrb[34].mxu1 }
 0x248   :  { %4595 = vmatpush1.bf16.msra.mxu0 %v7562_v4  ;;  %v6572_v12 = vpop.f32.mrb[35].mxu1  ;;  %v7613_v4 = vld [vmem:[%s9898_s3 + $0x20] ss:$8 sps:$4 sm:$0xff]  }
 0x249   :  { %4596 = vmatprep.subr.bf16.mxu0 %v7567_v8  ;;  %v4959_v14 = vadd.f32 %v6570_v11, %v4918_v55  ;;  %v6573_v17 = vadd.f32 %v6572_v12, %v6571_v34  ;;  %v7597_v55 = vld [vmem:[%s9895_s1 + $0x11a4] ss:$12 sps:$4 sm:$0xff]   ;;  %5469 = vmatpush1.bf16.msra.mxu1 %v7613_v4 }
 0x24b   :  { %v4962_v19 = vadd.f32 %v6573_v17, %v4921_v57  ;;  %v7600_v57 = vld [vmem:[%s9895_s1 + $0x11bc] ss:$12 sps:$4 sm:$0xff]  }
 0x24c   :  { %4597 = vmatpush1.bf16.msra.mxu0 %v7565_v39  ;;  %v7616_v39 = vld [vmem:[%s9898_s3 + $0x30] ss:$8 sps:$4 sm:$0xff]   ;;  %v7624_v17 = vld [vmem:[%s9898_s3 + $0x54] ss:$8 sps:$4 sm:$0xff]  }
 0x24d   :  { %4598 = vmatprep.subr.bf16.mxu0 %v7570_v9  ;;  %v7621_v9 = vld [vmem:[%s9898_s3 + $0x44] ss:$8 sps:$4 sm:$0xff]  }
 0x250   :  { %4599 = vmatpush1.bf16.msra.mxu0 %v7568_v22  ;;  %v7627_v22 = vld [vmem:[%s9898_s3 + $0x64] ss:$8 sps:$4 sm:$0xff]  }
 0x251   :  { %4600 = vmatprep.subr.bf16.mxu0 %v7573_v23  ;;  %v7625_v23 = vld [vmem:[%s9898_s3 + $0x60] ss:$8 sps:$4 sm:$0xff]  }
 0x254   :  { %4601 = vmatpush1.bf16.msra.mxu0 %v7571_v27  ;;  %v7630_v27 = vld [vmem:[%s9898_s3 + $0x74] ss:$8 sps:$4 sm:$0xff]  }
 0x255   :  { %4602 = vmatprep.subr.bf16.mxu0 %v7576_v28  ;;  %v7628_v28 = vld [vmem:[%s9898_s3 + $0x70] ss:$8 sps:$4 sm:$0xff]  }
 0x258   :  { %4603 = vmatpush1.bf16.msra.mxu0 %v7574_v29  ;;  %v7633_v29 = vld [vmem:[%s9898_s3 + $0x84] ss:$8 sps:$4 sm:$0xff]  }
 0x259   :  { %4604 = vmatprep.subr.bf16.mxu0 %v7579_v32  ;;  %v7631_v32 = vld [vmem:[%s9898_s3 + $0x80] ss:$8 sps:$4 sm:$0xff]  }
 0x25c   :  { %4605 = vmatpush1.bf16.msra.mxu0 %v7577_v33  ;;  %v7636_v33 = vld [vmem:[%s9898_s3 + $0x94] ss:$8 sps:$4 sm:$0xff]  }
 0x25d   :  { %4606 = vmatprep.subr.bf16.mxu0 %v7582_v35  ;;  %v7634_v35 = vld [vmem:[%s9898_s3 + $0x90] ss:$8 sps:$4 sm:$0xff]  }
 0x260   :  { %4607 = vmatpush1.bf16.msra.mxu0 %v7580_v31  ;;  %v7639_v31 = vld [vmem:[%s9898_s3 + $0xa4] ss:$8 sps:$4 sm:$0xff]  }
 0x261   :  { %4608 = vmatprep.subr.bf16.mxu0 %v7585_v36 }
 0x264   :  { %4609 = vmatpush1.bf16.msra.mxu0 %v7583_v37 }
 0x265   :  { %4610 = vmatprep.subr.bf16.mxu0 %v7588_v40  ;;  %v6590_v42 = vpop.f32.mrb[36].mxu1  ;;  %v7637_v40 = vld [vmem:[%s9898_s3 + $0xa0] ss:$8 sps:$4 sm:$0xff]  }
 0x266   :  { %v6591_v48 = vpop.f32.mrb[37].mxu1 }
 0x267   :  { %v6592_v43 = vadd.f32 %v6591_v48, %v6590_v42  ;;  %v6593_v44 = vpop.f32.mrb[38].mxu1  ;;  %v7642_v42 = vld [vmem:[%s9898_s3 + $0xb4] ss:$8 sps:$4 sm:$0xff]  }
 0x268   :  { %4611 = vmatpush1.bf16.msra.mxu0 %v7586_v38  ;;  %v6594_v46 = vpop.f32.mrb[39].mxu1 }
 0x269   :  { %4612 = vmatprep.subr.bf16.mxu0 %v7591_v41  ;;  %v5000_v50 = vadd.f32 %v6592_v43, %v4959_v14  ;;  %v6595_v51 = vadd.f32 %v6594_v46, %v6593_v44  ;;  %v7619_v14 = vld [vmem:[%s9898_s3 + $0x40] ss:$8 sps:$4 sm:$0xff]  }
 0x26b   :  { %v5003_v52 = vadd.f32 %v6595_v51, %v4962_v19  ;;  %v7622_v19 = vld [vmem:[%s9898_s3 + $0x50] ss:$8 sps:$4 sm:$0xff]  }
 0x26c   :  { %4613 = vmatpush1.bf16.msra.mxu0 %v7589_v45  ;;  %v7640_v45 = vld [vmem:[%s9898_s3 + $0xb0] ss:$8 sps:$4 sm:$0xff]  }
 0x26d   :  { %4614 = vmatprep.subr.bf16.mxu0 %v7594_v49  ;;  %v7645_v49 = vld [vmem:[%s9898_s3 + $0xc4] ss:$8 sps:$4 sm:$0xff]  }
 0x270   :  { %4615 = vmatpush1.bf16.msra.mxu0 %v7592_v54 }
 0x271   :  { %4616 = vmatprep.subr.bf16.mxu0 %v7597_v55 }
 0x274   :  { %4617 = vmatpush1.bf16.msra.mxu0 %v7595_v56 }
 0x275   :  { %4618 = vmatprep.subr.bf16.mxu0 %v7600_v57 }
 0x278   :  { %4619 = vmatpush1.bf16.msra.mxu0 %v7598_v24 }
 0x279   :  { %4620 = vmatprep.subr.bf16.mxu0 %v7603_v58 }
 0x27c   :  { %4621 = vmatpush1.bf16.msra.mxu0 %v7601_v61  ;;  %v7648_v61 = vld [vmem:[%s9898_s3 + $0xd4] ss:$8 sps:$4 sm:$0xff]  }
 0x27d   :  { %4622 = vmatprep.subr.bf16.mxu0 %v7606_v63  ;;  %v7646_v63 = vld [vmem:[%s9898_s3 + $0xd0] ss:$8 sps:$4 sm:$0xff]  }
 0x280   :  { %4623 = vmatpush1.bf16.msra.mxu0 %v7604_v30  ;;  %v7651_v30 = vld [vmem:[%s9898_s3 + $0xe4] ss:$8 sps:$4 sm:$0xff]  }
 0x283   :  { %4625 = vmatmul.mubr.bf16.vlgmr.msra.gmra.mrb[0].mxu0 %v9515_v21  ;;  %v7618_v21 = vld [vmem:[%s9898_s3 + $0x34] ss:$8 sps:$4 sm:$0xff]  }
 0x284   :  { %5470 = vmatprep.subr.bf16.mxu1 %v7618_v21 }
 0x285   :  { %v6612_v6 = vpop.f32.mrb[40].mxu1  ;;  %5471 = vmatpush1.bf16.msra.mxu1 %v7616_v39 }
 0x286   :  { %v6613_v7 = vpop.f32.mrb[41].mxu1  ;;  %5472 = vmatprep.subr.bf16.mxu1 %v7621_v9 }
 0x287   :  { %v6614_v8 = vadd.f32 %v6613_v7, %v6612_v6  ;;  %v6615_v53 = vpop.f32.mrb[42].mxu1 }
 0x288   :  { %v6616_v10 = vpop.f32.mrb[43].mxu1 }
 0x289   :  { %v5041_v11 = vadd.f32 %v6614_v8, %v5000_v50  ;;  %v6617_v34 = vadd.f32 %v6616_v10, %v6615_v53  ;;  %5473 = vmatpush1.bf16.msra.mxu1 %v7619_v14  ;;  %v7643_v50 = vld [vmem:[%s9898_s3 + $0xc0] ss:$8 sps:$4 sm:$0xff]  }
 0x28a   :  { %5474 = vmatprep.subr.bf16.mxu1 %v7624_v17 }
 0x28b   :  { %v5044_v12 = vadd.f32 %v6617_v34, %v5003_v52 }
 0x28d   :  { %5475 = vmatpush1.bf16.msra.mxu1 %v7622_v19 }
 0x28e   :  { %5476 = vmatprep.subr.bf16.mxu1 %v7627_v22 }
 0x291   :  { %5477 = vmatpush1.bf16.msra.mxu1 %v7625_v23 }
 0x292   :  { %5478 = vmatprep.subr.bf16.mxu1 %v7630_v27 }
 0x295   :  { %5479 = vmatpush1.bf16.msra.mxu1 %v7628_v28  ;;  %v841_v28 = vsub.s32 0, %v9111_v25 }
 0x296   :  { %5480 = vmatprep.subr.bf16.mxu1 %v7633_v29  ;;  %v845_v29 = vsub.s32 1, %v9111_v25  ;;  %v6403_v25 = vld [vmem:[%s9901_s6] ss:$0 sm:$0xff] }
 0x299   :  { %5481 = vmatpush1.bf16.msra.mxu1 %v7631_v32  ;;  %v7687_v32 = vld [vmem:[%s9897_s2] sm:$0x7] }
 0x29a   :  { %5482 = vmatprep.subr.bf16.mxu1 %v7636_v33  ;;  %v842_v33 = vrot.slane %v7687_v32, %v841_v28 }
 0x29d   :  { %5483 = vmatpush1.bf16.msra.mxu1 %v7634_v35  ;;  %v846_v35 = vrot.slane %v7687_v32, %v845_v29 }
 0x29e   :  { %5484 = vmatprep.subr.bf16.mxu1 %v7639_v31  ;;  %v6723_v31 = vadd.f32 %v8878_v59, %v842_v33 }
 0x2a1   :  { %5485 = vmatpush1.bf16.msra.mxu1 %v7637_v40  ;;  %v6729_v40 = vadd.f32 %v8885_v62, %v842_v33 }
 0x2a2   :  { %5486 = vmatprep.subr.bf16.mxu1 %v7642_v42  ;;  %v6732_v42 = vadd.f32 %v8890_v0, %v846_v35 }
 0x2a5   :  { %v6634_v36 = vpop.f32.mrb[44].mxu1  ;;  %5487 = vmatpush1.bf16.msra.mxu1 %v7640_v45 }
 0x2a6   :  { %v6635_v37 = vpop.f32.mrb[45].mxu1  ;;  %5488 = vmatprep.subr.bf16.mxu1 %v7645_v49 }
 0x2a7   :  { %v6636_v38 = vadd.f32 %v6635_v37, %v6634_v36  ;;  %v6637_v41 = vpop.f32.mrb[46].mxu1  ;;  %v6726_v36 = vadd.f32 %v8880_v60, %v846_v35 }
 0x2a8   :  { %v6638_v48 = vpop.f32.mrb[47].mxu1 }
 0x2a9   :  { %v5082_v43 = vadd.f32 %v6636_v38, %v5041_v11  ;;  %v6639_v44 = vadd.f32 %v6638_v48, %v6637_v41  ;;  %5489 = vmatpush1.bf16.msra.mxu1 %v7643_v50 }
 0x2aa   :  { %5490 = vmatprep.subr.bf16.mxu1 %v7648_v61  ;;  %v7662_v61 = vld [vmem:[%s9899_s5] sm:$0xff]  }
 0x2ab   :  { %v5085_v46 = vadd.f32 %v6639_v44, %v5044_v12 }
 0x2ad   :  { %5491 = vmatpush1.bf16.msra.mxu1 %v7646_v63  ;;  %v7663_v63 = vld [vmem:[%s9899_s5 + $0x48] sm:$0xff]  }
 0x2ae   :  { %5492 = vmatprep.subr.bf16.mxu1 %v7651_v30  ;;  %v7665_v30 = vld [vmem:[%s9899_s5 + $0x50] sm:$0xff]  }
 0x2b1   :  { %5493 = vmatpush1.bf16.msra.mxu1 %v7649_v1  ;;  %v7666_v1 = vld [vmem:[%s9899_s5 + $0x10] sm:$0xff]  }
 0x2b2   :  { %5494 = vmatprep.subr.bf16.mxu1 %v7654_v47  ;;  %v7667_v47 = vld [vmem:[%s9899_s5 + $0x58] sm:$0xff]  }
 0x2b5   :  { %5495 = vmatpush1.bf16.msra.mxu1 %v7652_v2  ;;  %v7668_v2 = vld [vmem:[%s9899_s5 + $0x18] sm:$0xff]  }
 0x2b6   :  { %5507 = vmatprep.subr.bf16.mxu1 %v7657_v3  ;;  %v7669_v3 = vld [vmem:[%s9899_s5 + $0x60] sm:$0xff]  }
 0x2c5   :  { %v6656_v51 = vpop.f32.mrb[48].mxu1 }
 0x2c6   :  { %v6657_v52 = vpop.f32.mrb[49].mxu1 }
 0x2c7   :  { %v6658_v54 = vadd.f32 %v6657_v52, %v6656_v51  ;;  %v6659_v55 = vpop.f32.mrb[50].mxu1 }
 0x2c8   :  { %v6660_v56 = vpop.f32.mrb[51].mxu1 }
 0x2c9   :  { %v5123_v57 = vadd.f32 %v6658_v54, %v5082_v43  ;;  %v6661_v24 = vadd.f32 %v6660_v56, %v6659_v55 }
 0x2cb   :  { %v5126_v58 = vadd.f32 %v6661_v24, %v5085_v46 }
 0x2e5   :  { %v6678_v5 = vpop.f32.mrb[52].mxu1 }
 0x2e6   :  { %v6679_v6 = vpop.f32.mrb[53].mxu1 }
 0x2e7   :  { %v6680_v7 = vadd.f32 %v6679_v6, %v6678_v5  ;;  %v6681_v4 = vpop.f32.mrb[54].mxu1  ;;  %v7670_v5 = vld [vmem:[%s9899_s5 + $0x20] sm:$0xff]   ;;  %v7671_v6 = vld [vmem:[%s9899_s5 + $0x68] sm:$0xff]  }
 0x2e8   :  { %v6682_v8 = vpop.f32.mrb[55].mxu1 }
 0x2e9   :  { %v6683_v53 = vadd.f32 %v6682_v8, %v6681_v4  ;;  %v5164_v21 = vadd.f32 %v6680_v7, %v5123_v57  ;;  %v7672_v7 = vld [vmem:[%s9899_s5 + $0x28] sm:$0xff]   ;;  %v7673_v4 = vld [vmem:[%s9899_s5 + $0x70] sm:$0xff]  }
 0x2ea   :  { %v7674_v8 = vld [vmem:[%s9899_s5 + $0x30] sm:$0xff]  }
 0x2eb   :  { %v5167_v10 = vadd.f32 %v6683_v53, %v5126_v58  ;;  %v7661_v58 = vld [vmem:[%s9899_s5 + $0x40] sm:$0xff]   ;;  %v7675_v53 = vld [vmem:[%s9899_s5 + $0x78] sm:$0xff]  }
 0x2f5   :  { %v5204_v11 = vpop.f32.mrb[56].mxu1 }
 0x2f6   :  { %v5205_v34 = vadd.f32 %v5204_v11, %v5164_v21  ;;  %v6721_v39 = vpop.f32.mrb[57].mxu1  ;;  %v7676_v21 = vld [vmem:[%s9899_s5 + $0x38] sm:$0xff]  }
 0x2f7   :  { %v5207_v12 = vpop.f32.mrb[58].mxu1 }
 0x2f8   :  { %v5219_v9 = vmul.f32 0.2, %v5205_v34  ;;  %v5208_v14 = vadd.f32 %v5207_v12, %v5167_v10  ;;  %v6722_v17 = vpop.f32.mrb[59].mxu1  ;;  %vm5213_vm2 = vcmp.ge.f32.partialorder %v5205_v34, 0.0  ;;  %v5268_v10 = vld [vmem:[%s9900_s4] sm:$0x3] }
 0x2f9   :  { %v5273_v11 = vrot.slane %v5268_v10, %v841_v28 }
 0x2fa   :  { %vm5216_vm3 = vcmp.ge.f32.partialorder %v5208_v14, 0.0  ;;  %v5222_v19 = vmul.f32 0.2, %v5208_v14  ;;  %v5225_v22 = vsel %vm5213_vm2, %v5205_v34, %v5219_v9  ;;  %v5277_v34 = vrot.slane %v5268_v10, %v845_v29 }
 0x2fc   :  { %v5228_v23 = vsel %vm5216_vm3, %v5208_v14, %v5222_v19 }
 0x2fd   :  { %v5231_v27 = vpack.c.bf16 %v5228_v23, %v5225_v22 }
 0x356   :  { %v4626_v37 = vpop.f32.mrb[0].mxu0 }
 0x357   :  { %v6724_v38 = vadd.f32 %v6723_v31, %v4626_v37  ;;  %v4628_v41 = vpop.f32.mrb[1].mxu0 }
 0x358   :  { %v6727_v48 = vadd.f32 %v6726_v36, %v4628_v41  ;;  %v4630_v43 = vpop.f32.mrb[2].mxu0 }
 0x359   :  { %v6725_v44 = vadd.f32 %v6724_v38, %v8931_v13  ;;  %v6730_v45 = vadd.f32 %v6729_v40, %v4630_v43  ;;  %v4632_v46 = vpop.f32.mrb[3].mxu0 }
 0x35a   :  { %v6728_v49 = vadd.f32 %v6727_v48, %v8942_v18  ;;  %v6733_v50 = vadd.f32 %v6732_v42, %v4632_v46  ;;  %v7655_v18 = vld [vmem:[%s9898_s3 + $0x100] ss:$8 sps:$4 sm:$0xff]  }
 0x35b   :  { %v5217_v51 = vmul.f32 0.2, %v6725_v44  ;;  %v6731_v59 = vadd.f32 %v6730_v45, %v8950_v16  ;;  %vm5211_vm4 = vcmp.ge.f32.partialorder %v6725_v44, 0.0  ;;  %v7660_v16 = vld [vmem:[%s9898_s3 + $0x114] ss:$8 sps:$4 sm:$0xff]   ;;  %v5733_v45 = vand.u32 127, %v839_v15 }
 0x35c   :  { %v5218_v60 = vmul.f32 0.2, %v6728_v49  ;;  %v6734_v62 = vadd.f32 %v6733_v50, %v8961_v26  ;;  %vm5212_vm5 = vcmp.ge.f32.partialorder %v6728_v49, 0.0  ;;  %v7658_v26 = vld [vmem:[%s9898_s3 + $0x110] ss:$8 sps:$4 sm:$0xff]  }
 0x35d   :  { %vm5214_vm6 = vcmp.ge.f32.partialorder %v6731_v59, 0.0  ;;  %v5220_v52 = vmul.f32 0.2, %v6731_v59  ;;  %v5223_v54 = vsel %vm5211_vm4, %v6725_v44, %v5217_v51  ;;  %vm5742_vm9 = vcmp.eq.s32.totalorder %v5733_v45, 10 }
 0x35e   :  { %vm5215_vm7 = vcmp.ge.f32.partialorder %v6734_v62, 0.0  ;;  %v5221_v0 = vmul.f32 0.2, %v6734_v62  ;;  %v5224_v13 = vsel %vm5212_vm5, %v6728_v49, %v5218_v60 }
 0x35f   :  { %v5226_v55 = vsel %vm5214_vm6, %v6731_v59, %v5220_v52 }
 0x360   :  { %v5227_v56 = vsel %vm5215_vm7, %v6734_v62, %v5221_v0  ;;  %v5229_v57 = vpack.c.bf16 %v5226_v55, %v5223_v54 }
 0x361   :  { %v5230_v24 = vpack.c.bf16 %v5227_v56, %v5224_v13 }
 0x363   :  { %5496 = vmatprep.mubr.bf16.mxu1 %v5230_v24 }
 0x364   :  { %5497 = vmatmul.mubr.bf16.vlgmr.msra.gmra.mrb[60].mxu1 %v5229_v57 }
 0x365   :  { %5508 = vmatpush1.bf16.msra.mxu1 %v7655_v18  ;;  %5539 = vmatprep.mubr.bf16.mxu1 %v7688_v20  ;;  %v7664_v20 = vld [vmem:[%s9899_s5 + $0x8] sm:$0xff]  }
 0x366   :  { %5509 = vmatprep.subr.bf16.mxu1 %v7660_v16 }
 0x369   :  { %5510 = vmatpush1.bf16.msra.mxu1 %v7658_v26 }
 0x36a   :  { %6689 = vmatprep.subr.bf16.mxu1 %v7661_v58 }
 0x370   :  { %6402 = vmatmul.mubr.msk.bf16.vlgmr.msra.gmra.mrb[60].mxu1 %vm5460_vm8, %v5231_v27 }
 0x371   :  { %6690 = vmatpush3.bf16.msra.mxu1 %v7662_v61 }
 0x372   :  { %6691 = vmatprep.subr.bf16.mxu1 %v7663_v63 }
 0x375   :  { %6692 = vmatpush3.bf16.msra.mxu1 %v7664_v20 }
 0x376   :  { %6693 = vmatprep.subr.bf16.mxu1 %v7665_v30 }
 0x379   :  { %6694 = vmatpush3.bf16.msra.mxu1 %v7666_v1 }
 0x37a   :  { %6695 = vmatprep.subr.bf16.mxu1 %v7667_v47 }
 0x37d   :  { %6696 = vmatpush3.bf16.msra.mxu1 %v7668_v2 }
 0x37e   :  { %6697 = vmatprep.subr.bf16.mxu1 %v7669_v3 }
 0x381   :  { %6698 = vmatpush3.bf16.msra.mxu1 %v7670_v5 }
 0x382   :  { %6699 = vmatprep.subr.bf16.mxu1 %v7671_v6 }
 0x385   :  { %6700 = vmatpush3.bf16.msra.mxu1 %v7672_v7 }
 0x386   :  { %6701 = vmatprep.subr.bf16.mxu1 %v7673_v4 }
 0x389   :  { %6702 = vmatpush3.bf16.msra.mxu1 %v7674_v8 }
 0x38a   :  { %6703 = vmatprep.subr.bf16.mxu1 %v7675_v53 }
 0x38d   :  { %6704 = vmatpush3.bf16.msra.mxu1 %v7676_v21 }
 0x443   :  { %v5541_v39 = vpop.f32.mrb[60].mxu1 }
 0x444   :  { %v6735_v12 = vadd.f32 %v5541_v39, %v5273_v11  ;;  %v5543_v9 = vpop.f32.mrb[61].mxu1 }
 0x445   :  { %v6736_v14 = vadd.f32 %v5543_v9, %v5277_v34  ;;  %v5545_v17 = vpop.f32.mrb[62].mxu1 }
 0x446   :  { %v6737_v19 = vadd.f32 %v5545_v17, %v5273_v11  ;;  %v5547_v22 = vpop.f32.mrb[63].mxu1  ;;  %v5550_v27 = vmax.f32 %v6735_v12, 0.0 }
 0x447   :  { %v6738_v23 = vadd.f32 %v5547_v22, %v5277_v34  ;;  %v5551_v33 = vmax.f32 %v6736_v14, 0.0 }
 0x448   :  { %v5552_v32 = vmax.f32 %v6737_v19, 0.0 }
 0x449   :  { %v5553_v35 = vmax.f32 %v6738_v23, 0.0 }
 0x44a   :  { %v5554_v31 = vpack.c.bf16 %v5552_v32, %v5550_v27 }
 0x44b   :  { %v5555_v36 = vpack.c.bf16 %v5553_v35, %v5551_v33 }
 0x44d   :  { %5723 = vmatprep.mubr.bf16.mxu1 %v5555_v36 }
 0x44e   :  { %5724 = vmatmul.mubr.bf16.vlgmr.msra.gmra.mrb[64].mxu1 %v5554_v31 }
 0x521   :  { %v6705_v28 = vpop.f32.mrb[64].mxu1 }
 0x522   :  { %v6706_v29 = vpop.f32.mrb[65].mxu1 }
 0x523   :  { %v6707_v37 = vadd.f32 %v6706_v29, %v6705_v28  ;;  %v6708_v40 = vpop.f32.mrb[66].mxu1 }
 0x524   :  { %v6709_v38 = vpop.f32.mrb[67].mxu1 }
 0x525   :  { %v5726_v41 = vadd.f32 %v6707_v37, %v6403_v25  ;;  %v6710_v42 = vadd.f32 %v6709_v38, %v6708_v40 }
 0x527   :  { %v5734_v48 = vmul.f32 0.5, %v5726_v41  ;;  %v5729_v43 = vadd.f32 %v6710_v42, %v6403_v25 }
 0x529   :  { %7677 = vtanh.f32 %v5734_v48  ;;  %v5735_v44 = vmul.f32 0.5, %v5729_v43 }
 0x52b   :  { %7679 = vtanh.f32 %v5735_v44 }
 0x533   :  { %v7678_v46 = vpop.eup %7677 }
 0x534   :  { %v5738_v49 = vadd.f32 1.0, %v7678_v46 }
 0x535   :  { %v7680_v50 = vpop.eup %7679 }
 0x536   :  { %v5740_v51 = vmul.f32 0.5, %v5738_v49  ;;  %v5739_v59 = vadd.f32 1.0, %v7680_v50 }
 0x538   :  { %v5743_v60 = vsel %vm5742_vm9, %v5740_v51, %v5726_v41  ;;  %v5741_v62 = vmul.f32 0.5, %v5739_v59 }
 0x539   :  { %5745 = vst [vmem:[%s9902_s7] sm:$0xff] %v5743_v60 }
 0x53a   :  { %v5744_v52 = vsel %vm5742_vm9, %v5741_v62, %v5729_v43 }
 0x53b   :  { %5746 = vst [vmem:[%s9902_s7 + $0x8] sm:$0xff] %v5744_v52 }

</bundles_post_ra>
